<compile_context>
chip_gen: v7x
topology: tpu7x:2x2x1
jax: 0.10.0
libtpu: 0.0.40
codegen_flags: <defaults>
</compile_context>

<pallas_src>
import functools

import jax
import jax.numpy as jnp
from jax import lax
from jax.experimental import pallas as pl
from jax.experimental.pallas import tpu as pltpu

# Explicit scoped-VMEM budget (raised above the 16/32 MiB defaults).
# TODO(synk): re-derive for v7x (64 MiB physical) at production FLAN-T5 sizes:
# single-buffer the constant-index-map weight specs and tile d_ff / Tk.
_VMEM_LIMIT = 64 * 1024 * 1024


# ------------------------------------------------------------------
# In-kernel helpers
# ------------------------------------------------------------------

def _rms_norm(h, ln):
    # T5LayerNorm: RMS only (no mean subtraction, no bias), fp32.
    var = jnp.mean(h * h, axis=-1, keepdims=True)
    return h * lax.rsqrt(var + 1e-6) * ln


def _mha(q_in_bf16, kv_in_bf16, wq_ref, wk_ref, wv_ref, wo_ref, ctx_scr, H, dk):
    """Multi-head attention for one batch element.

    Full-width Q/K/V projections, per-head scores/softmax/ctx at static lane
    offsets (ctx staged through VMEM), then ONE output projection with full
    contraction depth K = H*dk.  T5 semantics: no 1/sqrt(dk) scaling; masks /
    position_bias are None in this configuration -> no score add at all.
    """
    # Lane-dense projections: bf16 MXU inputs, fp32 accumulation.
    q = jnp.dot(q_in_bf16, wq_ref[...], preferred_element_type=jnp.float32)   # (Tq, H*dk)
    k = jnp.dot(kv_in_bf16, wk_ref[...], preferred_element_type=jnp.float32)  # (Tk, H*dk)
    v = jnp.dot(kv_in_bf16, wv_ref[...], preferred_element_type=jnp.float32)  # (Tk, H*dk)

    for hh in range(H):                       # static offsets (compile-time H)
        lo = hh * dk
        qh = q[:, lo:lo + dk].astype(jnp.bfloat16)    # (Tq, dk)
        kh = k[:, lo:lo + dk].astype(jnp.bfloat16)    # (Tk, dk)
        vh = v[:, lo:lo + dk].astype(jnp.bfloat16)    # (Tk, dk)
        # Scores: contract dk directly (no k.T materialized).
        s = lax.dot_general(qh, kh, (((1,), (1,)), ((), ())),
                            preferred_element_type=jnp.float32)               # (Tq, Tk)
        s = s - jnp.max(s, axis=-1, keepdims=True)
        p = jnp.exp(s)
        p = p * pl.reciprocal(jnp.sum(p, axis=-1, keepdims=True), approx=True)
        ctx_scr[:, lo:lo + dk] = jnp.dot(p.astype(jnp.bfloat16), vh,
                                         preferred_element_type=jnp.float32)
    # TODO(synk): at production sizes (H >= 8, long encoder Tk) switch the head
    # loop to lax.fori_loop over a head-major staging buffer and tile Tk with an
    # online-softmax inner loop to bound VMEM / vreg pressure.

    # Single O-projection with full contraction depth K = H*dk.
    return jnp.dot(ctx_scr[...].astype(jnp.bfloat16), wo_ref[...],
                   preferred_element_type=jnp.float32)                         # (Tq, D)


# ------------------------------------------------------------------
# Self-attention sublayer (layer[0]): one grid step == one batch element
# ------------------------------------------------------------------

def _self_attn_kernel(h_ref, ln_ref, wq_ref, wk_ref, wv_ref, wo_ref,
                      o_ref, ctx_scr, *, H, dk):
    h = h_ref[...]                                        # (Tq, D) fp32
    normed = _rms_norm(h, ln_ref[...]).astype(jnp.bfloat16)
    # Self-attention: K/V come from the *normed* hidden (T5 semantics).
    attn = _mha(normed, normed, wq_ref, wk_ref, wv_ref, wo_ref, ctx_scr, H, dk)
    o_ref[...] = h + attn                                 # dropout = identity (eval)


def _attn_flops(Tq, Tk, D, inner):
    return (2 * Tq * D * inner          # Q proj
            + 4 * Tk * D * inner        # K, V proj
            + 4 * Tq * Tk * inner       # scores + ctx
            + 2 * Tq * inner * D)       # O proj


def self_attention_sublayer(hidden, p, *, num_heads, d_kv):
    B, Tq, D = hidden.shape
    inner = num_heads * d_kv
    const = lambda b: (0, 0)
    cost = pl.CostEstimate(
        flops=int(B * _attn_flops(Tq, Tq, D, inner)),
        transcendentals=int(B * num_heads * Tq * Tq),
        bytes_accessed=int(8 * B * Tq * D + 2 * 4 * D * inner + 4 * D))
    out = pl.pallas_call(
        functools.partial(_self_attn_kernel, H=num_heads, dk=d_kv),
        out_shape=jax.ShapeDtypeStruct((B * Tq, D), jnp.float32),
        grid=(B,),
        in_specs=[pl.BlockSpec((Tq, D), lambda b: (b, 0)),
                  pl.BlockSpec((1, D), const),
                  pl.BlockSpec((D, inner), const),
                  pl.BlockSpec((D, inner), const),
                  pl.BlockSpec((D, inner), const),
                  pl.BlockSpec((inner, D), const)],
        out_specs=pl.BlockSpec((Tq, D), lambda b: (b, 0)),
        scratch_shapes=[pltpu.VMEM((Tq, inner), jnp.float32)],
        compiler_params=pltpu.CompilerParams(
            dimension_semantics=("parallel",),
            vmem_limit_bytes=_VMEM_LIMIT),
        cost_estimate=cost,
    )(hidden.reshape(B * Tq, D), p["ln"].reshape(1, D),
      p["wq"], p["wk"], p["wv"], p["wo"])
    return out.reshape(B, Tq, D)


# ------------------------------------------------------------------
# Fused cross-attention sublayers (layer[1] + layer[2]) in ONE pallas_call:
# the residual stream never leaves VMEM between the two attentions.
# ------------------------------------------------------------------

def _cross2_kernel(h_ref, ea_ref, eb_ref,
                   lnA_ref, wqA_ref, wkA_ref, wvA_ref, woA_ref,
                   lnB_ref, wqB_ref, wkB_ref, wvB_ref, woB_ref,
                   o_ref, ctx_scr, *, H, dk):
    h = h_ref[...]                                        # (Tq, D) fp32
    ea = ea_ref[...].astype(jnp.bfloat16)                 # (TkA, D) encoder A (un-normed)
    eb = eb_ref[...].astype(jnp.bfloat16)                 # (TkB, D) encoder B (un-normed)

    nA = _rms_norm(h, lnA_ref[...]).astype(jnp.bfloat16)
    h = h + _mha(nA, ea, wqA_ref, wkA_ref, wvA_ref, woA_ref, ctx_scr, H, dk)

    nB = _rms_norm(h, lnB_ref[...]).astype(jnp.bfloat16)
    h = h + _mha(nB, eb, wqB_ref, wkB_ref, wvB_ref, woB_ref, ctx_scr, H, dk)

    o_ref[...] = h


def cross_attention_sublayers(hidden, encA, encB, pA, pB, *, num_heads, d_kv):
    B, Tq, D = hidden.shape
    TkA, TkB = encA.shape[1], encB.shape[1]
    inner = num_heads * d_kv
    const = lambda b: (0, 0)
    w_spec = pl.BlockSpec((D, inner), const)
    wo_spec = pl.BlockSpec((inner, D), const)
    ln_spec = pl.BlockSpec((1, D), const)
    cost = pl.CostEstimate(
        flops=int(B * (_attn_flops(Tq, TkA, D, inner)
                       + _attn_flops(Tq, TkB, D, inner))),
        transcendentals=int(B * num_heads * Tq * (TkA + TkB)),
        bytes_accessed=int(8 * B * Tq * D + 4 * B * (TkA + TkB) * D
                           + 2 * 2 * 4 * D * inner + 2 * 4 * D))
    out = pl.pallas_call(
        functools.partial(_cross2_kernel, H=num_heads, dk=d_kv),
        out_shape=jax.ShapeDtypeStruct((B * Tq, D), jnp.float32),
        grid=(B,),
        in_specs=[pl.BlockSpec((Tq, D), lambda b: (b, 0)),
                  pl.BlockSpec((TkA, D), lambda b: (b, 0)),
                  pl.BlockSpec((TkB, D), lambda b: (b, 0)),
                  ln_spec, w_spec, w_spec, w_spec, wo_spec,      # cross-attn A
                  ln_spec, w_spec, w_spec, w_spec, wo_spec],     # cross-attn B
        out_specs=pl.BlockSpec((Tq, D), lambda b: (b, 0)),
        scratch_shapes=[pltpu.VMEM((Tq, inner), jnp.float32)],
        compiler_params=pltpu.CompilerParams(
            dimension_semantics=("parallel",),
            vmem_limit_bytes=_VMEM_LIMIT),
        cost_estimate=cost,
    )(hidden.reshape(B * Tq, D),
      encA.reshape(B * TkA, D), encB.reshape(B * TkB, D),
      pA["ln"].reshape(1, D), pA["wq"], pA["wk"], pA["wv"], pA["wo"],
      pB["ln"].reshape(1, D), pB["wq"], pB["wk"], pB["wv"], pB["wo"])
    return out.reshape(B, Tq, D)


# ------------------------------------------------------------------
# Fused gated-gelu FFN sublayer (layer[-1]); grid over large row tiles,
# weights resident (constant index map).
# ------------------------------------------------------------------

def _ffn_kernel(h_ref, ln_ref, wi0_ref, wi1_ref, wo_ref, o_ref):
    h = h_ref[...]                                        # (tile_m, D) fp32
    normed = _rms_norm(h, ln_ref[...]).astype(jnp.bfloat16)
    h0 = jnp.dot(normed, wi0_ref[...], preferred_element_type=jnp.float32)
    h1 = jnp.dot(normed, wi1_ref[...], preferred_element_type=jnp.float32)
    # gelu_new (tanh approximation), fp32 elementwise.
    c = 0.7978845608028654  # sqrt(2/pi)
    g = 0.5 * h0 * (1.0 + jnp.tanh(c * (h0 + 0.044715 * h0 * h0 * h0)))
    gated = (g * h1).astype(jnp.bfloat16)
    o_ref[...] = h + jnp.dot(gated, wo_ref[...], preferred_element_type=jnp.float32)


def ff_sublayer(hidden, p, *, tile_m=256):
    B, T, D = hidden.shape
    M = B * T
    F = p["wi0"].shape[1]
    tile_m = min(tile_m, M)          # >=128 at real sizes; full M at demo size
    assert M % tile_m == 0
    # TODO(synk): at FLAN-T5 XL sizes on v7x, also tile d_ff with a reduction
    # grid axis + fp32 VMEM accumulator and single-buffer the weight specs.
    const = lambda i: (0, 0)
    cost = pl.CostEstimate(
        flops=int(6 * M * D * F),
        transcendentals=int(M * F),
        bytes_accessed=int(8 * M * D + 2 * 3 * D * F + 4 * D))
    out = pl.pallas_call(
        _ffn_kernel,
        out_shape=jax.ShapeDtypeStruct((M, D), jnp.float32),
        grid=(M // tile_m,),
        in_specs=[pl.BlockSpec((tile_m, D), lambda i: (i, 0)),
                  pl.BlockSpec((1, D), const),
                  pl.BlockSpec((D, F), const),
                  pl.BlockSpec((D, F), const),
                  pl.BlockSpec((F, D), const)],
        out_specs=pl.BlockSpec((tile_m, D), lambda i: (i, 0)),
        compiler_params=pltpu.CompilerParams(
            dimension_semantics=("parallel",),
            vmem_limit_bytes=_VMEM_LIMIT),
        cost_estimate=cost,
    )(hidden.reshape(M, D), p["ln"].reshape(1, D), p["wi0"], p["wi1"], p["wo"])
    return out.reshape(B, T, D)


# ------------------------------------------------------------------
# Block forward (glue only; 3 pallas_calls total)
# ------------------------------------------------------------------

def combined_block_2a_forward(hidden_states, params, *,
                              encoder_hidden_statesA,
                              encoder_hidden_statesB,
                              num_heads, d_kv,
                              cache_position=None,   # accepted; unused (no cache)
                              use_cache=False):
    # TODO(synk): attention_mask / position_bias / layer_head_mask /
    # past_key_value / output_attentions branches are not modeled (all None /
    # False in this inference configuration); fp16 clamp is a no-op in fp32.
    h = self_attention_sublayer(hidden_states, params["self_attn"],
                                num_heads=num_heads, d_kv=d_kv)              # layer[0]
    h = cross_attention_sublayers(h, encoder_hidden_statesA,
                                  encoder_hidden_statesB,
                                  params["cross_attn_a"], params["cross_attn_b"],
                                  num_heads=num_heads, d_kv=d_kv)            # layer[1]+[2]
    h = ff_sublayer(h, params["ff"])                                         # layer[-1]
    # use_cache=False, output_attentions=False -> outputs = (hidden_states,)
    return (h,)


# ------------------------------------------------------------------
# Pure-JAX reference with the same precision strategy (bf16 MXU inputs,
# fp32 accumulation, fp32 norm/softmax/gelu) + param init
# ------------------------------------------------------------------

def _ref_rms(x, w):
    var = jnp.mean(x * x, axis=-1, keepdims=True)
    return x * lax.rsqrt(var + 1e-6) * w


def _ref_attn(h, p, H, dk, kv=None):
    B, Tq, D = h.shape
    n = _ref_rms(h, p["ln"])
    kv_in = n if kv is None else kv
    Tk = kv_in.shape[1]
    nb, kb = n.astype(jnp.bfloat16), kv_in.astype(jnp.bfloat16)
    q = jnp.einsum("btd,de->bte", nb, p["wq"], preferred_element_type=jnp.float32)
    k = jnp.einsum("btd,de->bte", kb, p["wk"], preferred_element_type=jnp.float32)
    v = jnp.einsum("btd,de->bte", kb, p["wv"], preferred_element_type=jnp.float32)
    q = q.reshape(B, Tq, H, dk).transpose(0, 2, 1, 3)
    k = k.reshape(B, Tk, H, dk).transpose(0, 2, 1, 3)
    v = v.reshape(B, Tk, H, dk).transpose(0, 2, 1, 3)
    s = jnp.einsum("bhqd,bhkd->bhqk", q.astype(jnp.bfloat16), k.astype(jnp.bfloat16),
                   preferred_element_type=jnp.float32)
    a = jax.nn.softmax(s, axis=-1)
    ctx = jnp.einsum("bhqk,bhkd->bhqd", a.astype(jnp.bfloat16), v.astype(jnp.bfloat16),
                     preferred_element_type=jnp.float32)
    ctx = ctx.transpose(0, 2, 1, 3).reshape(B, Tq, H * dk)
    out = jnp.einsum("bte,ed->btd", ctx.astype(jnp.bfloat16), p["wo"],
                     preferred_element_type=jnp.float32)
    return h + out


def _ref_ff(h, p):
    n = _ref_rms(h, p["ln"]).astype(jnp.bfloat16)
    h0 = jnp.einsum("btd,df->btf", n, p["wi0"], preferred_element_type=jnp.float32)
    h1 = jnp.einsum("btd,df->btf", n, p["wi1"], preferred_element_type=jnp.float32)
    c = 0.7978845608028654
    g = 0.5 * h0 * (1.0 + jnp.tanh(c * (h0 + 0.044715 * h0 ** 3)))
    ff = jnp.einsum("btf,fd->btd", (g * h1).astype(jnp.bfloat16), p["wo"],
                    preferred_element_type=jnp.float32)
    return h + ff


def _ref_forward(h, params, encA, encB, H, dk):
    h = _ref_attn(h, params["self_attn"], H, dk)
    h = _ref_attn(h, params["cross_attn_a"], H, dk, kv=encA)
    h = _ref_attn(h, params["cross_attn_b"], H, dk, kv=encB)
    h = _ref_ff(h, params["ff"])
    return h


def init_params(key, d_model, num_heads, d_kv, d_ff):
    inner = num_heads * d_kv
    ks = iter(jax.random.split(key, 16))

    def lin(in_f, out_f):
        # Weights stored in bf16 (MXU input dtype); accumulation stays fp32.
        return (jax.random.normal(next(ks), (in_f, out_f), jnp.float32)
                * 0.05).astype(jnp.bfloat16)

    def attn_p():
        return {"ln": jnp.ones((d_model,), jnp.float32),
                "wq": lin(d_model, inner), "wk": lin(d_model, inner),
                "wv": lin(d_model, inner), "wo": lin(inner, d_model)}

    return {
        "self_attn": attn_p(),
        "cross_attn_a": attn_p(),
        "cross_attn_b": attn_p(),
        "ff": {"ln": jnp.ones((d_model,), jnp.float32),
               "wi0": lin(d_model, d_ff), "wi1": lin(d_model, d_ff),
               "wo": lin(d_ff, d_model)},
    }


# ------------------------------------------------------------------
if __name__ == "__main__":
    B, Tq, TkA, TkB = 2, 8, 8, 8
    d_model, num_heads, d_kv, d_ff = 32, 4, 8, 64

    root = jax.random.PRNGKey(0)
    kx, ka, kb, kp = jax.random.split(root, 4)
    hidden = jax.random.normal(kx, (B, Tq, d_model), jnp.float32)
    encA = jax.random.normal(ka, (B, TkA, d_model), jnp.float32)
    encB = jax.random.normal(kb, (B, TkB, d_model), jnp.float32)
    params = init_params(kp, d_model, num_heads, d_kv, d_ff)
    cache_position = jnp.arange(Tq)  # accepted for API parity; unused (no cache)

    fwd = jax.jit(functools.partial(
        combined_block_2a_forward,
        encoder_hidden_statesA=encA,
        encoder_hidden_statesB=encB,
        num_heads=num_heads, d_kv=d_kv,
        cache_position=cache_position, use_cache=False))

    (out,) = fwd(hidden, params)
    out = jax.block_until_ready(out)

    ref = _ref_forward(hidden, params, encA, encB, num_heads, d_kv)
    assert out.shape == (B, Tq, d_model)
    max_err = float(jnp.max(jnp.abs(out - ref)))
    assert jnp.allclose(out, ref, atol=3e-3, rtol=3e-3), \
        f"mismatch vs reference, max abs err {max_err}"

    print("KERNEL_OK")
</pallas_src>

<mosaic_0001>
module attributes {stable_mosaic.version = 11 : i64} {
  func.func @_ffn_kernel(%arg0: i32, %arg1: memref<16x32xf32, #tpu.memory_space<vmem>>, %arg2: memref<1x32xf32, #tpu.memory_space<vmem>>, %arg3: memref<32x64xbf16, #tpu.memory_space<vmem>>, %arg4: memref<32x64xbf16, #tpu.memory_space<vmem>>, %arg5: memref<64x32xbf16, #tpu.memory_space<vmem>>, %arg6: memref<16x32xf32, #tpu.memory_space<vmem>>) attributes {dimension_semantics = [#tpu.dimension_semantics<parallel>], iteration_bounds = array<i64: 1>, scalar_prefetch = 0 : i64, scratch_operands = 0 : i64, tpu.core_type = #tpu.core_type<tc>, window_params = [{transform_indices = @transform_0, window_bounds = array<i64: 16, 32>}, {pipeline_mode = #tpu.pipeline_mode<synchronous>, transform_indices = @transform_1, window_bounds = array<i64: 1, 32>}, {pipeline_mode = #tpu.pipeline_mode<synchronous>, transform_indices = @transform_2, window_bounds = array<i64: 32, 64>}, {pipeline_mode = #tpu.pipeline_mode<synchronous>, transform_indices = @transform_3, window_bounds = array<i64: 32, 64>}, {pipeline_mode = #tpu.pipeline_mode<synchronous>, transform_indices = @transform_4, window_bounds = array<i64: 64, 32>}, {transform_indices = @transform_5, window_bounds = array<i64: 16, 32>}]} {
    %c0 = arith.constant 0 : index
    %c0_0 = arith.constant 0 : index
    %0 = vector.load %arg1[%c0, %c0_0] : memref<16x32xf32, #tpu.memory_space<vmem>>, vector<16x32xf32>
    %c0_1 = arith.constant 0 : index
    %c0_2 = arith.constant 0 : index
    %1 = vector.load %arg2[%c0_1, %c0_2] : memref<1x32xf32, #tpu.memory_space<vmem>>, vector<1x32xf32>
    %2 = arith.mulf %0, %0 : vector<16x32xf32>
    %cst = arith.constant dense<0.000000e+00> : vector<16xf32>
    %3 = vector.multi_reduction <add>, %2, %cst [1] : vector<16x32xf32> to vector<16xf32>
    %4 = vector.shape_cast %3 : vector<16xf32> to vector<16x1xf32>
    %cst_3 = arith.constant 3.200000e+01 : f32
    %5 = vector.broadcast %cst_3 : f32 to vector<16x1xf32>
    %6 = arith.divf %4, %5 : vector<16x1xf32>
    %cst_4 = arith.constant 9.99999997E-7 : f32
    %7 = vector.broadcast %cst_4 : f32 to vector<16x1xf32>
    %8 = arith.addf %6, %7 : vector<16x1xf32>
    %9 = math.rsqrt %8 : vector<16x1xf32>
    %10 = vector.broadcast %9 : vector<16x1xf32> to vector<16x32xf32>
    %11 = arith.mulf %0, %10 : vector<16x32xf32>
    %12 = vector.broadcast %1 : vector<1x32xf32> to vector<16x32xf32>
    %13 = arith.mulf %11, %12 : vector<16x32xf32>
    %14 = arith.truncf %13 : vector<16x32xf32> to vector<16x32xbf16>
    %c0_5 = arith.constant 0 : index
    %c0_6 = arith.constant 0 : index
    %15 = vector.load %arg3[%c0_5, %c0_6] : memref<32x64xbf16, #tpu.memory_space<vmem>>, vector<32x64xbf16>
    %cst_7 = arith.constant dense<0.000000e+00> : vector<16x64xf32>
    %16 = tpu.matmul %14, %15, %cst_7 {dimension_numbers = #tpu.dot_dimension_numbers<[1], [0], [0], [1], [0, 0, 1, 1], [], []>} : vector<16x32xbf16>, vector<32x64xbf16>, vector<16x64xf32> -> vector<16x64xf32>
    %c0_8 = arith.constant 0 : index
    %c0_9 = arith.constant 0 : index
    %17 = vector.load %arg4[%c0_8, %c0_9] : memref<32x64xbf16, #tpu.memory_space<vmem>>, vector<32x64xbf16>
    %cst_10 = arith.constant dense<0.000000e+00> : vector<16x64xf32>
    %18 = tpu.matmul %14, %17, %cst_10 {dimension_numbers = #tpu.dot_dimension_numbers<[1], [0], [0], [1], [0, 0, 1, 1], [], []>} : vector<16x32xbf16>, vector<32x64xbf16>, vector<16x64xf32> -> vector<16x64xf32>
    %cst_11 = arith.constant 5.000000e-01 : f32
    %19 = vector.broadcast %cst_11 : f32 to vector<16x64xf32>
    %20 = arith.mulf %19, %16 : vector<16x64xf32>
    %cst_12 = arith.constant 4.471500e-02 : f32
    %21 = vector.broadcast %cst_12 : f32 to vector<16x64xf32>
    %22 = arith.mulf %21, %16 : vector<16x64xf32>
    %23 = arith.mulf %22, %16 : vector<16x64xf32>
    %24 = arith.mulf %23, %16 : vector<16x64xf32>
    %25 = arith.addf %16, %24 : vector<16x64xf32>
    %cst_13 = arith.constant 0.797884583 : f32
    %26 = vector.broadcast %cst_13 : f32 to vector<16x64xf32>
    %27 = arith.mulf %26, %25 : vector<16x64xf32>
    %28 = math.tanh %27 : vector<16x64xf32>
    %cst_14 = arith.constant 1.000000e+00 : f32
    %29 = vector.broadcast %cst_14 : f32 to vector<16x64xf32>
    %30 = arith.addf %29, %28 : vector<16x64xf32>
    %31 = arith.mulf %20, %30 : vector<16x64xf32>
    %32 = arith.mulf %31, %18 : vector<16x64xf32>
    %33 = arith.truncf %32 : vector<16x64xf32> to vector<16x64xbf16>
    %c0_15 = arith.constant 0 : index
    %c0_16 = arith.constant 0 : index
    %34 = vector.load %arg5[%c0_15, %c0_16] : memref<64x32xbf16, #tpu.memory_space<vmem>>, vector<64x32xbf16>
    %cst_17 = arith.constant dense<0.000000e+00> : vector<16x32xf32>
    %35 = tpu.matmul %33, %34, %cst_17 {dimension_numbers = #tpu.dot_dimension_numbers<[1], [0], [0], [1], [0, 0, 1, 1], [], []>} : vector<16x64xbf16>, vector<64x32xbf16>, vector<16x32xf32> -> vector<16x32xf32>
    %36 = arith.addf %0, %35 : vector<16x32xf32>
    %c0_18 = arith.constant 0 : index
    %c0_19 = arith.constant 0 : index
    %37 = vector.load %arg6[%c0_18, %c0_19] : memref<16x32xf32, #tpu.memory_space<vmem>>, vector<16x32xf32>
    tpu.vector_store %arg6[%c0_18, %c0_19], %36 {strides = array<i32>} : memref<16x32xf32, #tpu.memory_space<vmem>>, vector<16x32xf32>,
    return
  }
  func.func @transform_0(%arg0: i32) -> (i32, i32) {
    %c0_i32 = arith.constant 0 : i32
    %c0_i32_0 = arith.constant 0 : i32
    return %arg0, %c0_i32 : i32, i32
  }
  func.func @transform_1(%arg0: i32) -> (i32, i32) {
    %c0_i32 = arith.constant 0 : i32
    %c0_i32_0 = arith.constant 0 : i32
    %c0_i32_1 = arith.constant 0 : i32
    return %c0_i32, %c0_i32_0 : i32, i32
  }
  func.func @transform_2(%arg0: i32) -> (i32, i32) {
    %c0_i32 = arith.constant 0 : i32
    %c0_i32_0 = arith.constant 0 : i32
    %c0_i32_1 = arith.constant 0 : i32
    return %c0_i32, %c0_i32_0 : i32, i32
  }
  func.func @transform_3(%arg0: i32) -> (i32, i32) {
    %c0_i32 = arith.constant 0 : i32
    %c0_i32_0 = arith.constant 0 : i32
    %c0_i32_1 = arith.constant 0 : i32
    return %c0_i32, %c0_i32_0 : i32, i32
  }
  func.func @transform_4(%arg0: i32) -> (i32, i32) {
    %c0_i32 = arith.constant 0 : i32
    %c0_i32_0 = arith.constant 0 : i32
    %c0_i32_1 = arith.constant 0 : i32
    return %c0_i32, %c0_i32_0 : i32, i32
  }
  func.func @transform_5(%arg0: i32) -> (i32, i32) {
    %c0_i32 = arith.constant 0 : i32
    %c0_i32_0 = arith.constant 0 : i32
    return %arg0, %c0_i32 : i32, i32
  }
}

module attributes {stable_mosaic.version = 11 : i64} {
  func.func @_self_attn_kernel(%arg0: i32, %arg1: memref<8x32xf32, #tpu.memory_space<vmem>>, %arg2: memref<1x32xf32, #tpu.memory_space<vmem>>, %arg3: memref<32x32xbf16, #tpu.memory_space<vmem>>, %arg4: memref<32x32xbf16, #tpu.memory_space<vmem>>, %arg5: memref<32x32xbf16, #tpu.memory_space<vmem>>, %arg6: memref<32x32xbf16, #tpu.memory_space<vmem>>, %arg7: memref<8x32xf32, #tpu.memory_space<vmem>>, %arg8: memref<8x32xf32, #tpu.memory_space<vmem>>) attributes {dimension_semantics = [#tpu.dimension_semantics<parallel>], iteration_bounds = array<i64: 2>, scalar_prefetch = 0 : i64, scratch_operands = 1 : i64, tpu.core_type = #tpu.core_type<tc>, window_params = [{transform_indices = @transform_0, window_bounds = array<i64: 8, 32>}, {pipeline_mode = #tpu.pipeline_mode<synchronous>, transform_indices = @transform_1, window_bounds = array<i64: 1, 32>}, {pipeline_mode = #tpu.pipeline_mode<synchronous>, transform_indices = @transform_2, window_bounds = array<i64: 32, 32>}, {pipeline_mode = #tpu.pipeline_mode<synchronous>, transform_indices = @transform_3, window_bounds = array<i64: 32, 32>}, {pipeline_mode = #tpu.pipeline_mode<synchronous>, transform_indices = @transform_4, window_bounds = array<i64: 32, 32>}, {pipeline_mode = #tpu.pipeline_mode<synchronous>, transform_indices = @transform_5, window_bounds = array<i64: 32, 32>}, {transform_indices = @transform_6, window_bounds = array<i64: 8, 32>}]} {
    %c0 = arith.constant 0 : index
    %c0_0 = arith.constant 0 : index
    %0 = vector.load %arg1[%c0, %c0_0] : memref<8x32xf32, #tpu.memory_space<vmem>>, vector<8x32xf32>
    %c0_1 = arith.constant 0 : index
    %c0_2 = arith.constant 0 : index
    %1 = vector.load %arg2[%c0_1, %c0_2] : memref<1x32xf32, #tpu.memory_space<vmem>>, vector<1x32xf32>
    %2 = arith.mulf %0, %0 : vector<8x32xf32>
    %cst = arith.constant dense<0.000000e+00> : vector<8xf32>
    %3 = vector.multi_reduction <add>, %2, %cst [1] : vector<8x32xf32> to vector<8xf32>
    %4 = vector.shape_cast %3 : vector<8xf32> to vector<8x1xf32>
    %cst_3 = arith.constant 3.200000e+01 : f32
    %5 = vector.broadcast %cst_3 : f32 to vector<8x1xf32>
    %6 = arith.divf %4, %5 : vector<8x1xf32>
    %cst_4 = arith.constant 9.99999997E-7 : f32
    %7 = vector.broadcast %cst_4 : f32 to vector<8x1xf32>
    %8 = arith.addf %6, %7 : vector<8x1xf32>
    %9 = math.rsqrt %8 : vector<8x1xf32>
    %10 = vector.broadcast %9 : vector<8x1xf32> to vector<8x32xf32>
    %11 = arith.mulf %0, %10 : vector<8x32xf32>
    %12 = vector.broadcast %1 : vector<1x32xf32> to vector<8x32xf32>
    %13 = arith.mulf %11, %12 : vector<8x32xf32>
    %14 = arith.truncf %13 : vector<8x32xf32> to vector<8x32xbf16>
    %c0_5 = arith.constant 0 : index
    %c0_6 = arith.constant 0 : index
    %15 = vector.load %arg3[%c0_5, %c0_6] : memref<32x32xbf16, #tpu.memory_space<vmem>>, vector<32x32xbf16>
    %cst_7 = arith.constant dense<0.000000e+00> : vector<8x32xf32>
    %16 = tpu.matmul %14, %15, %cst_7 {dimension_numbers = #tpu.dot_dimension_numbers<[1], [0], [0], [1], [0, 0, 1, 1], [], []>} : vector<8x32xbf16>, vector<32x32xbf16>, vector<8x32xf32> -> vector<8x32xf32>
    %c0_8 = arith.constant 0 : index
    %c0_9 = arith.constant 0 : index
    %17 = vector.load %arg4[%c0_8, %c0_9] : memref<32x32xbf16, #tpu.memory_space<vmem>>, vector<32x32xbf16>
    %cst_10 = arith.constant dense<0.000000e+00> : vector<8x32xf32>
    %18 = tpu.matmul %14, %17, %cst_10 {dimension_numbers = #tpu.dot_dimension_numbers<[1], [0], [0], [1], [0, 0, 1, 1], [], []>} : vector<8x32xbf16>, vector<32x32xbf16>, vector<8x32xf32> -> vector<8x32xf32>
    %c0_11 = arith.constant 0 : index
    %c0_12 = arith.constant 0 : index
    %19 = vector.load %arg5[%c0_11, %c0_12] : memref<32x32xbf16, #tpu.memory_space<vmem>>, vector<32x32xbf16>
    %cst_13 = arith.constant dense<0.000000e+00> : vector<8x32xf32>
    %20 = tpu.matmul %14, %19, %cst_13 {dimension_numbers = #tpu.dot_dimension_numbers<[1], [0], [0], [1], [0, 0, 1, 1], [], []>} : vector<8x32xbf16>, vector<32x32xbf16>, vector<8x32xf32> -> vector<8x32xf32>
    %21 = vector.extract_strided_slice %16 {offsets = [0, 0], sizes = [8, 8], strides = [1, 1]} : vector<8x32xf32> to vector<8x8xf32>
    %22 = arith.truncf %21 : vector<8x8xf32> to vector<8x8xbf16>
    %23 = vector.extract_strided_slice %18 {offsets = [0, 0], sizes = [8, 8], strides = [1, 1]} : vector<8x32xf32> to vector<8x8xf32>
    %24 = arith.truncf %23 : vector<8x8xf32> to vector<8x8xbf16>
    %25 = vector.extract_strided_slice %20 {offsets = [0, 0], sizes = [8, 8], strides = [1, 1]} : vector<8x32xf32> to vector<8x8xf32>
    %26 = arith.truncf %25 : vector<8x8xf32> to vector<8x8xbf16>
    %cst_14 = arith.constant dense<0.000000e+00> : vector<8x8xf32>
    %27 = tpu.matmul %22, %24, %cst_14 {dimension_numbers = #tpu.dot_dimension_numbers<[1], [1], [0], [0], [0, 0, 1, 0], [], []>} : vector<8x8xbf16>, vector<8x8xbf16>, vector<8x8xf32> -> vector<8x8xf32>
    %cst_15 = arith.constant dense<0xFF800000> : vector<8xf32>
    %28 = vector.multi_reduction <maximumf>, %27, %cst_15 [1] : vector<8x8xf32> to vector<8xf32>
    %29 = vector.shape_cast %28 : vector<8xf32> to vector<8x1xf32>
    %30 = vector.broadcast %29 : vector<8x1xf32> to vector<8x8xf32>
    %31 = arith.subf %27, %30 : vector<8x8xf32>
    %32 = math.exp %31 : vector<8x8xf32>
    %cst_16 = arith.constant dense<0.000000e+00> : vector<8xf32>
    %33 = vector.multi_reduction <add>, %32, %cst_16 [1] : vector<8x8xf32> to vector<8xf32>
    %34 = vector.shape_cast %33 : vector<8xf32> to vector<8x1xf32>
    %35 = tpu.reciprocal %34 {approx = true} : vector<8x1xf32> -> vector<8x1xf32>
    %36 = vector.broadcast %35 : vector<8x1xf32> to vector<8x8xf32>
    %37 = arith.mulf %32, %36 : vector<8x8xf32>
    %38 = arith.truncf %37 : vector<8x8xf32> to vector<8x8xbf16>
    %cst_17 = arith.constant dense<0.000000e+00> : vector<8x8xf32>
    %39 = tpu.matmul %38, %26, %cst_17 {dimension_numbers = #tpu.dot_dimension_numbers<[1], [0], [0], [1], [0, 0, 1, 1], [], []>} : vector<8x8xbf16>, vector<8x8xbf16>, vector<8x8xf32> -> vector<8x8xf32>
    %c0_18 = arith.constant 0 : index
    %c0_19 = arith.constant 0 : index
    %40 = vector.load %arg8[%c0_18, %c0_19] : memref<8x32xf32, #tpu.memory_space<vmem>>, vector<8x8xf32>
    tpu.vector_store %arg8[%c0_18, %c0_19], %39 {strides = array<i32>} : memref<8x32xf32, #tpu.memory_space<vmem>>, vector<8x8xf32>,
    %41 = vector.extract_strided_slice %16 {offsets = [0, 8], sizes = [8, 8], strides = [1, 1]} : vector<8x32xf32> to vector<8x8xf32>
    %42 = arith.truncf %41 : vector<8x8xf32> to vector<8x8xbf16>
    %43 = vector.extract_strided_slice %18 {offsets = [0, 8], sizes = [8, 8], strides = [1, 1]} : vector<8x32xf32> to vector<8x8xf32>
    %44 = arith.truncf %43 : vector<8x8xf32> to vector<8x8xbf16>
    %45 = vector.extract_strided_slice %20 {offsets = [0, 8], sizes = [8, 8], strides = [1, 1]} : vector<8x32xf32> to vector<8x8xf32>
    %46 = arith.truncf %45 : vector<8x8xf32> to vector<8x8xbf16>
    %cst_20 = arith.constant dense<0.000000e+00> : vector<8x8xf32>
    %47 = tpu.matmul %42, %44, %cst_20 {dimension_numbers = #tpu.dot_dimension_numbers<[1], [1], [0], [0], [0, 0, 1, 0], [], []>} : vector<8x8xbf16>, vector<8x8xbf16>, vector<8x8xf32> -> vector<8x8xf32>
    %cst_21 = arith.constant dense<0xFF800000> : vector<8xf32>
    %48 = vector.multi_reduction <maximumf>, %47, %cst_21 [1] : vector<8x8xf32> to vector<8xf32>
    %49 = vector.shape_cast %48 : vector<8xf32> to vector<8x1xf32>
    %50 = vector.broadcast %49 : vector<8x1xf32> to vector<8x8xf32>
    %51 = arith.subf %47, %50 : vector<8x8xf32>
    %52 = math.exp %51 : vector<8x8xf32>
    %cst_22 = arith.constant dense<0.000000e+00> : vector<8xf32>
    %53 = vector.multi_reduction <add>, %52, %cst_22 [1] : vector<8x8xf32> to vector<8xf32>
    %54 = vector.shape_cast %53 : vector<8xf32> to vector<8x1xf32>
    %55 = tpu.reciprocal %54 {approx = true} : vector<8x1xf32> -> vector<8x1xf32>
    %56 = vector.broadcast %55 : vector<8x1xf32> to vector<8x8xf32>
    %57 = arith.mulf %52, %56 : vector<8x8xf32>
    %58 = arith.truncf %57 : vector<8x8xf32> to vector<8x8xbf16>
    %cst_23 = arith.constant dense<0.000000e+00> : vector<8x8xf32>
    %59 = tpu.matmul %58, %46, %cst_23 {dimension_numbers = #tpu.dot_dimension_numbers<[1], [0], [0], [1], [0, 0, 1, 1], [], []>} : vector<8x8xbf16>, vector<8x8xbf16>, vector<8x8xf32> -> vector<8x8xf32>
    %c0_24 = arith.constant 0 : index
    %c8 = arith.constant 8 : index
    %60 = vector.load %arg8[%c0_24, %c8] : memref<8x32xf32, #tpu.memory_space<vmem>>, vector<8x8xf32>
    tpu.vector_store %arg8[%c0_24, %c8], %59 {strides = array<i32>} : memref<8x32xf32, #tpu.memory_space<vmem>>, vector<8x8xf32>,
    %61 = vector.extract_strided_slice %16 {offsets = [0, 16], sizes = [8, 8], strides = [1, 1]} : vector<8x32xf32> to vector<8x8xf32>
    %62 = arith.truncf %61 : vector<8x8xf32> to vector<8x8xbf16>
    %63 = vector.extract_strided_slice %18 {offsets = [0, 16], sizes = [8, 8], strides = [1, 1]} : vector<8x32xf32> to vector<8x8xf32>
    %64 = arith.truncf %63 : vector<8x8xf32> to vector<8x8xbf16>
    %65 = vector.extract_strided_slice %20 {offsets = [0, 16], sizes = [8, 8], strides = [1, 1]} : vector<8x32xf32> to vector<8x8xf32>
    %66 = arith.truncf %65 : vector<8x8xf32> to vector<8x8xbf16>
    %cst_25 = arith.constant dense<0.000000e+00> : vector<8x8xf32>
    %67 = tpu.matmul %62, %64, %cst_25 {dimension_numbers = #tpu.dot_dimension_numbers<[1], [1], [0], [0], [0, 0, 1, 0], [], []>} : vector<8x8xbf16>, vector<8x8xbf16>, vector<8x8xf32> -> vector<8x8xf32>
    %cst_26 = arith.constant dense<0xFF800000> : vector<8xf32>
    %68 = vector.multi_reduction <maximumf>, %67, %cst_26 [1] : vector<8x8xf32> to vector<8xf32>
    %69 = vector.shape_cast %68 : vector<8xf32> to vector<8x1xf32>
    %70 = vector.broadcast %69 : vector<8x1xf32> to vector<8x8xf32>
    %71 = arith.subf %67, %70 : vector<8x8xf32>
    %72 = math.exp %71 : vector<8x8xf32>
    %cst_27 = arith.constant dense<0.000000e+00> : vector<8xf32>
    %73 = vector.multi_reduction <add>, %72, %cst_27 [1] : vector<8x8xf32> to vector<8xf32>
    %74 = vector.shape_cast %73 : vector<8xf32> to vector<8x1xf32>
    %75 = tpu.reciprocal %74 {approx = true} : vector<8x1xf32> -> vector<8x1xf32>
    %76 = vector.broadcast %75 : vector<8x1xf32> to vector<8x8xf32>
    %77 = arith.mulf %72, %76 : vector<8x8xf32>
    %78 = arith.truncf %77 : vector<8x8xf32> to vector<8x8xbf16>
    %cst_28 = arith.constant dense<0.000000e+00> : vector<8x8xf32>
    %79 = tpu.matmul %78, %66, %cst_28 {dimension_numbers = #tpu.dot_dimension_numbers<[1], [0], [0], [1], [0, 0, 1, 1], [], []>} : vector<8x8xbf16>, vector<8x8xbf16>, vector<8x8xf32> -> vector<8x8xf32>
    %c0_29 = arith.constant 0 : index
    %c16 = arith.constant 16 : index
    %80 = vector.load %arg8[%c0_29, %c16] : memref<8x32xf32, #tpu.memory_space<vmem>>, vector<8x8xf32>
    tpu.vector_store %arg8[%c0_29, %c16], %79 {strides = array<i32>} : memref<8x32xf32, #tpu.memory_space<vmem>>, vector<8x8xf32>,
    %81 = vector.extract_strided_slice %16 {offsets = [0, 24], sizes = [8, 8], strides = [1, 1]} : vector<8x32xf32> to vector<8x8xf32>
    %82 = arith.truncf %81 : vector<8x8xf32> to vector<8x8xbf16>
    %83 = vector.extract_strided_slice %18 {offsets = [0, 24], sizes = [8, 8], strides = [1, 1]} : vector<8x32xf32> to vector<8x8xf32>
    %84 = arith.truncf %83 : vector<8x8xf32> to vector<8x8xbf16>
    %85 = vector.extract_strided_slice %20 {offsets = [0, 24], sizes = [8, 8], strides = [1, 1]} : vector<8x32xf32> to vector<8x8xf32>
    %86 = arith.truncf %85 : vector<8x8xf32> to vector<8x8xbf16>
    %cst_30 = arith.constant dense<0.000000e+00> : vector<8x8xf32>
    %87 = tpu.matmul %82, %84, %cst_30 {dimension_numbers = #tpu.dot_dimension_numbers<[1], [1], [0], [0], [0, 0, 1, 0], [], []>} : vector<8x8xbf16>, vector<8x8xbf16>, vector<8x8xf32> -> vector<8x8xf32>
    %cst_31 = arith.constant dense<0xFF800000> : vector<8xf32>
    %88 = vector.multi_reduction <maximumf>, %87, %cst_31 [1] : vector<8x8xf32> to vector<8xf32>
    %89 = vector.shape_cast %88 : vector<8xf32> to vector<8x1xf32>
    %90 = vector.broadcast %89 : vector<8x1xf32> to vector<8x8xf32>
    %91 = arith.subf %87, %90 : vector<8x8xf32>
    %92 = math.exp %91 : vector<8x8xf32>
    %cst_32 = arith.constant dense<0.000000e+00> : vector<8xf32>
    %93 = vector.multi_reduction <add>, %92, %cst_32 [1] : vector<8x8xf32> to vector<8xf32>
    %94 = vector.shape_cast %93 : vector<8xf32> to vector<8x1xf32>
    %95 = tpu.reciprocal %94 {approx = true} : vector<8x1xf32> -> vector<8x1xf32>
    %96 = vector.broadcast %95 : vector<8x1xf32> to vector<8x8xf32>
    %97 = arith.mulf %92, %96 : vector<8x8xf32>
    %98 = arith.truncf %97 : vector<8x8xf32> to vector<8x8xbf16>
    %cst_33 = arith.constant dense<0.000000e+00> : vector<8x8xf32>
    %99 = tpu.matmul %98, %86, %cst_33 {dimension_numbers = #tpu.dot_dimension_numbers<[1], [0], [0], [1], [0, 0, 1, 1], [], []>} : vector<8x8xbf16>, vector<8x8xbf16>, vector<8x8xf32> -> vector<8x8xf32>
    %c0_34 = arith.constant 0 : index
    %c24 = arith.constant 24 : index
    %100 = vector.load %arg8[%c0_34, %c24] : memref<8x32xf32, #tpu.memory_space<vmem>>, vector<8x8xf32>
    tpu.vector_store %arg8[%c0_34, %c24], %99 {strides = array<i32>} : memref<8x32xf32, #tpu.memory_space<vmem>>, vector<8x8xf32>,
    %c0_35 = arith.constant 0 : index
    %c0_36 = arith.constant 0 : index
    %101 = vector.load %arg8[%c0_35, %c0_36] : memref<8x32xf32, #tpu.memory_space<vmem>>, vector<8x32xf32>
    %102 = arith.truncf %101 : vector<8x32xf32> to vector<8x32xbf16>
    %c0_37 = arith.constant 0 : index
    %c0_38 = arith.constant 0 : index
    %103 = vector.load %arg6[%c0_37, %c0_38] : memref<32x32xbf16, #tpu.memory_space<vmem>>, vector<32x32xbf16>
    %cst_39 = arith.constant dense<0.000000e+00> : vector<8x32xf32>
    %104 = tpu.matmul %102, %103, %cst_39 {dimension_numbers = #tpu.dot_dimension_numbers<[1], [0], [0], [1], [0, 0, 1, 1], [], []>} : vector<8x32xbf16>, vector<32x32xbf16>, vector<8x32xf32> -> vector<8x32xf32>
    %105 = arith.addf %0, %104 : vector<8x32xf32>
    %c0_40 = arith.constant 0 : index
    %c0_41 = arith.constant 0 : index
    %106 = vector.load %arg7[%c0_40, %c0_41] : memref<8x32xf32, #tpu.memory_space<vmem>>, vector<8x32xf32>
    tpu.vector_store %arg7[%c0_40, %c0_41], %105 {strides = array<i32>} : memref<8x32xf32, #tpu.memory_space<vmem>>, vector<8x32xf32>,
    return
  }
  func.func @transform_0(%arg0: i32) -> (i32, i32) {
    %c0_i32 = arith.constant 0 : i32
    %c0_i32_0 = arith.constant 0 : i32
    return %arg0, %c0_i32 : i32, i32
  }
  func.func @transform_1(%arg0: i32) -> (i32, i32) {
    %c0_i32 = arith.constant 0 : i32
    %c0_i32_0 = arith.constant 0 : i32
    %c0_i32_1 = arith.constant 0 : i32
    return %c0_i32, %c0_i32_0 : i32, i32
  }
  func.func @transform_2(%arg0: i32) -> (i32, i32) {
    %c0_i32 = arith.constant 0 : i32
    %c0_i32_0 = arith.constant 0 : i32
    %c0_i32_1 = arith.constant 0 : i32
    return %c0_i32, %c0_i32_0 : i32, i32
  }
  func.func @transform_3(%arg0: i32) -> (i32, i32) {
    %c0_i32 = arith.constant 0 : i32
    %c0_i32_0 = arith.constant 0 : i32
    %c0_i32_1 = arith.constant 0 : i32
    return %c0_i32, %c0_i32_0 : i32, i32
  }
  func.func @transform_4(%arg0: i32) -> (i32, i32) {
    %c0_i32 = arith.constant 0 : i32
    %c0_i32_0 = arith.constant 0 : i32
    %c0_i32_1 = arith.constant 0 : i32
    return %c0_i32, %c0_i32_0 : i32, i32
  }
  func.func @transform_5(%arg0: i32) -> (i32, i32) {
    %c0_i32 = arith.constant 0 : i32
    %c0_i32_0 = arith.constant 0 : i32
    %c0_i32_1 = arith.constant 0 : i32
    return %c0_i32, %c0_i32_0 : i32, i32
  }
  func.func @transform_6(%arg0: i32) -> (i32, i32) {
    %c0_i32 = arith.constant 0 : i32
    %c0_i32_0 = arith.constant 0 : i32
    return %arg0, %c0_i32 : i32, i32
  }
}

module attributes {stable_mosaic.version = 11 : i64} {
  func.func @_cross2_kernel(%arg0: i32, %arg1: memref<8x32xf32, #tpu.memory_space<vmem>>, %arg2: memref<8x32xf32, #tpu.memory_space<vmem>>, %arg3: memref<8x32xf32, #tpu.memory_space<vmem>>, %arg4: memref<1x32xf32, #tpu.memory_space<vmem>>, %arg5: memref<32x32xbf16, #tpu.memory_space<vmem>>, %arg6: memref<32x32xbf16, #tpu.memory_space<vmem>>, %arg7: memref<32x32xbf16, #tpu.memory_space<vmem>>, %arg8: memref<32x32xbf16, #tpu.memory_space<vmem>>, %arg9: memref<1x32xf32, #tpu.memory_space<vmem>>, %arg10: memref<32x32xbf16, #tpu.memory_space<vmem>>, %arg11: memref<32x32xbf16, #tpu.memory_space<vmem>>, %arg12: memref<32x32xbf16, #tpu.memory_space<vmem>>, %arg13: memref<32x32xbf16, #tpu.memory_space<vmem>>, %arg14: memref<8x32xf32, #tpu.memory_space<vmem>>, %arg15: memref<8x32xf32, #tpu.memory_space<vmem>>) attributes {dimension_semantics = [#tpu.dimension_semantics<parallel>], iteration_bounds = array<i64: 2>, scalar_prefetch = 0 : i64, scratch_operands = 1 : i64, tpu.core_type = #tpu.core_type<tc>, window_params = [{transform_indices = @transform_0, window_bounds = array<i64: 8, 32>}, {transform_indices = @transform_1, window_bounds = array<i64: 8, 32>}, {transform_indices = @transform_2, window_bounds = array<i64: 8, 32>}, {pipeline_mode = #tpu.pipeline_mode<synchronous>, transform_indices = @transform_3, window_bounds = array<i64: 1, 32>}, {pipeline_mode = #tpu.pipeline_mode<synchronous>, transform_indices = @transform_4, window_bounds = array<i64: 32, 32>}, {pipeline_mode = #tpu.pipeline_mode<synchronous>, transform_indices = @transform_5, window_bounds = array<i64: 32, 32>}, {pipeline_mode = #tpu.pipeline_mode<synchronous>, transform_indices = @transform_6, window_bounds = array<i64: 32, 32>}, {pipeline_mode = #tpu.pipeline_mode<synchronous>, transform_indices = @transform_7, window_bounds = array<i64: 32, 32>}, {pipeline_mode = #tpu.pipeline_mode<synchronous>, transform_indices = @transform_8, window_bounds = array<i64: 1, 32>}, {pipeline_mode = #tpu.pipeline_mode<synchronous>, transform_indices = @transform_9, window_bounds = array<i64: 32, 32>}, {pipeline_mode = #tpu.pipeline_mode<synchronous>, transform_indices = @transform_10, window_bounds = array<i64: 32, 32>}, {pipeline_mode = #tpu.pipeline_mode<synchronous>, transform_indices = @transform_11, window_bounds = array<i64: 32, 32>}, {pipeline_mode = #tpu.pipeline_mode<synchronous>, transform_indices = @transform_12, window_bounds = array<i64: 32, 32>}, {transform_indices = @transform_13, window_bounds = array<i64: 8, 32>}]} {
    %c0 = arith.constant 0 : index
    %c0_0 = arith.constant 0 : index
    %0 = vector.load %arg1[%c0, %c0_0] : memref<8x32xf32, #tpu.memory_space<vmem>>, vector<8x32xf32>
    %c0_1 = arith.constant 0 : index
    %c0_2 = arith.constant 0 : index
    %1 = vector.load %arg2[%c0_1, %c0_2] : memref<8x32xf32, #tpu.memory_space<vmem>>, vector<8x32xf32>
    %2 = arith.truncf %1 : vector<8x32xf32> to vector<8x32xbf16>
    %c0_3 = arith.constant 0 : index
    %c0_4 = arith.constant 0 : index
    %3 = vector.load %arg3[%c0_3, %c0_4] : memref<8x32xf32, #tpu.memory_space<vmem>>, vector<8x32xf32>
    %4 = arith.truncf %3 : vector<8x32xf32> to vector<8x32xbf16>
    %c0_5 = arith.constant 0 : index
    %c0_6 = arith.constant 0 : index
    %5 = vector.load %arg4[%c0_5, %c0_6] : memref<1x32xf32, #tpu.memory_space<vmem>>, vector<1x32xf32>
    %6 = arith.mulf %0, %0 : vector<8x32xf32>
    %cst = arith.constant dense<0.000000e+00> : vector<8xf32>
    %7 = vector.multi_reduction <add>, %6, %cst [1] : vector<8x32xf32> to vector<8xf32>
    %8 = vector.shape_cast %7 : vector<8xf32> to vector<8x1xf32>
    %cst_7 = arith.constant 3.200000e+01 : f32
    %9 = vector.broadcast %cst_7 : f32 to vector<8x1xf32>
    %10 = arith.divf %8, %9 : vector<8x1xf32>
    %cst_8 = arith.constant 9.99999997E-7 : f32
    %11 = vector.broadcast %cst_8 : f32 to vector<8x1xf32>
    %12 = arith.addf %10, %11 : vector<8x1xf32>
    %13 = math.rsqrt %12 : vector<8x1xf32>
    %14 = vector.broadcast %13 : vector<8x1xf32> to vector<8x32xf32>
    %15 = arith.mulf %0, %14 : vector<8x32xf32>
    %16 = vector.broadcast %5 : vector<1x32xf32> to vector<8x32xf32>
    %17 = arith.mulf %15, %16 : vector<8x32xf32>
    %18 = arith.truncf %17 : vector<8x32xf32> to vector<8x32xbf16>
    %c0_9 = arith.constant 0 : index
    %c0_10 = arith.constant 0 : index
    %19 = vector.load %arg5[%c0_9, %c0_10] : memref<32x32xbf16, #tpu.memory_space<vmem>>, vector<32x32xbf16>
    %cst_11 = arith.constant dense<0.000000e+00> : vector<8x32xf32>
    %20 = tpu.matmul %18, %19, %cst_11 {dimension_numbers = #tpu.dot_dimension_numbers<[1], [0], [0], [1], [0, 0, 1, 1], [], []>} : vector<8x32xbf16>, vector<32x32xbf16>, vector<8x32xf32> -> vector<8x32xf32>
    %c0_12 = arith.constant 0 : index
    %c0_13 = arith.constant 0 : index
    %21 = vector.load %arg6[%c0_12, %c0_13] : memref<32x32xbf16, #tpu.memory_space<vmem>>, vector<32x32xbf16>
    %cst_14 = arith.constant dense<0.000000e+00> : vector<8x32xf32>
    %22 = tpu.matmul %2, %21, %cst_14 {dimension_numbers = #tpu.dot_dimension_numbers<[1], [0], [0], [1], [0, 0, 1, 1], [], []>} : vector<8x32xbf16>, vector<32x32xbf16>, vector<8x32xf32> -> vector<8x32xf32>
    %c0_15 = arith.constant 0 : index
    %c0_16 = arith.constant 0 : index
    %23 = vector.load %arg7[%c0_15, %c0_16] : memref<32x32xbf16, #tpu.memory_space<vmem>>, vector<32x32xbf16>
    %cst_17 = arith.constant dense<0.000000e+00> : vector<8x32xf32>
    %24 = tpu.matmul %2, %23, %cst_17 {dimension_numbers = #tpu.dot_dimension_numbers<[1], [0], [0], [1], [0, 0, 1, 1], [], []>} : vector<8x32xbf16>, vector<32x32xbf16>, vector<8x32xf32> -> vector<8x32xf32>
    %25 = vector.extract_strided_slice %20 {offsets = [0, 0], sizes = [8, 8], strides = [1, 1]} : vector<8x32xf32> to vector<8x8xf32>
    %26 = arith.truncf %25 : vector<8x8xf32> to vector<8x8xbf16>
    %27 = vector.extract_strided_slice %22 {offsets = [0, 0], sizes = [8, 8], strides = [1, 1]} : vector<8x32xf32> to vector<8x8xf32>
    %28 = arith.truncf %27 : vector<8x8xf32> to vector<8x8xbf16>
    %29 = vector.extract_strided_slice %24 {offsets = [0, 0], sizes = [8, 8], strides = [1, 1]} : vector<8x32xf32> to vector<8x8xf32>
    %30 = arith.truncf %29 : vector<8x8xf32> to vector<8x8xbf16>
    %cst_18 = arith.constant dense<0.000000e+00> : vector<8x8xf32>
    %31 = tpu.matmul %26, %28, %cst_18 {dimension_numbers = #tpu.dot_dimension_numbers<[1], [1], [0], [0], [0, 0, 1, 0], [], []>} : vector<8x8xbf16>, vector<8x8xbf16>, vector<8x8xf32> -> vector<8x8xf32>
    %cst_19 = arith.constant dense<0xFF800000> : vector<8xf32>
    %32 = vector.multi_reduction <maximumf>, %31, %cst_19 [1] : vector<8x8xf32> to vector<8xf32>
    %33 = vector.shape_cast %32 : vector<8xf32> to vector<8x1xf32>
    %34 = vector.broadcast %33 : vector<8x1xf32> to vector<8x8xf32>
    %35 = arith.subf %31, %34 : vector<8x8xf32>
    %36 = math.exp %35 : vector<8x8xf32>
    %cst_20 = arith.constant dense<0.000000e+00> : vector<8xf32>
    %37 = vector.multi_reduction <add>, %36, %cst_20 [1] : vector<8x8xf32> to vector<8xf32>
    %38 = vector.shape_cast %37 : vector<8xf32> to vector<8x1xf32>
    %39 = tpu.reciprocal %38 {approx = true} : vector<8x1xf32> -> vector<8x1xf32>
    %40 = vector.broadcast %39 : vector<8x1xf32> to vector<8x8xf32>
    %41 = arith.mulf %36, %40 : vector<8x8xf32>
    %42 = arith.truncf %41 : vector<8x8xf32> to vector<8x8xbf16>
    %cst_21 = arith.constant dense<0.000000e+00> : vector<8x8xf32>
    %43 = tpu.matmul %42, %30, %cst_21 {dimension_numbers = #tpu.dot_dimension_numbers<[1], [0], [0], [1], [0, 0, 1, 1], [], []>} : vector<8x8xbf16>, vector<8x8xbf16>, vector<8x8xf32> -> vector<8x8xf32>
    %c0_22 = arith.constant 0 : index
    %c0_23 = arith.constant 0 : index
    %44 = vector.load %arg15[%c0_22, %c0_23] : memref<8x32xf32, #tpu.memory_space<vmem>>, vector<8x8xf32>
    tpu.vector_store %arg15[%c0_22, %c0_23], %43 {strides = array<i32>} : memref<8x32xf32, #tpu.memory_space<vmem>>, vector<8x8xf32>,
    %45 = vector.extract_strided_slice %20 {offsets = [0, 8], sizes = [8, 8], strides = [1, 1]} : vector<8x32xf32> to vector<8x8xf32>
    %46 = arith.truncf %45 : vector<8x8xf32> to vector<8x8xbf16>
    %47 = vector.extract_strided_slice %22 {offsets = [0, 8], sizes = [8, 8], strides = [1, 1]} : vector<8x32xf32> to vector<8x8xf32>
    %48 = arith.truncf %47 : vector<8x8xf32> to vector<8x8xbf16>
    %49 = vector.extract_strided_slice %24 {offsets = [0, 8], sizes = [8, 8], strides = [1, 1]} : vector<8x32xf32> to vector<8x8xf32>
    %50 = arith.truncf %49 : vector<8x8xf32> to vector<8x8xbf16>
    %cst_24 = arith.constant dense<0.000000e+00> : vector<8x8xf32>
    %51 = tpu.matmul %46, %48, %cst_24 {dimension_numbers = #tpu.dot_dimension_numbers<[1], [1], [0], [0], [0, 0, 1, 0], [], []>} : vector<8x8xbf16>, vector<8x8xbf16>, vector<8x8xf32> -> vector<8x8xf32>
    %cst_25 = arith.constant dense<0xFF800000> : vector<8xf32>
    %52 = vector.multi_reduction <maximumf>, %51, %cst_25 [1] : vector<8x8xf32> to vector<8xf32>
    %53 = vector.shape_cast %52 : vector<8xf32> to vector<8x1xf32>
    %54 = vector.broadcast %53 : vector<8x1xf32> to vector<8x8xf32>
    %55 = arith.subf %51, %54 : vector<8x8xf32>
    %56 = math.exp %55 : vector<8x8xf32>
    %cst_26 = arith.constant dense<0.000000e+00> : vector<8xf32>
    %57 = vector.multi_reduction <add>, %56, %cst_26 [1] : vector<8x8xf32> to vector<8xf32>
    %58 = vector.shape_cast %57 : vector<8xf32> to vector<8x1xf32>
    %59 = tpu.reciprocal %58 {approx = true} : vector<8x1xf32> -> vector<8x1xf32>
    %60 = vector.broadcast %59 : vector<8x1xf32> to vector<8x8xf32>
    %61 = arith.mulf %56, %60 : vector<8x8xf32>
    %62 = arith.truncf %61 : vector<8x8xf32> to vector<8x8xbf16>
    %cst_27 = arith.constant dense<0.000000e+00> : vector<8x8xf32>
    %63 = tpu.matmul %62, %50, %cst_27 {dimension_numbers = #tpu.dot_dimension_numbers<[1], [0], [0], [1], [0, 0, 1, 1], [], []>} : vector<8x8xbf16>, vector<8x8xbf16>, vector<8x8xf32> -> vector<8x8xf32>
    %c0_28 = arith.constant 0 : index
    %c8 = arith.constant 8 : index
    %64 = vector.load %arg15[%c0_28, %c8] : memref<8x32xf32, #tpu.memory_space<vmem>>, vector<8x8xf32>
    tpu.vector_store %arg15[%c0_28, %c8], %63 {strides = array<i32>} : memref<8x32xf32, #tpu.memory_space<vmem>>, vector<8x8xf32>,
    %65 = vector.extract_strided_slice %20 {offsets = [0, 16], sizes = [8, 8], strides = [1, 1]} : vector<8x32xf32> to vector<8x8xf32>
    %66 = arith.truncf %65 : vector<8x8xf32> to vector<8x8xbf16>
    %67 = vector.extract_strided_slice %22 {offsets = [0, 16], sizes = [8, 8], strides = [1, 1]} : vector<8x32xf32> to vector<8x8xf32>
    %68 = arith.truncf %67 : vector<8x8xf32> to vector<8x8xbf16>
    %69 = vector.extract_strided_slice %24 {offsets = [0, 16], sizes = [8, 8], strides = [1, 1]} : vector<8x32xf32> to vector<8x8xf32>
    %70 = arith.truncf %69 : vector<8x8xf32> to vector<8x8xbf16>
    %cst_29 = arith.constant dense<0.000000e+00> : vector<8x8xf32>
    %71 = tpu.matmul %66, %68, %cst_29 {dimension_numbers = #tpu.dot_dimension_numbers<[1], [1], [0], [0], [0, 0, 1, 0], [], []>} : vector<8x8xbf16>, vector<8x8xbf16>, vector<8x8xf32> -> vector<8x8xf32>
    %cst_30 = arith.constant dense<0xFF800000> : vector<8xf32>
    %72 = vector.multi_reduction <maximumf>, %71, %cst_30 [1] : vector<8x8xf32> to vector<8xf32>
    %73 = vector.shape_cast %72 : vector<8xf32> to vector<8x1xf32>
    %74 = vector.broadcast %73 : vector<8x1xf32> to vector<8x8xf32>
    %75 = arith.subf %71, %74 : vector<8x8xf32>
    %76 = math.exp %75 : vector<8x8xf32>
    %cst_31 = arith.constant dense<0.000000e+00> : vector<8xf32>
    %77 = vector.multi_reduction <add>, %76, %cst_31 [1] : vector<8x8xf32> to vector<8xf32>
    %78 = vector.shape_cast %77 : vector<8xf32> to vector<8x1xf32>
    %79 = tpu.reciprocal %78 {approx = true} : vector<8x1xf32> -> vector<8x1xf32>
    %80 = vector.broadcast %79 : vector<8x1xf32> to vector<8x8xf32>
    %81 = arith.mulf %76, %80 : vector<8x8xf32>
    %82 = arith.truncf %81 : vector<8x8xf32> to vector<8x8xbf16>
    %cst_32 = arith.constant dense<0.000000e+00> : vector<8x8xf32>
    %83 = tpu.matmul %82, %70, %cst_32 {dimension_numbers = #tpu.dot_dimension_numbers<[1], [0], [0], [1], [0, 0, 1, 1], [], []>} : vector<8x8xbf16>, vector<8x8xbf16>, vector<8x8xf32> -> vector<8x8xf32>
    %c0_33 = arith.constant 0 : index
    %c16 = arith.constant 16 : index
    %84 = vector.load %arg15[%c0_33, %c16] : memref<8x32xf32, #tpu.memory_space<vmem>>, vector<8x8xf32>
    tpu.vector_store %arg15[%c0_33, %c16], %83 {strides = array<i32>} : memref<8x32xf32, #tpu.memory_space<vmem>>, vector<8x8xf32>,
    %85 = vector.extract_strided_slice %20 {offsets = [0, 24], sizes = [8, 8], strides = [1, 1]} : vector<8x32xf32> to vector<8x8xf32>
    %86 = arith.truncf %85 : vector<8x8xf32> to vector<8x8xbf16>
    %87 = vector.extract_strided_slice %22 {offsets = [0, 24], sizes = [8, 8], strides = [1, 1]} : vector<8x32xf32> to vector<8x8xf32>
    %88 = arith.truncf %87 : vector<8x8xf32> to vector<8x8xbf16>
    %89 = vector.extract_strided_slice %24 {offsets = [0, 24], sizes = [8, 8], strides = [1, 1]} : vector<8x32xf32> to vector<8x8xf32>
    %90 = arith.truncf %89 : vector<8x8xf32> to vector<8x8xbf16>
    %cst_34 = arith.constant dense<0.000000e+00> : vector<8x8xf32>
    %91 = tpu.matmul %86, %88, %cst_34 {dimension_numbers = #tpu.dot_dimension_numbers<[1], [1], [0], [0], [0, 0, 1, 0], [], []>} : vector<8x8xbf16>, vector<8x8xbf16>, vector<8x8xf32> -> vector<8x8xf32>
    %cst_35 = arith.constant dense<0xFF800000> : vector<8xf32>
    %92 = vector.multi_reduction <maximumf>, %91, %cst_35 [1] : vector<8x8xf32> to vector<8xf32>
    %93 = vector.shape_cast %92 : vector<8xf32> to vector<8x1xf32>
    %94 = vector.broadcast %93 : vector<8x1xf32> to vector<8x8xf32>
    %95 = arith.subf %91, %94 : vector<8x8xf32>
    %96 = math.exp %95 : vector<8x8xf32>
    %cst_36 = arith.constant dense<0.000000e+00> : vector<8xf32>
    %97 = vector.multi_reduction <add>, %96, %cst_36 [1] : vector<8x8xf32> to vector<8xf32>
    %98 = vector.shape_cast %97 : vector<8xf32> to vector<8x1xf32>
    %99 = tpu.reciprocal %98 {approx = true} : vector<8x1xf32> -> vector<8x1xf32>
    %100 = vector.broadcast %99 : vector<8x1xf32> to vector<8x8xf32>
    %101 = arith.mulf %96, %100 : vector<8x8xf32>
    %102 = arith.truncf %101 : vector<8x8xf32> to vector<8x8xbf16>
    %cst_37 = arith.constant dense<0.000000e+00> : vector<8x8xf32>
    %103 = tpu.matmul %102, %90, %cst_37 {dimension_numbers = #tpu.dot_dimension_numbers<[1], [0], [0], [1], [0, 0, 1, 1], [], []>} : vector<8x8xbf16>, vector<8x8xbf16>, vector<8x8xf32> -> vector<8x8xf32>
    %c0_38 = arith.constant 0 : index
    %c24 = arith.constant 24 : index
    %104 = vector.load %arg15[%c0_38, %c24] : memref<8x32xf32, #tpu.memory_space<vmem>>, vector<8x8xf32>
    tpu.vector_store %arg15[%c0_38, %c24], %103 {strides = array<i32>} : memref<8x32xf32, #tpu.memory_space<vmem>>, vector<8x8xf32>,
    %c0_39 = arith.constant 0 : index
    %c0_40 = arith.constant 0 : index
    %105 = vector.load %arg15[%c0_39, %c0_40] : memref<8x32xf32, #tpu.memory_space<vmem>>, vector<8x32xf32>
    %106 = arith.truncf %105 : vector<8x32xf32> to vector<8x32xbf16>
    %c0_41 = arith.constant 0 : index
    %c0_42 = arith.constant 0 : index
    %107 = vector.load %arg8[%c0_41, %c0_42] : memref<32x32xbf16, #tpu.memory_space<vmem>>, vector<32x32xbf16>
    %cst_43 = arith.constant dense<0.000000e+00> : vector<8x32xf32>
    %108 = tpu.matmul %106, %107, %cst_43 {dimension_numbers = #tpu.dot_dimension_numbers<[1], [0], [0], [1], [0, 0, 1, 1], [], []>} : vector<8x32xbf16>, vector<32x32xbf16>, vector<8x32xf32> -> vector<8x32xf32>
    %109 = arith.addf %0, %108 : vector<8x32xf32>
    %c0_44 = arith.constant 0 : index
    %c0_45 = arith.constant 0 : index
    %110 = vector.load %arg9[%c0_44, %c0_45] : memref<1x32xf32, #tpu.memory_space<vmem>>, vector<1x32xf32>
    %111 = arith.mulf %109, %109 : vector<8x32xf32>
    %cst_46 = arith.constant dense<0.000000e+00> : vector<8xf32>
    %112 = vector.multi_reduction <add>, %111, %cst_46 [1] : vector<8x32xf32> to vector<8xf32>
    %113 = vector.shape_cast %112 : vector<8xf32> to vector<8x1xf32>
    %cst_47 = arith.constant 3.200000e+01 : f32
    %114 = vector.broadcast %cst_47 : f32 to vector<8x1xf32>
    %115 = arith.divf %113, %114 : vector<8x1xf32>
    %cst_48 = arith.constant 9.99999997E-7 : f32
    %116 = vector.broadcast %cst_48 : f32 to vector<8x1xf32>
    %117 = arith.addf %115, %116 : vector<8x1xf32>
    %118 = math.rsqrt %117 : vector<8x1xf32>
    %119 = vector.broadcast %118 : vector<8x1xf32> to vector<8x32xf32>
    %120 = arith.mulf %109, %119 : vector<8x32xf32>
    %121 = vector.broadcast %110 : vector<1x32xf32> to vector<8x32xf32>
    %122 = arith.mulf %120, %121 : vector<8x32xf32>
    %123 = arith.truncf %122 : vector<8x32xf32> to vector<8x32xbf16>
    %c0_49 = arith.constant 0 : index
    %c0_50 = arith.constant 0 : index
    %124 = vector.load %arg10[%c0_49, %c0_50] : memref<32x32xbf16, #tpu.memory_space<vmem>>, vector<32x32xbf16>
    %cst_51 = arith.constant dense<0.000000e+00> : vector<8x32xf32>
    %125 = tpu.matmul %123, %124, %cst_51 {dimension_numbers = #tpu.dot_dimension_numbers<[1], [0], [0], [1], [0, 0, 1, 1], [], []>} : vector<8x32xbf16>, vector<32x32xbf16>, vector<8x32xf32> -> vector<8x32xf32>
    %c0_52 = arith.constant 0 : index
    %c0_53 = arith.constant 0 : index
    %126 = vector.load %arg11[%c0_52, %c0_53] : memref<32x32xbf16, #tpu.memory_space<vmem>>, vector<32x32xbf16>
    %cst_54 = arith.constant dense<0.000000e+00> : vector<8x32xf32>
    %127 = tpu.matmul %4, %126, %cst_54 {dimension_numbers = #tpu.dot_dimension_numbers<[1], [0], [0], [1], [0, 0, 1, 1], [], []>} : vector<8x32xbf16>, vector<32x32xbf16>, vector<8x32xf32> -> vector<8x32xf32>
    %c0_55 = arith.constant 0 : index
    %c0_56 = arith.constant 0 : index
    %128 = vector.load %arg12[%c0_55, %c0_56] : memref<32x32xbf16, #tpu.memory_space<vmem>>, vector<32x32xbf16>
    %cst_57 = arith.constant dense<0.000000e+00> : vector<8x32xf32>
    %129 = tpu.matmul %4, %128, %cst_57 {dimension_numbers = #tpu.dot_dimension_numbers<[1], [0], [0], [1], [0, 0, 1, 1], [], []>} : vector<8x32xbf16>, vector<32x32xbf16>, vector<8x32xf32> -> vector<8x32xf32>
    %130 = vector.extract_strided_slice %125 {offsets = [0, 0], sizes = [8, 8], strides = [1, 1]} : vector<8x32xf32> to vector<8x8xf32>
    %131 = arith.truncf %130 : vector<8x8xf32> to vector<8x8xbf16>
    %132 = vector.extract_strided_slice %127 {offsets = [0, 0], sizes = [8, 8], strides = [1, 1]} : vector<8x32xf32> to vector<8x8xf32>
    %133 = arith.truncf %132 : vector<8x8xf32> to vector<8x8xbf16>
    %134 = vector.extract_strided_slice %129 {offsets = [0, 0], sizes = [8, 8], strides = [1, 1]} : vector<8x32xf32> to vector<8x8xf32>
    %135 = arith.truncf %134 : vector<8x8xf32> to vector<8x8xbf16>
    %cst_58 = arith.constant dense<0.000000e+00> : vector<8x8xf32>
    %136 = tpu.matmul %131, %133, %cst_58 {dimension_numbers = #tpu.dot_dimension_numbers<[1], [1], [0], [0], [0, 0, 1, 0], [], []>} : vector<8x8xbf16>, vector<8x8xbf16>, vector<8x8xf32> -> vector<8x8xf32>
    %cst_59 = arith.constant dense<0xFF800000> : vector<8xf32>
    %137 = vector.multi_reduction <maximumf>, %136, %cst_59 [1] : vector<8x8xf32> to vector<8xf32>
    %138 = vector.shape_cast %137 : vector<8xf32> to vector<8x1xf32>
    %139 = vector.broadcast %138 : vector<8x1xf32> to vector<8x8xf32>
    %140 = arith.subf %136, %139 : vector<8x8xf32>
    %141 = math.exp %140 : vector<8x8xf32>
    %cst_60 = arith.constant dense<0.000000e+00> : vector<8xf32>
    %142 = vector.multi_reduction <add>, %141, %cst_60 [1] : vector<8x8xf32> to vector<8xf32>
    %143 = vector.shape_cast %142 : vector<8xf32> to vector<8x1xf32>
    %144 = tpu.reciprocal %143 {approx = true} : vector<8x1xf32> -> vector<8x1xf32>
    %145 = vector.broadcast %144 : vector<8x1xf32> to vector<8x8xf32>
    %146 = arith.mulf %141, %145 : vector<8x8xf32>
    %147 = arith.truncf %146 : vector<8x8xf32> to vector<8x8xbf16>
    %cst_61 = arith.constant dense<0.000000e+00> : vector<8x8xf32>
    %148 = tpu.matmul %147, %135, %cst_61 {dimension_numbers = #tpu.dot_dimension_numbers<[1], [0], [0], [1], [0, 0, 1, 1], [], []>} : vector<8x8xbf16>, vector<8x8xbf16>, vector<8x8xf32> -> vector<8x8xf32>
    %c0_62 = arith.constant 0 : index
    %c0_63 = arith.constant 0 : index
    %149 = vector.load %arg15[%c0_62, %c0_63] : memref<8x32xf32, #tpu.memory_space<vmem>>, vector<8x8xf32>
    tpu.vector_store %arg15[%c0_62, %c0_63], %148 {strides = array<i32>} : memref<8x32xf32, #tpu.memory_space<vmem>>, vector<8x8xf32>,
    %150 = vector.extract_strided_slice %125 {offsets = [0, 8], sizes = [8, 8], strides = [1, 1]} : vector<8x32xf32> to vector<8x8xf32>
    %151 = arith.truncf %150 : vector<8x8xf32> to vector<8x8xbf16>
    %152 = vector.extract_strided_slice %127 {offsets = [0, 8], sizes = [8, 8], strides = [1, 1]} : vector<8x32xf32> to vector<8x8xf32>
    %153 = arith.truncf %152 : vector<8x8xf32> to vector<8x8xbf16>
    %154 = vector.extract_strided_slice %129 {offsets = [0, 8], sizes = [8, 8], strides = [1, 1]} : vector<8x32xf32> to vector<8x8xf32>
    %155 = arith.truncf %154 : vector<8x8xf32> to vector<8x8xbf16>
    %cst_64 = arith.constant dense<0.000000e+00> : vector<8x8xf32>
    %156 = tpu.matmul %151, %153, %cst_64 {dimension_numbers = #tpu.dot_dimension_numbers<[1], [1], [0], [0], [0, 0, 1, 0], [], []>} : vector<8x8xbf16>, vector<8x8xbf16>, vector<8x8xf32> -> vector<8x8xf32>
    %cst_65 = arith.constant dense<0xFF800000> : vector<8xf32>
    %157 = vector.multi_reduction <maximumf>, %156, %cst_65 [1] : vector<8x8xf32> to vector<8xf32>
    %158 = vector.shape_cast %157 : vector<8xf32> to vector<8x1xf32>
    %159 = vector.broadcast %158 : vector<8x1xf32> to vector<8x8xf32>
    %160 = arith.subf %156, %159 : vector<8x8xf32>
    %161 = math.exp %160 : vector<8x8xf32>
    %cst_66 = arith.constant dense<0.000000e+00> : vector<8xf32>
    %162 = vector.multi_reduction <add>, %161, %cst_66 [1] : vector<8x8xf32> to vector<8xf32>
    %163 = vector.shape_cast %162 : vector<8xf32> to vector<8x1xf32>
    %164 = tpu.reciprocal %163 {approx = true} : vector<8x1xf32> -> vector<8x1xf32>
    %165 = vector.broadcast %164 : vector<8x1xf32> to vector<8x8xf32>
    %166 = arith.mulf %161, %165 : vector<8x8xf32>
    %167 = arith.truncf %166 : vector<8x8xf32> to vector<8x8xbf16>
    %cst_67 = arith.constant dense<0.000000e+00> : vector<8x8xf32>
    %168 = tpu.matmul %167, %155, %cst_67 {dimension_numbers = #tpu.dot_dimension_numbers<[1], [0], [0], [1], [0, 0, 1, 1], [], []>} : vector<8x8xbf16>, vector<8x8xbf16>, vector<8x8xf32> -> vector<8x8xf32>
    %c0_68 = arith.constant 0 : index
    %c8_69 = arith.constant 8 : index
    %169 = vector.load %arg15[%c0_68, %c8_69] : memref<8x32xf32, #tpu.memory_space<vmem>>, vector<8x8xf32>
    tpu.vector_store %arg15[%c0_68, %c8_69], %168 {strides = array<i32>} : memref<8x32xf32, #tpu.memory_space<vmem>>, vector<8x8xf32>,
    %170 = vector.extract_strided_slice %125 {offsets = [0, 16], sizes = [8, 8], strides = [1, 1]} : vector<8x32xf32> to vector<8x8xf32>
    %171 = arith.truncf %170 : vector<8x8xf32> to vector<8x8xbf16>
    %172 = vector.extract_strided_slice %127 {offsets = [0, 16], sizes = [8, 8], strides = [1, 1]} : vector<8x32xf32> to vector<8x8xf32>
    %173 = arith.truncf %172 : vector<8x8xf32> to vector<8x8xbf16>
    %174 = vector.extract_strided_slice %129 {offsets = [0, 16], sizes = [8, 8], strides = [1, 1]} : vector<8x32xf32> to vector<8x8xf32>
    %175 = arith.truncf %174 : vector<8x8xf32> to vector<8x8xbf16>
    %cst_70 = arith.constant dense<0.000000e+00> : vector<8x8xf32>
    %176 = tpu.matmul %171, %173, %cst_70 {dimension_numbers = #tpu.dot_dimension_numbers<[1], [1], [0], [0], [0, 0, 1, 0], [], []>} : vector<8x8xbf16>, vector<8x8xbf16>, vector<8x8xf32> -> vector<8x8xf32>
    %cst_71 = arith.constant dense<0xFF800000> : vector<8xf32>
    %177 = vector.multi_reduction <maximumf>, %176, %cst_71 [1] : vector<8x8xf32> to vector<8xf32>
    %178 = vector.shape_cast %177 : vector<8xf32> to vector<8x1xf32>
    %179 = vector.broadcast %178 : vector<8x1xf32> to vector<8x8xf32>
    %180 = arith.subf %176, %179 : vector<8x8xf32>
    %181 = math.exp %180 : vector<8x8xf32>
    %cst_72 = arith.constant dense<0.000000e+00> : vector<8xf32>
    %182 = vector.multi_reduction <add>, %181, %cst_72 [1] : vector<8x8xf32> to vector<8xf32>
    %183 = vector.shape_cast %182 : vector<8xf32> to vector<8x1xf32>
    %184 = tpu.reciprocal %183 {approx = true} : vector<8x1xf32> -> vector<8x1xf32>
    %185 = vector.broadcast %184 : vector<8x1xf32> to vector<8x8xf32>
    %186 = arith.mulf %181, %185 : vector<8x8xf32>
    %187 = arith.truncf %186 : vector<8x8xf32> to vector<8x8xbf16>
    %cst_73 = arith.constant dense<0.000000e+00> : vector<8x8xf32>
    %188 = tpu.matmul %187, %175, %cst_73 {dimension_numbers = #tpu.dot_dimension_numbers<[1], [0], [0], [1], [0, 0, 1, 1], [], []>} : vector<8x8xbf16>, vector<8x8xbf16>, vector<8x8xf32> -> vector<8x8xf32>
    %c0_74 = arith.constant 0 : index
    %c16_75 = arith.constant 16 : index
    %189 = vector.load %arg15[%c0_74, %c16_75] : memref<8x32xf32, #tpu.memory_space<vmem>>, vector<8x8xf32>
    tpu.vector_store %arg15[%c0_74, %c16_75], %188 {strides = array<i32>} : memref<8x32xf32, #tpu.memory_space<vmem>>, vector<8x8xf32>,
    %190 = vector.extract_strided_slice %125 {offsets = [0, 24], sizes = [8, 8], strides = [1, 1]} : vector<8x32xf32> to vector<8x8xf32>
    %191 = arith.truncf %190 : vector<8x8xf32> to vector<8x8xbf16>
    %192 = vector.extract_strided_slice %127 {offsets = [0, 24], sizes = [8, 8], strides = [1, 1]} : vector<8x32xf32> to vector<8x8xf32>
    %193 = arith.truncf %192 : vector<8x8xf32> to vector<8x8xbf16>
    %194 = vector.extract_strided_slice %129 {offsets = [0, 24], sizes = [8, 8], strides = [1, 1]} : vector<8x32xf32> to vector<8x8xf32>
    %195 = arith.truncf %194 : vector<8x8xf32> to vector<8x8xbf16>
    %cst_76 = arith.constant dense<0.000000e+00> : vector<8x8xf32>
    %196 = tpu.matmul %191, %193, %cst_76 {dimension_numbers = #tpu.dot_dimension_numbers<[1], [1], [0], [0], [0, 0, 1, 0], [], []>} : vector<8x8xbf16>, vector<8x8xbf16>, vector<8x8xf32> -> vector<8x8xf32>
    %cst_77 = arith.constant dense<0xFF800000> : vector<8xf32>
    %197 = vector.multi_reduction <maximumf>, %196, %cst_77 [1] : vector<8x8xf32> to vector<8xf32>
    %198 = vector.shape_cast %197 : vector<8xf32> to vector<8x1xf32>
    %199 = vector.broadcast %198 : vector<8x1xf32> to vector<8x8xf32>
    %200 = arith.subf %196, %199 : vector<8x8xf32>
    %201 = math.exp %200 : vector<8x8xf32>
    %cst_78 = arith.constant dense<0.000000e+00> : vector<8xf32>
    %202 = vector.multi_reduction <add>, %201, %cst_78 [1] : vector<8x8xf32> to vector<8xf32>
    %203 = vector.shape_cast %202 : vector<8xf32> to vector<8x1xf32>
    %204 = tpu.reciprocal %203 {approx = true} : vector<8x1xf32> -> vector<8x1xf32>
    %205 = vector.broadcast %204 : vector<8x1xf32> to vector<8x8xf32>
    %206 = arith.mulf %201, %205 : vector<8x8xf32>
    %207 = arith.truncf %206 : vector<8x8xf32> to vector<8x8xbf16>
    %cst_79 = arith.constant dense<0.000000e+00> : vector<8x8xf32>
    %208 = tpu.matmul %207, %195, %cst_79 {dimension_numbers = #tpu.dot_dimension_numbers<[1], [0], [0], [1], [0, 0, 1, 1], [], []>} : vector<8x8xbf16>, vector<8x8xbf16>, vector<8x8xf32> -> vector<8x8xf32>
    %c0_80 = arith.constant 0 : index
    %c24_81 = arith.constant 24 : index
    %209 = vector.load %arg15[%c0_80, %c24_81] : memref<8x32xf32, #tpu.memory_space<vmem>>, vector<8x8xf32>
    tpu.vector_store %arg15[%c0_80, %c24_81], %208 {strides = array<i32>} : memref<8x32xf32, #tpu.memory_space<vmem>>, vector<8x8xf32>,
    %c0_82 = arith.constant 0 : index
    %c0_83 = arith.constant 0 : index
    %210 = vector.load %arg15[%c0_82, %c0_83] : memref<8x32xf32, #tpu.memory_space<vmem>>, vector<8x32xf32>
    %211 = arith.truncf %210 : vector<8x32xf32> to vector<8x32xbf16>
    %c0_84 = arith.constant 0 : index
    %c0_85 = arith.constant 0 : index
    %212 = vector.load %arg13[%c0_84, %c0_85] : memref<32x32xbf16, #tpu.memory_space<vmem>>, vector<32x32xbf16>
    %cst_86 = arith.constant dense<0.000000e+00> : vector<8x32xf32>
    %213 = tpu.matmul %211, %212, %cst_86 {dimension_numbers = #tpu.dot_dimension_numbers<[1], [0], [0], [1], [0, 0, 1, 1], [], []>} : vector<8x32xbf16>, vector<32x32xbf16>, vector<8x32xf32> -> vector<8x32xf32>
    %214 = arith.addf %109, %213 : vector<8x32xf32>
    %c0_87 = arith.constant 0 : index
    %c0_88 = arith.constant 0 : index
    %215 = vector.load %arg14[%c0_87, %c0_88] : memref<8x32xf32, #tpu.memory_space<vmem>>, vector<8x32xf32>
    tpu.vector_store %arg14[%c0_87, %c0_88], %214 {strides = array<i32>} : memref<8x32xf32, #tpu.memory_space<vmem>>, vector<8x32xf32>,
    return
  }
  func.func @transform_0(%arg0: i32) -> (i32, i32) {
    %c0_i32 = arith.constant 0 : i32
    %c0_i32_0 = arith.constant 0 : i32
    return %arg0, %c0_i32 : i32, i32
  }
  func.func @transform_1(%arg0: i32) -> (i32, i32) {
    %c0_i32 = arith.constant 0 : i32
    %c0_i32_0 = arith.constant 0 : i32
    return %arg0, %c0_i32 : i32, i32
  }
  func.func @transform_2(%arg0: i32) -> (i32, i32) {
    %c0_i32 = arith.constant 0 : i32
    %c0_i32_0 = arith.constant 0 : i32
    return %arg0, %c0_i32 : i32, i32
  }
  func.func @transform_3(%arg0: i32) -> (i32, i32) {
    %c0_i32 = arith.constant 0 : i32
    %c0_i32_0 = arith.constant 0 : i32
    %c0_i32_1 = arith.constant 0 : i32
    return %c0_i32, %c0_i32_0 : i32, i32
  }
  func.func @transform_4(%arg0: i32) -> (i32, i32) {
    %c0_i32 = arith.constant 0 : i32
    %c0_i32_0 = arith.constant 0 : i32
    %c0_i32_1 = arith.constant 0 : i32
    return %c0_i32, %c0_i32_0 : i32, i32
  }
  func.func @transform_5(%arg0: i32) -> (i32, i32) {
    %c0_i32 = arith.constant 0 : i32
    %c0_i32_0 = arith.constant 0 : i32
    %c0_i32_1 = arith.constant 0 : i32
    return %c0_i32, %c0_i32_0 : i32, i32
  }
  func.func @transform_6(%arg0: i32) -> (i32, i32) {
    %c0_i32 = arith.constant 0 : i32
    %c0_i32_0 = arith.constant 0 : i32
    %c0_i32_1 = arith.constant 0 : i32
    return %c0_i32, %c0_i32_0 : i32, i32
  }
  func.func @transform_7(%arg0: i32) -> (i32, i32) {
    %c0_i32 = arith.constant 0 : i32
    %c0_i32_0 = arith.constant 0 : i32
    %c0_i32_1 = arith.constant 0 : i32
    return %c0_i32, %c0_i32_0 : i32, i32
  }
  func.func @transform_8(%arg0: i32) -> (i32, i32) {
    %c0_i32 = arith.constant 0 : i32
    %c0_i32_0 = arith.constant 0 : i32
    %c0_i32_1 = arith.constant 0 : i32
    return %c0_i32, %c0_i32_0 : i32, i32
  }
  func.func @transform_9(%arg0: i32) -> (i32, i32) {
    %c0_i32 = arith.constant 0 : i32
    %c0_i32_0 = arith.constant 0 : i32
    %c0_i32_1 = arith.constant 0 : i32
    return %c0_i32, %c0_i32_0 : i32, i32
  }
  func.func @transform_10(%arg0: i32) -> (i32, i32) {
    %c0_i32 = arith.constant 0 : i32
    %c0_i32_0 = arith.constant 0 : i32
    %c0_i32_1 = arith.constant 0 : i32
    return %c0_i32, %c0_i32_0 : i32, i32
  }
  func.func @transform_11(%arg0: i32) -> (i32, i32) {
    %c0_i32 = arith.constant 0 : i32
    %c0_i32_0 = arith.constant 0 : i32
    %c0_i32_1 = arith.constant 0 : i32
    return %c0_i32, %c0_i32_0 : i32, i32
  }
  func.func @transform_12(%arg0: i32) -> (i32, i32) {
    %c0_i32 = arith.constant 0 : i32
    %c0_i32_0 = arith.constant 0 : i32
    %c0_i32_1 = arith.constant 0 : i32
    return %c0_i32, %c0_i32_0 : i32, i32
  }
  func.func @transform_13(%arg0: i32) -> (i32, i32) {
    %c0_i32 = arith.constant 0 : i32
    %c0_i32_0 = arith.constant 0 : i32
    return %arg0, %c0_i32 : i32, i32
  }
}

</mosaic_0001>

<bundles_post_ra>
// kernel: combined_block_2a_forward.5
= control target key start
LH: loop header
LB: loop body
LE: loop exit
PB: predicated region body
PF: predicated region fallthrough
CT: control target
= control target key end

     0   :  { %10 = vsyncpa [#allocation3], 0  ;;  %s725_s0 = inlined_call_operand.hbm [shape: f32[16,32], index: 0, kind: input, shape index: {}]   ;;  %s726_s1 = inlined_call_operand.hbm [shape: f32[1,32], index: 1, kind: input, shape index: {}]   ;;  %s727_s2 = inlined_call_operand.hbm [shape: bf16[32,64], index: 2, kind: input, shape index: {}]   ;;  %s728_s3 = inlined_call_operand.hbm [shape: bf16[32,64], index: 3, kind: input, shape index: {}]   ;;  %s729_s4 = inlined_call_operand.hbm [shape: bf16[64,32], index: 4, kind: input, shape index: {}]   ;;  %s730_s5 = inlined_call_operand.hbm [shape: f32[16,32], index: 5, kind: output, shape index: {}]  }
   0x1   :  { %11 = vsyncpa [#allocation6], 0 }
   0x2   :  { %12 = vsyncpa [#allocation9], 0 }
   0x3   :  { %13 = vsyncpa [#allocation4], 0  ;;  %s575_s18 = smov [#allocation5]   ;;  %s435_s22 = scalar_lea.hbm %s726_s1, 16 }
   0x4   :  { %s32_s19 = sshll.u32 %s575_s18, 4  ;;  %p436_p0 = scmp.ne.s32.totalorder %s726_s1, %s435_s22  ;;  %s33_s19 = int_to_ptr.vmem [resolvable:$true] %s32_s19 }
   0x5   :  { %p439_p1 = scmp.lt.u32.totalorder %s435_s22, %s726_s1 }
   0x7   :  { %p441_p2 = pnand %p439_p1, %p436_p0 }
   0x9   :  { %444 = shalt.err (!%p441_p2)
}
   0xa   :  { %s445_s27 = scalar_lea.vmem %s33_s19, 16  ;;  %s449_s28 = scalar_lea.vmem %s33_s19, 32 }
   0xb   :  { %p446_p3 = scmp.ne.s32.totalorder %s33_s19, %s445_s27  ;;  %p450_p4 = scmp.lt.s32.totalorder %s33_s19, %s33_s19 }
   0xc   :  { %p451_p5 = scmp.lt.s32.totalorder %s449_s28, %s445_s27 }
   0xe   :  { %p452_p6 = por %p451_p5, %p450_p4 }
  0x10   :  { %p453_p7 = pnand %p452_p6, %p446_p3 }
  0x12   :  { %456 = shalt.err (!%p453_p7)
}
  0x13   :  { %35 = dma.hbm_to_vmem [thread:$0]  %s726_s1, 16, %s33_s19, [#allocation6]  }
  0x14   :  { %s576_s6 = smov [#allocation8]   ;;  %s577_s8 = smov [#allocation2]  }
  0x15   :  { %s53_s7 = sshll.u32 %s576_s6, 4  ;;  %s19_s9 = sshll.u32 %s577_s8, 4  ;;  %s54_s7 = int_to_ptr.vmem [resolvable:$true] %s53_s7  ;;  %s20_s9 = int_to_ptr.vmem [resolvable:$true] %s19_s9 }
  0x16   :  { %s457_s12 = scalar_lea.hbm %s728_s3, 256 }
  0x17   :  { %p458_p8 = scmp.ne.s32.totalorder %s728_s3, %s457_s12  ;;  %p461_p9 = scmp.lt.u32.totalorder %s457_s12, %s728_s3 }
  0x19   :  { %p463_p10 = pnand %p461_p9, %p458_p8 }
  0x1b   :  { %466 = shalt.err (!%p463_p10)
}
  0x1c   :  { %s467_s1 = scalar_lea.vmem %s54_s7, 256  ;;  %p472_p12 = scmp.lt.s32.totalorder %s54_s7, %s54_s7 }
  0x1d   :  { %p468_p11 = scmp.ne.s32.totalorder %s54_s7, %s467_s1  ;;  %p473_p13 = scmp.lt.s32.totalorder %s467_s1, %s467_s1 }
  0x1f   :  { %p474_p0 = por %p473_p13, %p472_p12 }
  0x21   :  { %p475_p1 = pnand %p474_p0, %p468_p11 }
  0x23   :  { %478 = shalt.err (!%p475_p1)
}
  0x24   :  { %s578_s17 = smov 64   ;;  %s579_s18 = smov 4  }
  0x25   :  { %59 = dma.hbm_to_vmem [thread:$0]  %s728_s3, 256, %s54_s7, [#allocation9], %s578_s17, %s578_s17, %s579_s18  }
  0x26   :  { %s479_s23 = scalar_lea.hbm %s725_s0, 256 }
  0x27   :  { %p480_p2 = scmp.ne.s32.totalorder %s725_s0, %s479_s23  ;;  %p483_p3 = scmp.lt.u32.totalorder %s479_s23, %s725_s0 }
  0x29   :  { %p485_p4 = pnand %p483_p3, %p480_p2 }
  0x2b   :  { %488 = shalt.err (!%p485_p4)
}
  0x2c   :  { %s489_s28 = scalar_lea.vmem %s20_s9, 256  ;;  %p494_p6 = scmp.lt.s32.totalorder %s20_s9, %s20_s9 }
  0x2d   :  { %p490_p5 = scmp.ne.s32.totalorder %s20_s9, %s489_s28  ;;  %p495_p7 = scmp.lt.s32.totalorder %s489_s28, %s489_s28 }
  0x2f   :  { %p496_p8 = por %p495_p7, %p494_p6 }
  0x31   :  { %p497_p9 = pnand %p496_p8, %p490_p5 }
  0x33   :  { %500 = shalt.err (!%p497_p9)
}
  0x34   :  { %s580_s3 = smov 128   ;;  %s581_s29 = smov 8  }
  0x35   :  { %25 = dma.hbm_to_vmem [thread:$0]  %s725_s0, 256, %s20_s9, [#allocation3], %s580_s3, %s580_s3, %s581_s29  }
  0x36   :  { %s582_s7 = smov [#allocation7]   ;;  %s583_s10 = smov [#allocation10]  }
  0x37   :  { %s41_s8 = sshll.u32 %s582_s7, 4  ;;  %s65_s11 = sshll.u32 %s583_s10, 4  ;;  %s42_s8 = int_to_ptr.vmem [resolvable:$true] %s41_s8  ;;  %s66_s11 = int_to_ptr.vmem [resolvable:$true] %s65_s11 }
  0x38   :  { %s501_s14 = scalar_lea.hbm %s727_s2, 256 }
  0x39   :  { %p502_p10 = scmp.ne.s32.totalorder %s727_s2, %s501_s14  ;;  %p505_p11 = scmp.lt.u32.totalorder %s501_s14, %s727_s2 }
  0x3b   :  { %p507_p12 = pnand %p505_p11, %p502_p10 }
  0x3d   :  { %510 = shalt.err (!%p507_p12)
}
  0x3e   :  { %s511_s0 = scalar_lea.vmem %s42_s8, 256  ;;  %p516_p0 = scmp.lt.s32.totalorder %s42_s8, %s42_s8 }
  0x3f   :  { %p512_p13 = scmp.ne.s32.totalorder %s42_s8, %s511_s0  ;;  %p517_p1 = scmp.lt.s32.totalorder %s511_s0, %s511_s0 }
  0x41   :  { %p518_p2 = por %p517_p1, %p516_p0 }
  0x43   :  { %p519_p3 = pnand %p518_p2, %p512_p13 }
  0x45   :  { %522 = shalt.err (!%p519_p3)
}
  0x46   :  { %47 = dma.hbm_to_vmem [thread:$0]  %s727_s2, 256, %s42_s8, [#allocation6], %s578_s17, %s578_s17, %s579_s18  }
  0x47   :  { %s523_s23 = scalar_lea.hbm %s729_s4, 512 }
  0x48   :  { %p524_p4 = scmp.ne.s32.totalorder %s729_s4, %s523_s23  ;;  %p527_p5 = scmp.lt.u32.totalorder %s523_s23, %s729_s4 }
  0x4a   :  { %p529_p6 = pnand %p527_p5, %p524_p4 }
  0x4c   :  { %532 = shalt.err (!%p529_p6)
}
  0x4d   :  { %s533_s28 = scalar_lea.vmem %s66_s11, 512  ;;  %p538_p8 = scmp.lt.s32.totalorder %s66_s11, %s66_s11 }
  0x4e   :  { %p534_p7 = scmp.ne.s32.totalorder %s66_s11, %s533_s28  ;;  %p539_p9 = scmp.lt.s32.totalorder %s533_s28, %s533_s28 }
  0x50   :  { %p540_p10 = por %p539_p9, %p538_p8 }
  0x52   :  { %p541_p11 = pnand %p540_p10, %p534_p7 }
  0x54   :  { %544 = shalt.err (!%p541_p11)
}
  0x55   :  { %71 = dma.hbm_to_vmem [thread:$0]  %s729_s4, 512, %s66_s11, [#allocation9], %s578_s17, %s578_s17, %s579_s18  }
  0x56   :  { %567 = dma.done.wait [#allocation3], 256  }
  0x57   :  { %568 = vsyncadd [#allocation3], 4294967040 }
  0x58   :  { %569 = dma.done.wait [#allocation6], 272  }
  0x59   :  { %570 = vsyncadd [#allocation6], 4294967024 }
  0x5a   :  { %571 = dma.done.wait [#allocation9], 768  }
  0x5b   :  { %572 = vsyncadd [#allocation9], 4294966528  ;;  %v689_v0 = vld [vmem:[#allocation2] sm:$0xff]  ;;  %vm93_vm0 = vcmask 261120   ;;  %v691_v1 = vld [vmem:[#allocation2 + $0x8] sm:$0xff]  ;;  %v584_v7 = vmov 0.0  }
  0x5c   :  { %v91_v2 = vmul.f32 %v689_v0, %v689_v0  ;;  %v92_v3 = vmul.f32 %v691_v1, %v691_v1  ;;  %v419_v6 = vld [vmem:[#allocation7] sm:$0xff]   ;;  %379 = vmatprep.subr.bf16.mxu1 %v584_v7  ;;  %vm585_vm1 = vmmov 0   ;;  %v420_v8 = vld [vmem:[#allocation7 + $0x8] sm:$0xff]   ;;  %395 = vmatprep.subr.bf16.mxu0 %v584_v7  ;;  %v356_v18 = vld [vmem:[#allocation5] ss:$0 sm:$0xff]  ;;  %vm288_vm2 = vcmask 523264  }
  0x5d   :  { %383 = vmatprep.mubr.msk.bf16.mxu1 %vm585_vm1, %v584_v7  ;;  %380 = vmatpush3.bf16.msra.mxu1 %v419_v6  ;;  %v421_v22 = vld [vmem:[#allocation8] sm:$0xff]   ;;  %v422_v24 = vld [vmem:[#allocation8 + $0x8] sm:$0xff]   ;;  %v423_v25 = vld [vmem:[#allocation10] sm:$0xff]   ;;  %s586_s4 = smov [#allocation11]  }
  0x5e   :  { %v94_v4 = vsel %vm93_vm0, %v91_v2, 0.0  ;;  %v97_v5 = vsel %vm93_vm0, %v92_v3, 0.0  ;;  %381 = vmatprep.subr.bf16.mxu1 %v584_v7  ;;  %403 = vmatprep.mubr.msk.bf16.mxu0 %vm585_vm1, %v584_v7  ;;  %v424_v26 = vld [vmem:[#allocation10 + $0x8] sm:$0xff]   ;;  %v425_v27 = vld [vmem:[#allocation10 + $0x10] sm:$0xff]   ;;  %v426_v28 = vld [vmem:[#allocation10 + $0x18] sm:$0xff]   ;;  %s342_s17 = sshll.u32 %s586_s4, 4  ;;  %s343_s17 = int_to_ptr.vmem [resolvable:$true] %s342_s17 }
  0x5f   :  { %95 = vadd.xlane.f32.xlu0 %v94_v4  ;;  %396 = vmatpush3.bf16.msra.mxu0 %v423_v25  ;;  %s545_s18 = scalar_lea.vmem %s343_s17, 256  ;;  %p550_p13 = scmp.lt.s32.totalorder %s343_s17, %s343_s17 }
  0x60   :  { %397 = vmatprep.subr.bf16.mxu0 %v584_v7  ;;  %p546_p12 = scmp.ne.s32.totalorder %s343_s17, %s545_s18  ;;  %p551_p0 = scmp.lt.s32.totalorder %s545_s18, %s545_s18 }
  0x61   :  { %382 = vmatpush3.bf16.msra.mxu1 %v420_v8 }
  0x62   :  { %387 = vmatprep.subr.bf16.mxu1 %v584_v7  ;;  %p552_p1 = por %p551_p0, %p550_p13 }
  0x63   :  { %98 = vadd.xlane.f32.xlu0 %v97_v5  ;;  %398 = vmatpush3.bf16.msra.mxu0 %v424_v26 }
  0x64   :  { %399 = vmatprep.subr.bf16.mxu0 %v584_v7  ;;  %p553_p2 = pnand %p552_p1, %p546_p12 }
  0x67   :  { %400 = vmatpush3.bf16.msra.mxu0 %v425_v27 }
  0x68   :  { %401 = vmatprep.subr.bf16.mxu0 %v584_v7 }
  0x6b   :  { %402 = vmatpush3.bf16.msra.mxu0 %v426_v28 }
  0xec   :  { %v96_v9 = vpop.xlane.xlu0 %95 }
  0xed   :  { %v101_v10 = vmul.f32 0.03125, %v96_v9 }
  0xef   :  { %v103_v11 = vadd.f32 1e-06, %v101_v10 }
  0xf0   :  { %v99_v12 = vpop.xlane.xlu0 %98 }
  0xf1   :  { %427 = vrsqrt.f32 %v103_v11  ;;  %v102_v13 = vmul.f32 0.03125, %v99_v12 }
  0xf3   :  { %v104_v14 = vadd.f32 1e-06, %v102_v13 }
  0xf5   :  { %429 = vrsqrt.f32 %v104_v14 }
  0xfb   :  { %v428_v15 = vpop.eup %427 }
  0xfc   :  { %v107_v16 = vmul.f32 %v428_v15, %v689_v0 }
  0xfe   :  { %v115_v20 = vmul.f32 %v356_v18, %v107_v16 }
  0xff   :  { %v430_v17 = vpop.eup %429 }
 0x100   :  { %v108_v19 = vmul.f32 %v430_v17, %v691_v1 }
 0x102   :  { %v116_v21 = vmul.f32 %v356_v18, %v108_v19 }
 0x104   :  { %v117_v23 = vpack.c.bf16 %v116_v21, %v115_v20 }
 0x106   :  { %384 = vmatmul.mubr.msk.bf16.vlgmr.msra.gmra.mrb[0].mxu1 %vm93_vm0, %v117_v23 }
 0x107   :  { %388 = vmatpush3.bf16.msra.mxu1 %v421_v22  ;;  %391 = vmatprep.mubr.msk.bf16.mxu1 %vm585_vm1, %v584_v7 }
 0x108   :  { %389 = vmatprep.subr.bf16.mxu1 %v584_v7 }
 0x10b   :  { %390 = vmatpush3.bf16.msra.mxu1 %v422_v24 }
 0x10e   :  { %392 = vmatmul.mubr.msk.bf16.vlgmr.msra.gmra.mrb[4].mxu1 %vm93_vm0, %v117_v23 }
 0x1d9   :  { %v171_v29 = vpop.f32.mrb[0].mxu1 }
 0x1da   :  { %v237_v30 = vmul.f32 0.044715, %v171_v29  ;;  %v385_v31 = vpop.f32.mrb[1].mxu1  ;;  %v235_v48 = vmul.f32 0.5, %v171_v29 }
 0x1db   :  { %v174_v32 = vpop.f32.mrb[2].mxu1 }
 0x1dc   :  { %v239_v33 = vmul.f32 %v237_v30, %v171_v29  ;;  %v238_v34 = vmul.f32 0.044715, %v174_v32  ;;  %v386_v35 = vpop.f32.mrb[3].mxu1  ;;  %v236_v52 = vmul.f32 0.5, %v174_v32 }
 0x1de   :  { %v241_v36 = vmul.f32 %v239_v33, %v171_v29  ;;  %v240_v37 = vmul.f32 %v238_v34, %v174_v32 }
 0x1e0   :  { %v242_v38 = vmul.f32 %v240_v37, %v174_v32  ;;  %v243_v39 = vadd.f32 %v241_v36, %v171_v29 }
 0x1e1   :  { %v228_v40 = vpop.f32.mrb[4].mxu1 }
 0x1e2   :  { %v245_v41 = vmul.f32 0.7978846, %v243_v39  ;;  %v393_v42 = vpop.f32.mrb[5].mxu1  ;;  %v244_v43 = vadd.f32 %v242_v38, %v174_v32 }
 0x1e3   :  { %v231_v44 = vpop.f32.mrb[6].mxu1 }
 0x1e4   :  { %431 = vtanh.f32 %v245_v41  ;;  %v246_v45 = vmul.f32 0.7978846, %v244_v43  ;;  %v394_v46 = vpop.f32.mrb[7].mxu1 }
 0x1e6   :  { %433 = vtanh.f32 %v246_v45 }
 0x1ee   :  { %v432_v47 = vpop.eup %431 }
 0x1ef   :  { %v249_v49 = vadd.f32 1.0, %v432_v47 }
 0x1f0   :  { %v434_v50 = vpop.eup %433 }
 0x1f1   :  { %v251_v51 = vmul.f32 %v249_v49, %v235_v48  ;;  %v250_v53 = vadd.f32 1.0, %v434_v50 }
 0x1f3   :  { %v253_v54 = vmul.f32 %v251_v51, %v228_v40  ;;  %v252_v55 = vmul.f32 %v250_v53, %v236_v52 }
 0x1f5   :  { %v254_v56 = vmul.f32 %v252_v55, %v231_v44 }
 0x1f7   :  { %v255_v57 = vpack.c.bf16 %v254_v56, %v253_v54 }
 0x1f9   :  { %404 = vmatmul.mubr.msk.bf16.vlgmr.msra.gmra.mrb[0].mxu0 %vm288_vm2, %v255_v57 }
 0x2cc   :  { %v326_v58 = vpop.f32.mrb[0].mxu0 }
 0x2cd   :  { %v333_v59 = vadd.f32 %v326_v58, %v689_v0  ;;  %v405_v60 = vpop.f32.mrb[1].mxu0 }
 0x2ce   :  { %v329_v61 = vpop.f32.mrb[2].mxu0 }
 0x2cf   :  { %335 = vst.msk [vmem:[#allocation11] sm:$0xff] %vm93_vm0, %v333_v59  ;;  %v334_v62 = vadd.f32 %v329_v61, %v691_v1  ;;  %v406_v63 = vpop.f32.mrb[3].mxu0 }
 0x2d1   :  { %336 = vst.msk [vmem:[#allocation11 + $0x8] sm:$0xff] %vm93_vm0, %v334_v62 }
 0x2d2   :  { %556 = shalt.err (!%p553_p2)
}
 0x2d3   :  { %s557_s8 = scalar_lea.hbm %s730_s5, 256 }
 0x2d4   :  { %p558_p3 = scmp.ne.s32.totalorder %s730_s5, %s557_s8  ;;  %p561_p4 = scmp.lt.u32.totalorder %s557_s8, %s730_s5 }
 0x2d6   :  { %p563_p5 = pnand %p561_p4, %p558_p3 }
 0x2d8   :  { %566 = shalt.err (!%p563_p5)
}
 0x2d9   :  { %348 = dma.vmem_to_hbm [thread:$0]  %s343_s17, 256, %s730_s5, [#allocation4], %s580_s3, %s580_s3, %s581_s29  }
 0x2da   :  { %573 = dma.done.wait [#allocation4], 256  }
 0x2db   :  { %574 = vsyncadd [#allocation4], 4294967040 }
 0x2dc   :  { %352 = vsyncpa [#allocation3], 1 }
 0x2dd   :  { %353 = vsyncpa [#allocation6], 1 }
 0x2de   :  { %354 = vsyncpa [#allocation9], 1 }
 0x2df   :  { %355 = vsyncpa [#allocation4], 1 }

// kernel: combined_block_2a_forward.3
= control target key start
LH: loop header
LB: loop body
LE: loop exit
PB: predicated region body
PF: predicated region fallthrough
CT: control target
= control target key end

     0   :  { %11 = vsyncpa [#allocation4], 0  ;;  %s2177_s0 = inlined_call_operand.hbm [shape: f32[16,32], index: 0, kind: input, shape index: {}]   ;;  %s2178_s1 = inlined_call_operand.hbm [shape: f32[1,32], index: 1, kind: input, shape index: {}]   ;;  %s2179_s2 = inlined_call_operand.hbm [shape: bf16[32,32], index: 2, kind: input, shape index: {}]   ;;  %s2180_s3 = inlined_call_operand.hbm [shape: bf16[32,32], index: 3, kind: input, shape index: {}]   ;;  %s2181_s4 = inlined_call_operand.hbm [shape: bf16[32,32], index: 4, kind: input, shape index: {}]   ;;  %s2182_s5 = inlined_call_operand.hbm [shape: bf16[32,32], index: 5, kind: input, shape index: {}]   ;;  %s2183_s6 = inlined_call_operand.hbm [shape: f32[16,32], index: 6, kind: output, shape index: {}]  }
   0x1   :  { %13 = vsyncpa [#allocation4 + $0x1], 0 }
   0x2   :  { %14 = vsyncpa [#allocation7], 0 }
   0x3   :  { %15 = vsyncpa [#allocation10], 0 }
   0x4   :  { %16 = vsyncpa [#allocation13], 0 }
   0x5   :  { %17 = vsyncpa [#allocation5], 0 }
   0x6   :  { %19 = vsyncpa [#allocation5 + $0x1], 0  ;;  %s1772_s21 = smov 0   ;;  %s1774_s22 = smov 0  }
   0x7   :  { %s1776_s23 = smov 0   ;;  %s1778_s24 = smov 0  }
   0x8 LB: > { %s1720_s25 = smov [#allocation6]   ;;  %s1793_s27 = sadd.s32 4294967295, %s1718_s24   ;;  %s1718_s24 = sphi %s1778_s24, %s2208_s24   ;;  %s1714_s23 = sphi %s1776_s23, %s2207_s23   ;;  %s1710_s22 = sphi %s1774_s22, %s2206_s22   ;;  %s1706_s21 = sphi %s1772_s21, %s2205_s21  }
   0x9   : > { %s200_s26 = sshll.u32 %s1720_s25, 4  ;;  %p1187_p0 = scmp.ge.s32.totalorder %s1718_s24, 1  ;;  %s1798_s26 = int_to_ptr.vmem [resolvable:$true] %s200_s26 }
   0xa   : > { %p2184_p1 = scmp.eq.s32.totalorder %s1793_s27, 0  ;;  %p187_p2 = scmp.lt.s32.totalorder %s1718_s24, 3 }
   0xb   : > { %s1721_s29 = smov [#allocation9]   ;;  %s1722_s8 = smov [#allocation8]  }
   0xc   : > { %p1800_p3 = pnand %p1187_p0, %p187_p2  ;;  %s223_s30 = sshll.u32 %s1721_s29, 4  ;;  %s1813_s30 = int_to_ptr.vmem [resolvable:$true] %s223_s30 }
   0xd   : > { %s210_s9 = sshll.u32 %s1722_s8, 4  ;;  %s1470_s12 = scalar_lea.hbm %s2178_s1, 16  ;;  %s1815_s9 = int_to_ptr.vmem [resolvable:$true] %s210_s9 }
   0xe   : > { %s2187_s28 = scalar_select %p1800_p3, 1, 0 }
   0xf   : > { %p1361_p5 = pneg %p1800_p3  ;;  %p1471_p7 = scmp.ne.s32.totalorder %s2178_s1, %s1470_s12 }
  0x10   : > { %p1477_p11 = scmp.lt.u32.totalorder %s1470_s12, %s2178_s1 }
  0x11   : > { %p1809_p6 = pnand %p1361_p5, %p2184_p1 }
  0x13   : > { %p1825_p8 = pneg %p1809_p6 }
  0x15   : > { %p1473_p9 = pnand %p1825_p8, %p1471_p7 }
  0x17   : > { %p1474_p10 = pneg %p1473_p9 }
  0x19   : > { %p1479_p12 = pnand %p1477_p11, %p1474_p10 }
  0x1b   : > { %1482 = shalt.err (!%p1479_p12)
}
  0x1c   : > { %s1483_s18 = scalar_lea.vmem %s1798_s26, 16  ;;  %s1490_s19 = scalar_lea.vmem %s1798_s26, 32 }
  0x1d   : > { %p1484_p13 = scmp.ne.s32.totalorder %s1798_s26, %s1483_s18  ;;  %p1491_p5 = scmp.lt.s32.totalorder %s1798_s26, %s1798_s26 }
  0x1e   : > { %p1492_p7 = scmp.lt.s32.totalorder %s1490_s19, %s1483_s18 }
  0x1f   : > { %p1486_p0 = pnand %p1484_p13, %p1825_p8 }
  0x20   : > { %p1493_p9 = por %p1492_p7, %p1491_p5 }
  0x21   : > { %p1487_p2 = pneg %p1486_p0 }
  0x23   : > { %p1494_p4 = pnand %p1493_p9, %p1487_p2 }
  0x25   : > { %1497 = shalt.err (!%p1494_p4)
}
  0x26   : > { %1364 = dma.hbm_to_vmem [thread:$0]  (!%p1809_p6), %s2178_s1, 16, %s1798_s26, [#allocation7]  }
  0x27   : > { %s1498_s10 = scalar_lea.hbm %s2180_s3, 256 }
  0x28   : > { %p1499_p10 = scmp.ne.s32.totalorder %s2180_s3, %s1498_s10  ;;  %p1505_p4 = scmp.lt.u32.totalorder %s1498_s10, %s2180_s3 }
  0x2a   : > { %p1501_p11 = pnand %p1499_p10, %p1825_p8 }
  0x2c   : > { %p1502_p12 = pneg %p1501_p11 }
  0x2e   : > { %p1507_p13 = pnand %p1505_p4, %p1502_p12 }
  0x30   : > { %1510 = shalt.err (!%p1507_p13)
}
  0x31   : > { %s1511_s26 = scalar_lea.vmem %s1813_s30, 256  ;;  %p1519_p7 = scmp.lt.s32.totalorder %s1813_s30, %s1813_s30 }
  0x32   : > { %p1512_p0 = scmp.ne.s32.totalorder %s1813_s30, %s1511_s26  ;;  %p1520_p9 = scmp.lt.s32.totalorder %s1511_s26, %s1511_s26 }
  0x34   : > { %p1514_p2 = pnand %p1512_p0, %p1825_p8  ;;  %p1521_p10 = por %p1520_p9, %p1519_p7 }
  0x36   : > { %p1515_p5 = pneg %p1514_p2 }
  0x38   : > { %p1522_p11 = pnand %p1521_p10, %p1515_p5 }
  0x3a   : > { %1525 = shalt.err (!%p1522_p11)
}
  0x3b   : > { %s1723_s16 = smov 64   ;;  %s1724_s17 = smov 4  }
  0x3c   : > { %1370 = dma.hbm_to_vmem [thread:$0]  (!%p1809_p6), %s2180_s3, 256, %s1813_s30, [#allocation10], %s1723_s16, %s1723_s16, %s1724_s17  }
  0x3d   : > { %s1526_s29 = scalar_lea.hbm %s2179_s2, 256 }
  0x3e   : > { %p1527_p12 = scmp.ne.s32.totalorder %s2179_s2, %s1526_s29  ;;  %p1533_p0 = scmp.lt.u32.totalorder %s1526_s29, %s2179_s2 }
  0x40   : > { %p1529_p4 = pnand %p1527_p12, %p1825_p8 }
  0x42   : > { %p1530_p13 = pneg %p1529_p4 }
  0x44   : > { %p1535_p2 = pnand %p1533_p0, %p1530_p13 }
  0x46   : > { %1538 = shalt.err (!%p1535_p2)
}
  0x47   : > { %s1539_s30 = scalar_lea.vmem %s1815_s9, 256  ;;  %p1547_p10 = scmp.lt.s32.totalorder %s1815_s9, %s1815_s9 }
  0x48   : > { %p1540_p5 = scmp.ne.s32.totalorder %s1815_s9, %s1539_s30  ;;  %p1548_p11 = scmp.lt.s32.totalorder %s1539_s30, %s1539_s30 }
  0x4a   : > { %p1542_p7 = pnand %p1540_p5, %p1825_p8  ;;  %p1549_p12 = por %p1548_p11, %p1547_p10 }
  0x4c   : > { %p1543_p9 = pneg %p1542_p7 }
  0x4e   : > { %p1550_p4 = pnand %p1549_p12, %p1543_p9 }
  0x50   : > { %1553 = shalt.err (!%p1550_p4)
}
  0x51   : > { %1367 = dma.hbm_to_vmem [thread:$0]  (!%p1809_p6), %s2179_s2, 256, %s1815_s9, [#allocation7], %s1723_s16, %s1723_s16, %s1724_s17  }
  0x52   : > { %s1725_s26 = smov [#allocation11]   ;;  %s1726_s19 = smov [#allocation12]  }
  0x53   : > { %s236_s18 = sshll.u32 %s1725_s26, 4  ;;  %s249_s20 = sshll.u32 %s1726_s19, 4  ;;  %s237_s18 = int_to_ptr.vmem [resolvable:$true] %s236_s18  ;;  %s250_s20 = int_to_ptr.vmem [resolvable:$true] %s249_s20 }
  0x54   : > { %s1554_s8 = scalar_lea.hbm %s2181_s4, 256 }
  0x55   : > { %p1555_p13 = scmp.ne.s32.totalorder %s2181_s4, %s1554_s8  ;;  %p1561_p5 = scmp.lt.u32.totalorder %s1554_s8, %s2181_s4 }
  0x57   : > { %p1557_p0 = pnand %p1555_p13, %p1825_p8 }
  0x59   : > { %p1558_p2 = pneg %p1557_p0 }
  0x5b   : > { %p1563_p7 = pnand %p1561_p5, %p1558_p2 }
  0x5d   : > { %1566 = shalt.err (!%p1563_p7)
}
  0x5e   : > { %s1567_s9 = scalar_lea.vmem %s237_s18, 256  ;;  %p1575_p12 = scmp.lt.s32.totalorder %s237_s18, %s237_s18 }
  0x5f   : > { %p1568_p9 = scmp.ne.s32.totalorder %s237_s18, %s1567_s9  ;;  %p1576_p4 = scmp.lt.s32.totalorder %s1567_s9, %s1567_s9 }
  0x61   : > { %p1570_p10 = pnand %p1568_p9, %p1825_p8  ;;  %p1577_p1 = por %p1576_p4, %p1575_p12 }
  0x63   : > { %p1571_p11 = pneg %p1570_p10 }
  0x65   : > { %p1578_p3 = pnand %p1577_p1, %p1571_p11 }
  0x67   : > { %1581 = shalt.err (!%p1578_p3)
}
  0x68   : > { %1373 = dma.hbm_to_vmem [thread:$0]  (!%p1809_p6), %s2181_s4, 256, %s237_s18, [#allocation10], %s1723_s16, %s1723_s16, %s1724_s17  }
  0x69   : > { %s1582_s25 = scalar_lea.hbm %s2182_s5, 256 }
  0x6a   : > { %p1583_p1 = scmp.ne.s32.totalorder %s2182_s5, %s1582_s25  ;;  %p1589_p0 = scmp.lt.u32.totalorder %s1582_s25, %s2182_s5 }
  0x6c   : > { %p1585_p3 = pnand %p1583_p1, %p1825_p8 }
  0x6e   : > { %p1586_p13 = pneg %p1585_p3 }
  0x70   : > { %p1591_p2 = pnand %p1589_p0, %p1586_p13 }
  0x72   : > { %1594 = shalt.err (!%p1591_p2)
}
  0x73   : > { %s1595_s12 = scalar_lea.vmem %s250_s20, 256  ;;  %p1603_p10 = scmp.lt.s32.totalorder %s250_s20, %s250_s20 }
  0x74   : > { %p1596_p5 = scmp.ne.s32.totalorder %s250_s20, %s1595_s12  ;;  %p1604_p11 = scmp.lt.s32.totalorder %s1595_s12, %s1595_s12 }
  0x76   : > { %p1598_p7 = pnand %p1596_p5, %p1825_p8  ;;  %p1605_p12 = por %p1604_p11, %p1603_p10 }
  0x78   : > { %p1599_p9 = pneg %p1598_p7 }
  0x7a   : > { %p1606_p4 = pnand %p1605_p12, %p1599_p9 }
  0x7c   : > { %1609 = shalt.err (!%p1606_p4)
}
  0x7d   : > { %1376 = dma.hbm_to_vmem [thread:$0]  (!%p1809_p6), %s2182_s5, 256, %s250_s20, [#allocation13], %s1723_s16, %s1723_s16, %s1724_s17  }
  0x7e   : > { %s1186_s7 = sadd.s32 4294967294, %s1718_s24   ;;  %s1943_s15 = sadd.s32 1, %s1718_s24  }
  0x7f   : > { %s32_s9 = sadd.s32 1, %s1714_s23  ;;  %s29_s13 = ssub.s32 %s1718_s24, %s1943_s15 }
  0x80   : > { %p39_p8 = scmp.ne.s32.totalorder %s1714_s23, %s1710_s22  ;;  %p30_p1 = scmp.eq.s32.totalorder %s29_s13, 0 }
  0x81   : > { %p40_p3 = scmp.eq.s32.totalorder %s1718_s24, 0  ;;  %p45_p13 = scmp.ne.s32.totalorder %s1710_s22, %s1706_s21 }
  0x82   : > { %p174_p0 = scmp.eq.s32.totalorder %s1793_s27, 1  ;;  %p2190_p5 = scmp.eq.s32.totalorder %s1793_s27, 0 }
  0x83   : > { %s1955_s14 = scalar_select %p30_p1, %s1714_s23, %s32_s9  }
  0x84   : > { %p41_p2 = por %p40_p3, %p39_p8  ;;  %p1959_p7 = por %p2190_p5, %p45_p13 }
  0x85   : > { %p1963_p6 = por %p174_p0, %p39_p8  ;;  %p180_p9 = scmp.eq.s32.totalorder %s1186_s7, 1 }
  0x86   : > { %p1390_p10 = scmp.lt.s32.totalorder %s1718_s24, 2  ;;  %s263_s17 = sand.u32 1, %s1714_s23  }
  0x87   : > { %s2192_s16 = scalar_select %p1963_p6, 1, 0 }
  0x88   : > { %p1969_p11 = por %p180_p9, %p45_p13  ;;  %s1194_s19 = sshll.u32 %s263_s17, 3 }
  0x89   : > { %s1195_s25 = sshll.u32 %s1718_s24, 7  ;;  %s267_s11 = scalar_lea.vmem [#allocation3], %s1194_s19 }
  0x8a   : > { %s2193_s20 = scalar_select %p1969_p11, 1, 0 }
  0x8b   : > { %s1977_s10 = scalar_lea.hbm %s2177_s0, %s1195_s25  ;;  %s274_s12 = sshll.u32 %s267_s11, 4  ;;  %s1983_s12 = int_to_ptr.vmem [resolvable:$true] %s274_s12 }
  0x8c   : > { %p1979_p12 = pnand %p1390_p10, %p41_p2  ;;  %s264_s30 = scalar_lea.sflag [#allocation4], %s263_s17 }
  0x8d   : > { %s1610_s7 = scalar_lea.hbm %s1977_s10, 128  ;;  %s1615_s19 = scalar_lea.hbm %s2177_s0, 256 }
  0x8e   : > { %p1611_p4 = scmp.ne.s32.totalorder %s1977_s10, %s1610_s7  ;;  %p1612_p8 = pneg %p1979_p12 }
  0x8f   : > { %p1616_p13 = scmp.lt.u32.totalorder %s1977_s10, %s2177_s0  ;;  %p1617_p0 = scmp.lt.u32.totalorder %s1615_s19, %s1610_s7 }
  0x90   : > { %p1613_p1 = pnand %p1612_p8, %p1611_p4  ;;  %p1619_p5 = scmp.lt.u32.totalorder %s1610_s7, %s1977_s10 }
  0x91   : > { %p1618_p2 = por %p1617_p0, %p1616_p13 }
  0x92   : > { %p1614_p3 = pneg %p1613_p1 }
  0x93   : > { %p1620_p9 = por %p1619_p5, %p1618_p2 }
  0x95   : > { %p1621_p10 = pnand %p1620_p9, %p1614_p3 }
  0x97   : > { %1624 = shalt.err (!%p1621_p10)
}
  0x98   : > { %s1625_s17 = scalar_lea.vmem %s1983_s12, 128  ;;  %s1727_s8 = smov [#allocation3]  }
  0x99   : > { %p1626_p4 = scmp.ne.s32.totalorder %s1983_s12, %s1625_s17  ;;  %s1630_s11 = sshll.u32 %s1727_s8, 4  ;;  %s1631_s11 = int_to_ptr.vmem [resolvable:$false] %s1630_s11 }
  0x9a   : > { %s1632_s9 = scalar_lea.vmem %s1631_s11, 256  ;;  %p1633_p6 = scmp.lt.s32.totalorder %s1983_s12, %s1631_s11 }
  0x9b   : > { %p1628_p1 = pnand %p1626_p4, %p1612_p8  ;;  %p1634_p13 = scmp.lt.s32.totalorder %s1632_s9, %s1625_s17 }
  0x9d   : > { %p1629_p11 = pneg %p1628_p1  ;;  %p1635_p0 = por %p1634_p13, %p1633_p6 }
  0x9f   : > { %p1636_p2 = pnand %p1635_p0, %p1629_p11 }
  0xa1   : > { %1639 = shalt.err (!%p1636_p2)
}
  0xa2   : > { %1380 = dma.hbm_to_vmem [thread:$0]  (!%p1979_p12), %s1977_s10, 128, %s1983_s12, %s264_s30  }
  0xa3   : > { %p2195_p3 = scmp.ne.s32.totalorder %s2187_s28, 0 }
  0xa4   : > { %s2013_s7 = sand.u32 (!%p2195_p3), 1, %s1710_s22  }
  0xa5   : > { %283 = sbr.rel (%p2195_p3) target bundleno = 1796 (0x704), region = 44  ;;  %s1197_s13 = sshll.u32 (!%p2195_p3), %s2013_s7, 3 }
  0xa6   : > { %s286_s19 = scalar_lea.sflag (!%p2195_p3), [#allocation4], %s2013_s7  ;;  %s289_s25 = scalar_lea.vmem (!%p2195_p3), [#allocation3], %s1197_s13 }
  0xac   : > { %1685 = dma.done.wait (%p1959_p7), %s286_s19, 128  }
  0xad   : > { %1687 = vsyncadd (%p1959_p7), %s286_s19, 4294967168  ;;  %p2196_p6 = scmp.eq.s32.totalorder %s1793_s27, 0 }
  0xaf   : > { %1689 = dma.done.wait (%p2196_p6), [#allocation7], 272   ;;  %p2197_p11 = pmov %p2196_p6 }
  0xb0   : > { %p2198_p12 = pmov %p2196_p6 }
  0xb1   : > { %1691 = vsyncadd (%p2197_p11), [#allocation7], 4294967024 }
  0xb2   : > { %1693 = dma.done.wait (%p2198_p12), [#allocation10], 512   ;;  %p2199_p8 = pmov %p2196_p6 }
  0xb3   : > { %p2200_p5 = pmov %p2196_p6 }
  0xb4   : > { %1695 = vsyncadd (%p2199_p8), [#allocation10], 4294966784 }
  0xb5   : > { %1697 = dma.done.wait (%p2200_p5), [#allocation13], 256   ;;  %p2201_p9 = pmov %p2200_p5 }
  0xb6   : > { %v2035_v0 = vld [vmem:[%s289_s25] sm:$0xff]  ;;  %vm342_vm0 = vcmask 261120   ;;  %v1444_v3 = vld [vmem:[#allocation8] sm:$0xff]   ;;  %v1728_v5 = vmov 0.0   ;;  %vm1729_vm1 = vmmov 0   ;;  %vm533_vm2 = vcmask 64512  }
  0xb7   : > { %1699 = vsyncadd (%p2201_p9), [#allocation13], 4294967040  ;;  %v341_v1 = vmul.f32 %v2035_v0, %v2035_v0  ;;  %v1445_v4 = vld [vmem:[#allocation9] sm:$0xff]   ;;  %1257 = vmatprep.subr.bf16.mxu0 %v1728_v5  ;;  %1265 = vmatprep.subr.bf16.mxu1 %v1728_v5  ;;  %v1446_v6 = vld [vmem:[#allocation8 + $0x8] sm:$0xff]   ;;  %s1730_s28 = smov 120   ;;  %s1731_s26 = smov 112  }
  0xb8   : > { %1258 = vmatpush3.bf16.msra.mxu0 %v1444_v3  ;;  %1266 = vmatpush3.bf16.msra.mxu1 %v1445_v4  ;;  %v1447_v7 = vld [vmem:[#allocation9 + $0x8] sm:$0xff]   ;;  %v1448_v15 = vld [vmem:[#allocation11] sm:$0xff]   ;;  %v1449_v17 = vld [vmem:[#allocation11 + $0x8] sm:$0xff]   ;;  %vm595_vm3 = vcmask 1043456   ;;  %s1732_s10 = smov 104   ;;  %s1733_s12 = smov 8  }
  0xb9   : > { %v343_v2 = vsel %vm342_vm0, %v341_v1, 0.0  ;;  %1259 = vmatprep.subr.bf16.mxu0 %v1728_v5  ;;  %1267 = vmatprep.subr.bf16.mxu1 %v1728_v5  ;;  %v1204_v12 = vld [vmem:[#allocation6] ss:$0 sm:$0xff]  ;;  %s1734_s18 = smov 16   ;;  %s1735_s30 = smov 24   ;;  %vm757_vm4 = vcmask 130112  }
  0xba   : > { %344 = vadd.xlane.f32.xlu0 %v343_v2  ;;  %1261 = vmatprep.mubr.msk.bf16.mxu0 %vm1729_vm1, %v1728_v5  ;;  %vm873_vm5 = vcmask 195712   ;;  %vm989_vm6 = vcmask 261312   ;;  %s1226_s29 = sshll.u32 %s1793_s27, 7  ;;  %s337_s17 = scalar_lea.vmem [#allocation14], %s1197_s13 }
  0xbb   : > { %1269 = vmatprep.mubr.msk.bf16.mxu1 %vm1729_vm1, %v1728_v5  ;;  %s1068_s8 = sshll.u32 %s337_s17, 4  ;;  %s2132_s19 = scalar_lea.hbm %s2183_s6, %s1226_s29  ;;  %s2134_s8 = int_to_ptr.vmem [resolvable:$true] %s1068_s8 }
  0xbc   : > { %1260 = vmatpush3.bf16.msra.mxu0 %v1446_v6  ;;  %1268 = vmatpush3.bf16.msra.mxu1 %v1447_v7  ;;  %s1055_s27 = scalar_lea.sflag [#allocation5], %s2013_s7  ;;  %s1640_s13 = scalar_lea.vmem %s2134_s8, 128 }
  0xbd   : > { %1273 = vmatprep.subr.bf16.mxu0 %v1728_v5  ;;  %1281 = vmatprep.subr.bf16.mxu1 %v1728_v5  ;;  %p1641_p7 = scmp.ne.s32.totalorder %s2134_s8, %s1640_s13  ;;  %p2202_p10 = scmp.ne.s32.totalorder %s2192_s16, 0 }
  0xbe   : > { %s1736_s25 = smov [#allocation14]  }
  0xbf   : > { %p1642_p4 = pnand %p1641_p7, %p2202_p10 }
  0xc1   : > { %p1643_p1 = pneg %p1642_p4 }
 0x147   : > { %v345_v8 = vpop.xlane.xlu0 %344 }
 0x148   : > { %v347_v9 = vmul.f32 0.03125, %v345_v8 }
 0x14a   : > { %v348_v10 = vadd.f32 1e-06, %v347_v9 }
 0x14c   : > { %1452 = vrsqrt.f32 %v348_v10 }
 0x156   : > { %v1453_v11 = vpop.eup %1452 }
 0x157   : > { %v350_v13 = vmul.f32 %v1453_v11, %v2035_v0 }
 0x159   : > { %v357_v14 = vmul.f32 %v1204_v12, %v350_v13 }
 0x15b   : > { %v358_v16 = vpack.c.bf16 %v357_v14, %v357_v14 }
 0x15d   : > { %1262 = vmatmul.mubr.msk.bf16.vlgmr.msra.gmra.mrb[0].mxu0 %vm342_vm0, %v358_v16  ;;  %1270 = vmatmul.mubr.msk.bf16.vlgmr.msra.gmra.mrb[0].mxu1 %vm342_vm0, %v358_v16 }
 0x15e   : > { %1274 = vmatpush3.bf16.msra.mxu0 %v1448_v15  ;;  %1277 = vmatprep.mubr.msk.bf16.mxu0 %vm1729_vm1, %v1728_v5 }
 0x15f   : > { %1275 = vmatprep.subr.bf16.mxu0 %v1728_v5  ;;  %1283 = vmatprep.mubr.msk.bf16.mxu1 %vm1729_vm1, %v1728_v5 }
 0x162   : > { %1276 = vmatpush3.bf16.msra.mxu0 %v1449_v17 }
 0x163   : > { %1287 = vmatprep.subr.bf16.mxu0 %v1728_v5 }
 0x165   : > { %1278 = vmatmul.mubr.msk.bf16.vlgmr.msra.gmra.mrb[4].mxu0 %vm342_vm0, %v358_v16 }
 0x166   : > { %1289 = vmatprep.mubr.msk.bf16.mxu0 %vm1729_vm1, %v1728_v5 }
 0x230   : > { %v412_v18 = vpop.f32.mrb[0].mxu0  ;;  %v468_v19 = vpop.f32.mrb[0].mxu1 }
 0x231   : > { %v530_v20 = vpack.c.bf16 %v412_v18, %v412_v18  ;;  %v531_v21 = vpack.c.bf16 %v468_v19, %v468_v19  ;;  %v1263_v22 = vpop.f32.mrb[1].mxu0  ;;  %v1271_v23 = vpop.f32.mrb[1].mxu1 }
 0x232   : > { %v415_v24 = vpop.f32.mrb[2].mxu0  ;;  %v471_v25 = vpop.f32.mrb[2].mxu1 }
 0x233   : > { %644 = vrot.lane.b32.xlu0 %v531_v21, %s1730_s28  ;;  %v1272_v26 = vpop.f32.mrb[3].mxu1  ;;  %641 = vrot.lane.b32.xlu1 %v530_v20, %s1730_s28  ;;  %v1264_v27 = vpop.f32.mrb[3].mxu0  ;;  %v538_v28 = vsel %vm533_vm2, %v531_v21, 0 }
 0x234   : > { %1282 = vmatpush3.bf16.xpose.msra.mxu1 %v538_v28 }
 0x235   : > { %1293 = vmatprep.subr.bf16.mxu1 %v1728_v5 }
 0x237   : > { %761 = vrot.lane.b32.xlu1 %v531_v21, %s1731_s26 }
 0x238   : > { %v524_v29 = vpop.f32.mrb[4].mxu0 }
 0x239   : > { %v2067_v30 = vpack.c.bf16 %v524_v29, %v524_v29  ;;  %v1279_v31 = vpop.f32.mrb[5].mxu0 }
 0x23a   : > { %v527_v32 = vpop.f32.mrb[6].mxu0 }
 0x23b   : > { %759 = vrot.lane.b32.xlu1 %v530_v20, %s1731_s26  ;;  %v1280_v33 = vpop.f32.mrb[7].mxu0  ;;  %1284 = vmatmul.mubr.msk.bf16.vlgmr.msra.gmra.mrb[4].mxu1 %vm533_vm2, %v530_v20  ;;  %v597_v34 = vsel %vm595_vm3, %v2067_v30, 0 }
 0x23c   : > { %1288 = vmatpush3.bf16.msra.mxu0 %v597_v34  ;;  %1295 = vmatprep.mubr.msk.bf16.mxu1 %vm1729_vm1, %v1728_v5 }
 0x23d   : > { %1299 = vmatprep.subr.bf16.mxu0 %v1728_v5 }
 0x23f   : > { %877 = vrot.lane.b32.xlu1 %v531_v21, %s1732_s10 }
 0x243   : > { %875 = vrot.lane.b32.xlu1 %v530_v20, %s1732_s10 }
 0x2a5   : > { %v645_v35 = vpop.permute.xlu0 %644  ;;  %v642_v36 = vpop.permute.xlu1 %641 }
 0x2a6   : > { %v650_v37 = vsel %vm533_vm2, %v645_v35, 0 }
 0x2a7   : > { %1294 = vmatpush3.bf16.xpose.msra.mxu1 %v650_v37 }
 0x2a8   : > { %1305 = vmatprep.subr.bf16.mxu1 %v1728_v5 }
 0x2a9   : > { %v762_v38 = vpop.permute.xlu1 %761 }
 0x2aa   : > { %v767_v40 = vsel %vm533_vm2, %v762_v38, 0 }
 0x2ad   : > { %v760_v39 = vpop.permute.xlu1 %759 }
 0x2ae   : > { %1296 = vmatmul.mubr.msk.bf16.vlgmr.msra.gmra.mrb[8].mxu1 %vm533_vm2, %v642_v36 }
 0x2af   : > { %1306 = vmatpush3.bf16.xpose.msra.mxu1 %v767_v40  ;;  %1307 = vmatprep.mubr.msk.bf16.mxu1 %vm1729_vm1, %v1728_v5 }
 0x2b0   : > { %1317 = vmatprep.subr.bf16.mxu1 %v1728_v5 }
 0x2b1   : > { %v878_v41 = vpop.permute.xlu1 %877 }
 0x2b2   : > { %v883_v42 = vsel %vm533_vm2, %v878_v41, 0 }
 0x2b5   : > { %v876_v43 = vpop.permute.xlu1 %875 }
 0x2b6   : > { %1308 = vmatmul.mubr.msk.bf16.vlgmr.msra.gmra.mrb[12].mxu1 %vm533_vm2, %v760_v39 }
 0x2b7   : > { %1318 = vmatpush3.bf16.xpose.msra.mxu1 %v883_v42  ;;  %1319 = vmatprep.mubr.msk.bf16.mxu1 %vm1729_vm1, %v1728_v5 }
 0x2b8   : > { %1329 = vmatprep.subr.bf16.mxu1 %v1728_v5 }
 0x2be   : > { %1320 = vmatmul.mubr.msk.bf16.vlgmr.msra.gmra.mrb[16].mxu1 %vm533_vm2, %v876_v43 }
 0x2bf   : > { %1333 = vmatprep.mubr.msk.bf16.mxu1 %vm1729_vm1, %v1728_v5 }
 0x30e   : > { %v574_v44 = vpop.f32.mrb[4].mxu1 }
 0x30f   : > { %v1285_v45 = vpop.f32.mrb[5].mxu1  ;;  %v580_v46 = vsel %vm533_vm2, %v574_v44, -inf }
 0x310   : > { %581 = vmax.xlane.f32.xlu1 %v580_v46  ;;  %v577_v47 = vpop.f32.mrb[6].mxu1 }
 0x311   : > { %v1286_v48 = vpop.f32.mrb[7].mxu1 }
 0x381   : > { %v686_v49 = vpop.f32.mrb[8].mxu1 }
 0x382   : > { %v1297_v50 = vpop.f32.mrb[9].mxu1  ;;  %v692_v51 = vsel %vm533_vm2, %v686_v49, -inf }
 0x383   : > { %693 = vmax.xlane.f32.xlu0 %v692_v51  ;;  %v689_v52 = vpop.f32.mrb[10].mxu1 }
 0x384   : > { %v1298_v53 = vpop.f32.mrb[11].mxu1  ;;  %v1450_v52 = vld [vmem:[#allocation12] sm:$0xff]  }
 0x385   : > { %1330 = vmatpush3.bf16.msra.mxu1 %v1450_v52  ;;  %v1451_v53 = vld [vmem:[#allocation12 + $0x8] sm:$0xff]  }
 0x386   : > { %1331 = vmatprep.subr.bf16.mxu1 %v1728_v5 }
 0x389   : > { %v803_v54 = vpop.f32.mrb[12].mxu1  ;;  %1332 = vmatpush3.bf16.msra.mxu1 %v1451_v53 }
 0x38a   : > { %v1309_v55 = vpop.f32.mrb[13].mxu1  ;;  %v809_v56 = vsel %vm533_vm2, %v803_v54, -inf }
 0x38b   : > { %810 = vmax.xlane.f32.xlu1 %v809_v56  ;;  %v806_v57 = vpop.f32.mrb[14].mxu1 }
 0x38c   : > { %v1310_v58 = vpop.f32.mrb[15].mxu1 }
 0x391   : > { %v919_v59 = vpop.f32.mrb[16].mxu1 }
 0x392   : > { %v1321_v60 = vpop.f32.mrb[17].mxu1  ;;  %v925_v61 = vsel %vm533_vm2, %v919_v59, -inf }
 0x393   : > { %926 = vmax.xlane.f32.xlu0 %v925_v61  ;;  %v922_v62 = vpop.f32.mrb[18].mxu1 }
 0x394   : > { %v1322_v63 = vpop.f32.mrb[19].mxu1 }
 0x39d   : > { %v582_v1 = vpop.xlane.xlu1 %581 }
 0x39e   : > { %v583_v2 = vsub.f32 %v574_v44, %v582_v1 }
 0x3a0   : > { %v584_v3 = vmul.f32 1.442695, %v583_v2 }
 0x3a2   : > { %1454 = vpow2.f32 %v584_v3 }
 0x3ac   : > { %v1455_v4 = vpop.eup %1454 }
 0x3ad   : > { %v586_v6 = vsel %vm533_vm2, %v1455_v4, 0.0 }
 0x3ae   : > { %587 = vadd.xlane.f32.xlu1 %v586_v6 }
 0x3bf   : > { %705 = vrot.lane.b32.xlu1 %v2067_v30, %s1730_s28  ;;  %s1644_s28 = sshll.u32 %s1736_s25, 4  ;;  %s1645_s28 = int_to_ptr.vmem [resolvable:$false] %s1644_s28 }
 0x3c0   : > { %p1647_p13 = scmp.lt.s32.totalorder %s2134_s8, %s1645_s28 }
 0x410   : > { %v694_v7 = vpop.xlane.xlu0 %693 }
 0x411   : > { %v695_v8 = vsub.f32 %v686_v49, %v694_v7 }
 0x413   : > { %v696_v9 = vmul.f32 1.442695, %v695_v8 }
 0x415   : > { %1456 = vpow2.f32 %v696_v9 }
 0x418   : > { %v811_v10 = vpop.xlane.xlu1 %810 }
 0x419   : > { %v812_v11 = vsub.f32 %v803_v54, %v811_v10 }
 0x41b   : > { %v813_v12 = vmul.f32 1.442695, %v812_v11 }
 0x41d   : > { %1458 = vpow2.f32 %v813_v12 }
 0x41f   : > { %v1457_v13 = vpop.eup %1456 }
 0x420   : > { %v927_v14 = vpop.xlane.xlu0 %926  ;;  %v698_v15 = vsel %vm533_vm2, %v1457_v13, 0.0 }
 0x421   : > { %v928_v16 = vsub.f32 %v919_v59, %v927_v14  ;;  %699 = vadd.xlane.f32.xlu0 %v698_v15 }
 0x423   : > { %v929_v17 = vmul.f32 1.442695, %v928_v16 }
 0x425   : > { %1460 = vpow2.f32 %v929_v17 }
 0x427   : > { %v1459_v18 = vpop.eup %1458 }
 0x428   : > { %v815_v19 = vsel %vm533_vm2, %v1459_v18, 0.0 }
 0x429   : > { %816 = vadd.xlane.f32.xlu1 %v815_v19 }
 0x42f   : > { %v1461_v20 = vpop.eup %1460 }
 0x430   : > { %v931_v21 = vsel %vm533_vm2, %v1461_v20, 0.0 }
 0x431   : > { %932 = vadd.xlane.f32.xlu0 %v931_v21 }
 0x43a   : > { %937 = vrot.lane.b32.xlu1 %v2067_v30, %s1732_s10 }
 0x43b   : > { %v588_v22 = vpop.xlane.xlu1 %587 }
 0x43c   : > { %1462 = vrcp.f32 %v588_v22 }
 0x43f   : > { %v706_v25 = vpop.permute.xlu1 %705 }
 0x440   : > { %v711_v27 = vsel %vm595_vm3, %v706_v25, 0 }
 0x446   : > { %v1463_v23 = vpop.eup %1462 }
 0x447   : > { %v590_v24 = vmul.f32 %v1463_v23, %v1455_v4  ;;  %821 = vrot.lane.b32.xlu0 %v2067_v30, %s1731_s26  ;;  %s1646_s26 = scalar_lea.vmem %s1645_s28, 256 }
 0x448   : > { %p1648_p0 = scmp.lt.s32.totalorder %s1646_s26, %s1640_s13 }
 0x449   : > { %v591_v26 = vpack.c.bf16 %v590_v24, %v590_v24 }
 0x44a   : > { %p1649_p2 = por %p1648_p0, %p1647_p13 }
 0x44b   : > { %1290 = vmatmul.mubr.msk.bf16.vlgmr.msra.gmra.mrb[8].mxu0 %vm533_vm2, %v591_v26 }
 0x44c   : > { %1300 = vmatpush3.bf16.msra.mxu0 %v711_v27  ;;  %1301 = vmatprep.mubr.msk.bf16.mxu0 %vm1729_vm1, %v1728_v5  ;;  %p1650_p3 = pnand %p1649_p2, %p1643_p1 }
 0x44d   : > { %1311 = vmatprep.subr.bf16.mxu0 %v1728_v5 }
 0x4ae   : > { %v700_v28 = vpop.xlane.xlu0 %699 }
 0x4af   : > { %1464 = vrcp.f32 %v700_v28 }
 0x4b6   : > { %v817_v29 = vpop.xlane.xlu1 %816 }
 0x4b7   : > { %1466 = vrcp.f32 %v817_v29 }
 0x4b9   : > { %v1465_v31 = vpop.eup %1464 }
 0x4ba   : > { %v702_v32 = vmul.f32 %v1465_v31, %v1457_v13  ;;  %v938_v38 = vpop.permute.xlu1 %937 }
 0x4bb   : > { %v943_v40 = vsel %vm595_vm3, %v938_v38, 0 }
 0x4bc   : > { %v703_v33 = vpack.c.bf16 %v702_v32, %v702_v32 }
 0x4be   : > { %v933_v30 = vpop.xlane.xlu0 %932  ;;  %1302 = vmatmul.mubr.msk.bf16.vlgmr.msra.gmra.mrb[12].mxu0 %vm533_vm2, %v703_v33 }
 0x4bf   : > { %1468 = vrcp.f32 %v933_v30  ;;  %1313 = vmatprep.mubr.msk.bf16.mxu0 %vm1729_vm1, %v1728_v5 }
 0x4c1   : > { %v1467_v34 = vpop.eup %1466 }
 0x4c2   : > { %v819_v35 = vmul.f32 %v1467_v34, %v1459_v18  ;;  %v822_v36 = vpop.permute.xlu0 %821 }
 0x4c3   : > { %v827_v37 = vsel %vm595_vm3, %v822_v36, 0 }
 0x4c4   : > { %1312 = vmatpush3.bf16.msra.mxu0 %v827_v37  ;;  %v820_v39 = vpack.c.bf16 %v819_v35, %v819_v35 }
 0x4c5   : > { %1323 = vmatprep.subr.bf16.mxu0 %v1728_v5 }
 0x4c7   : > { %1314 = vmatmul.mubr.msk.bf16.vlgmr.msra.gmra.mrb[16].mxu0 %vm533_vm2, %v820_v39 }
 0x4c8   : > { %1324 = vmatpush3.bf16.msra.mxu0 %v943_v40  ;;  %1325 = vmatprep.mubr.msk.bf16.mxu0 %vm1729_vm1, %v1728_v5 }
 0x4c9   : > { %v1469_v41 = vpop.eup %1468 }
 0x4ca   : > { %v935_v42 = vmul.f32 %v1469_v41, %v1461_v20 }
 0x4cc   : > { %v936_v43 = vpack.c.bf16 %v935_v42, %v935_v42 }
 0x4cf   : > { %1326 = vmatmul.mubr.msk.bf16.vlgmr.msra.gmra.mrb[20].mxu0 %vm533_vm2, %v936_v43 }
 0x51e   : > { %v633_v44 = vpop.f32.mrb[8].mxu0 }
 0x51f   : > { %639 = vst.msk [vmem:[#allocation2] sm:$0xff] %vm533_vm2, %v633_v44  ;;  %v1291_v45 = vpop.f32.mrb[9].mxu0 }
 0x520   : > { %v636_v46 = vpop.f32.mrb[10].mxu0 }
 0x521   : > { %v1292_v47 = vpop.f32.mrb[11].mxu0 }
 0x591   : > { %v747_v48 = vpop.f32.mrb[12].mxu0 }
 0x592   : > { %754 = vrot.lane.b32.xlu1 %v747_v48, %s1733_s12  ;;  %v1303_v49 = vpop.f32.mrb[13].mxu0 }
 0x593   : > { %v750_v50 = vpop.f32.mrb[14].mxu0 }
 0x594   : > { %v1304_v51 = vpop.f32.mrb[15].mxu0 }
 0x59a   : > { %v863_v54 = vpop.f32.mrb[16].mxu0 }
 0x59b   : > { %870 = vrot.lane.b32.xlu0 %v863_v54, %s1734_s18  ;;  %v1315_v55 = vpop.f32.mrb[17].mxu0 }
 0x59c   : > { %v866_v56 = vpop.f32.mrb[18].mxu0 }
 0x59d   : > { %v1316_v57 = vpop.f32.mrb[19].mxu0 }
 0x5a2   : > { %v979_v58 = vpop.f32.mrb[20].mxu0 }
 0x5a3   : > { %986 = vrot.lane.b32.xlu1 %v979_v58, %s1735_s30  ;;  %v1327_v59 = vpop.f32.mrb[21].mxu0 }
 0x5a4   : > { %v982_v60 = vpop.f32.mrb[22].mxu0 }
 0x5a5   : > { %v1328_v61 = vpop.f32.mrb[23].mxu0 }
 0x604   : > { %v755_v62 = vpop.permute.xlu1 %754 }
 0x605   : > { %758 = vst.msk [vmem:[#allocation2] sm:$0xff] %vm757_vm4, %v755_v62 }
 0x60d   : > { %v871_v5 = vpop.permute.xlu0 %870 }
 0x60e   : > { %874 = vst.msk [vmem:[#allocation2] sm:$0xff] %vm873_vm5, %v871_v5 }
 0x615   : > { %v987_v63 = vpop.permute.xlu1 %986 }
 0x616   : > { %990 = vst.msk [vmem:[#allocation2] sm:$0xff] %vm989_vm6, %v987_v63 }
 0x61d   : > { %v991_v1 = vld [vmem:[#allocation2] sm:$0xff] }
 0x61e   : > { %v992_v2 = vpack.c.bf16 %v991_v1, %v991_v1 }
 0x620   : > { %1334 = vmatmul.mubr.msk.bf16.vlgmr.msra.gmra.mrb[20].mxu1 %vm342_vm0, %v992_v2 }
 0x6f3   : > { %v1046_v3 = vpop.f32.mrb[20].mxu1 }
 0x6f4   : > { %v1052_v4 = vadd.f32 %v1046_v3, %v2035_v0  ;;  %v1335_v6 = vpop.f32.mrb[21].mxu1 }
 0x6f5   : > { %v1049_v7 = vpop.f32.mrb[22].mxu1 }
 0x6f6   : > { %v1336_v8 = vpop.f32.mrb[23].mxu1  ;;  %1053 = vst.msk [vmem:[%s337_s17] sm:$0xff] %vm342_vm0, %v1052_v4 }
 0x6f7   : > { %1653 = shalt.err (!%p1650_p3)
}
 0x6f8   : > { %s1654_s7 = scalar_lea.hbm %s2132_s19, 128  ;;  %s1658_s18 = scalar_lea.hbm %s2183_s6, 256 }
 0x6f9   : > { %p1655_p6 = scmp.ne.s32.totalorder %s2132_s19, %s1654_s7  ;;  %p1659_p8 = scmp.lt.u32.totalorder %s2132_s19, %s2183_s6 }
 0x6fa   : > { %p1660_p5 = scmp.lt.u32.totalorder %s1658_s18, %s1654_s7  ;;  %p1662_p7 = scmp.lt.u32.totalorder %s1654_s7, %s2132_s19 }
 0x6fb   : > { %p1656_p11 = pnand %p1655_p6, %p2202_p10 }
 0x6fc   : > { %p1661_p9 = por %p1660_p5, %p1659_p8 }
 0x6fd   : > { %p1657_p12 = pneg %p1656_p11 }
 0x6fe   : > { %p1663_p4 = por %p1662_p7, %p1661_p9 }
 0x700   : > { %p1664_p1 = pnand %p1663_p4, %p1657_p12 }
 0x702   : > { %1667 = shalt.err (!%p1664_p1)
}
 0x703   : > { %1359 = dma.vmem_to_hbm [thread:$0]  (%p2202_p10), %s2134_s8, 128, %s2132_s19, %s1055_s27  }
 0x704 PF: > { %s1080_s17 = sand.u32 1, %s1706_s21   ;;  %p2203_p13 = scmp.ne.s32.totalorder %s2193_s20, 0 }
 0x705   : > { %p2204_p0 = scmp.ge.s32.totalorder %s1718_s24, 2  ;;  %s1081_s11 = scalar_lea.sflag [#allocation5], %s1080_s17 }
 0x707   : > { %p1382_p2 = pnand %p2204_p0, %p2203_p13 }
 0x709   : > { %1701 = dma.done.wait (!%p1382_p2), %s1081_s11, 128  }
 0x70a   : > { %1703 = vsyncadd (!%p1382_p2), %s1081_s11, 4294967168  ;;  %p22_p3 = scmp.ge.s32.totalorder %s1943_s15, 4   ;;  %s2205_s21 = smov %s1710_s22 }
 0x70b   : > { %s2206_s22 = smov %s1714_s23  ;;  %s2207_s23 = smov %s1955_s14 }
 0x70c   : > { %s2208_s24 = smov %s1943_s15  ;;  %24 = sbr.rel (!%p22_p3) target bundleno = 8 (0x8), region = 109 }
 0x713   :  { %1086 = vsyncpa [#allocation4], 1 }
 0x714   :  { %1088 = vsyncpa [#allocation4 + $0x1], 1 }
 0x715   :  { %1089 = vsyncpa [#allocation7], 1 }
 0x716   :  { %1090 = vsyncpa [#allocation10], 1 }
 0x717   :  { %1091 = vsyncpa [#allocation13], 1 }
 0x718   :  { %1092 = vsyncpa [#allocation5], 1 }
 0x719   :  { %1094 = vsyncpa [#allocation5 + $0x1], 1 }

// kernel: combined_block_2a_forward.4
= control target key start
LH: loop header
LB: loop body
LE: loop exit
PB: predicated region body
PF: predicated region fallthrough
CT: control target
= control target key end

     0   :  { %s4073_s0 = inlined_call_operand.hbm [shape: f32[16,32], index: 0, kind: input, shape index: {}]   ;;  %s4074_s1 = inlined_call_operand.hbm [shape: f32[16,32], index: 1, kind: input, shape index: {}]   ;;  %s4075_s2 = inlined_call_operand.hbm [shape: f32[16,32], index: 2, kind: input, shape index: {}]   ;;  %s4076_s3 = inlined_call_operand.hbm [shape: f32[1,32], index: 3, kind: input, shape index: {}]   ;;  %s4077_s4 = inlined_call_operand.hbm [shape: bf16[32,32], index: 4, kind: input, shape index: {}]   ;;  %s4078_s5 = inlined_call_operand.hbm [shape: bf16[32,32], index: 5, kind: input, shape index: {}]   ;;  %s4079_s6 = inlined_call_operand.hbm [shape: bf16[32,32], index: 6, kind: input, shape index: {}]   ;;  %s4080_s7 = inlined_call_operand.hbm [shape: bf16[32,32], index: 7, kind: input, shape index: {}]   ;;  %s4081_s8 = inlined_call_operand.hbm [shape: f32[1,32], index: 8, kind: input, shape index: {}]   ;;  %s4082_s9 = inlined_call_operand.hbm [shape: bf16[32,32], index: 9, kind: input, shape index: {}]   ;;  %s4083_s10 = inlined_call_operand.hbm [shape: bf16[32,32], index: 10, kind: input, shape index: {}]   ;;  %s4084_s11 = inlined_call_operand.hbm [shape: bf16[32,32], index: 11, kind: input, shape index: {}]   ;;  %s4085_s12 = inlined_call_operand.hbm [shape: bf16[32,32], index: 12, kind: input, shape index: {}]   ;;  %s4086_s13 = inlined_call_operand.hbm [shape: f32[16,32], index: 13, kind: output, shape index: {}]  }
   0x1   :  { %4113 = sst [smem:[#allocation39_spill]] %s4073_s0 }
   0x2   :  { %4114 = sst [smem:[#allocation40_spill]] %s4074_s1 }
   0x3   :  { %4115 = sst [smem:[#allocation41_spill]] %s4075_s2 }
   0x4   :  { %4116 = sst [smem:[#allocation42_spill]] %s4076_s3 }
   0x5   :  { %4117 = sst [smem:[#allocation43_spill]] %s4077_s4 }
   0x6   :  { %4118 = sst [smem:[#allocation44_spill]] %s4078_s5 }
   0x7   :  { %4119 = sst [smem:[#allocation45_spill]] %s4080_s7 }
   0x8   :  { %4120 = sst [smem:[#allocation46_spill]] %s4082_s9 }
   0x9   :  { %4121 = sst [smem:[#allocation47_spill]] %s4084_s11 }
   0xa   :  { %4122 = sst [smem:[#allocation48_spill]] %s4086_s13 }
   0xb   :  { %18 = vsyncpa [#allocation4], 0 }
   0xc   :  { %20 = vsyncpa [#allocation4 + $0x1], 0 }
   0xd   :  { %21 = vsyncpa [#allocation7], 0 }
   0xe   :  { %23 = vsyncpa [#allocation7 + $0x1], 0 }
   0xf   :  { %24 = vsyncpa [#allocation10], 0 }
  0x10   :  { %25 = vsyncpa [#allocation13], 0 }
  0x11   :  { %26 = vsyncpa [#allocation16], 0 }
  0x12   :  { %27 = vsyncpa [#allocation19], 0 }
  0x13   :  { %28 = vsyncpa [#allocation22], 0 }
  0x14   :  { %29 = vsyncpa [#allocation5], 0 }
  0x15   :  { %31 = vsyncpa [#allocation5 + $0x1], 0  ;;  %s3393_s25 = smov 0   ;;  %s3395_s26 = smov 0  }
  0x16   :  { %s3397_s27 = smov 0   ;;  %s3399_s28 = smov 0  }
  0x17 LB: > { %4123 = sst [smem:[#allocation33_spill]] %s3285_s25  ;;  %s3299_s29 = smov [#allocation9]   ;;  %s3297_s28 = sphi %s3399_s28, %s4175_s28   ;;  %s3293_s27 = sphi %s3397_s27, %s4179_s27   ;;  %s3289_s26 = sphi %s3395_s26, %s4178_s26   ;;  %s3285_s25 = sphi %s3393_s25, %s4177_s25  }
  0x18   : > { %4124 = sst [smem:[#allocation34_spill]] %s3297_s28  ;;  %s369_s30 = sshll.u32 %s3299_s29, 4  ;;  %s3419_s30 = int_to_ptr.vmem [resolvable:$true] %s369_s30 }
  0x19   : > { %s3414_s14 = sadd.s32 4294967295, %s3297_s28   ;;  %p2323_p0 = scmp.ge.s32.totalorder %s3297_s28, 1 }
  0x1a   : > { %p4091_p1 = scmp.eq.s32.totalorder %s3414_s14, 0  ;;  %p356_p2 = scmp.lt.s32.totalorder %s3297_s28, 3 }
  0x1b   : > { %s3300_s16 = smov [#allocation12]   ;;  %s3301_s19 = smov [#allocation15]  }
  0x1c   : > { %p3421_p3 = pnand %p2323_p0, %p356_p2  ;;  %s392_s17 = sshll.u32 %s3300_s16, 4  ;;  %s3434_s17 = int_to_ptr.vmem [resolvable:$true] %s392_s17 }
  0x1d   : > { %s418_s20 = sshll.u32 %s3301_s19, 4  ;;  %s4128_s3 = sld [smem:[#allocation42_spill]]  ;;  %s3436_s20 = int_to_ptr.vmem [resolvable:$true] %s418_s20 }
  0x1e   : > { %s4125_s15 = scalar_select %p3421_p3, 1, 0 }
  0x1f   : > { %p2666_p5 = pneg %p3421_p3 }
  0x20   : > { %4126 = sst [smem:[#allocation35_spill]] %s4125_s15 }
  0x21   : > { %p3430_p6 = pnand %p2666_p5, %p4091_p1 }
  0x23   : > { %s4127_s18 = scalar_select %p3430_p6, 1, 0 }
  0x24   : > { %s2837_s23 = scalar_lea.hbm %s4128_s3, 16  ;;  %p3446_p8 = pneg %p3430_p6 }
  0x25   : > { %p2838_p7 = scmp.ne.s32.totalorder %s4128_s3, %s2837_s23  ;;  %p2844_p11 = scmp.lt.u32.totalorder %s2837_s23, %s4128_s3 }
  0x26   : > { %s4129_s16 = scalar_select %p3446_p8, 1, 0 }
  0x27   : > { %p2840_p9 = pnand %p3446_p8, %p2838_p7 }
  0x29   : > { %p2841_p10 = pneg %p2840_p9 }
  0x2b   : > { %p2846_p12 = pnand %p2844_p11, %p2841_p10 }
  0x2d   : > { %2849 = shalt.err (!%p2846_p12)
}
  0x2e   : > { %s2850_s21 = scalar_lea.vmem %s3419_s30, 16  ;;  %s2857_s22 = scalar_lea.vmem %s3419_s30, 32 }
  0x2f   : > { %p2851_p13 = scmp.ne.s32.totalorder %s3419_s30, %s2850_s21  ;;  %p2858_p5 = scmp.lt.s32.totalorder %s3419_s30, %s3419_s30 }
  0x30   : > { %p2859_p7 = scmp.lt.s32.totalorder %s2857_s22, %s2850_s21 }
  0x31   : > { %p2853_p0 = pnand %p2851_p13, %p3446_p8 }
  0x32   : > { %p2860_p9 = por %p2859_p7, %p2858_p5 }
  0x33   : > { %p2854_p2 = pneg %p2853_p0 }
  0x35   : > { %p2861_p4 = pnand %p2860_p9, %p2854_p2 }
  0x37   : > { %2864 = shalt.err (!%p2861_p4)
}
  0x38   : > { %2669 = dma.hbm_to_vmem [thread:$0]  (!%p3430_p6), %s4128_s3, 16, %s3419_s30, [#allocation10]  }
  0x39   : > { %s4130_s5 = sld [smem:[#allocation44_spill]] }
  0x3f   : > { %s2865_s19 = scalar_lea.hbm %s4130_s5, 256 }
  0x40   : > { %p2866_p10 = scmp.ne.s32.totalorder %s4130_s5, %s2865_s19  ;;  %p2872_p4 = scmp.lt.u32.totalorder %s2865_s19, %s4130_s5 }
  0x42   : > { %p2868_p11 = pnand %p2866_p10, %p3446_p8 }
  0x44   : > { %p2869_p12 = pneg %p2868_p11 }
  0x46   : > { %p2874_p13 = pnand %p2872_p4, %p2869_p12 }
  0x48   : > { %2877 = shalt.err (!%p2874_p13)
}
  0x49   : > { %s2878_s30 = scalar_lea.vmem %s3434_s17, 256  ;;  %p2886_p7 = scmp.lt.s32.totalorder %s3434_s17, %s3434_s17 }
  0x4a   : > { %p2879_p0 = scmp.ne.s32.totalorder %s3434_s17, %s2878_s30  ;;  %p2887_p9 = scmp.lt.s32.totalorder %s2878_s30, %s2878_s30 }
  0x4c   : > { %p2881_p2 = pnand %p2879_p0, %p3446_p8  ;;  %p2888_p10 = por %p2887_p9, %p2886_p7 }
  0x4e   : > { %p2882_p5 = pneg %p2881_p2 }
  0x50   : > { %p2889_p11 = pnand %p2888_p10, %p2882_p5 }
  0x52   : > { %2892 = shalt.err (!%p2889_p11)
}
  0x53   : > { %s4094_s2 = smov 64   ;;  %s4096_s15 = smov 4  }
  0x54   : > { %2675 = dma.hbm_to_vmem [thread:$0]  (!%p3430_p6), %s4130_s5, 256, %s3434_s17, [#allocation13], %s4094_s2, %s4094_s2, %s4096_s15  }
  0x55   : > { %s4131_s7 = sld [smem:[#allocation45_spill]] }
  0x5b   : > { %s2893_s19 = scalar_lea.hbm %s4131_s7, 256 }
  0x5c   : > { %p2894_p12 = scmp.ne.s32.totalorder %s4131_s7, %s2893_s19  ;;  %p2900_p0 = scmp.lt.u32.totalorder %s2893_s19, %s4131_s7 }
  0x5e   : > { %p2896_p4 = pnand %p2894_p12, %p3446_p8 }
  0x60   : > { %p2897_p13 = pneg %p2896_p4 }
  0x62   : > { %p2902_p2 = pnand %p2900_p0, %p2897_p13 }
  0x64   : > { %2905 = shalt.err (!%p2902_p2)
}
  0x65   : > { %s2906_s17 = scalar_lea.vmem %s3436_s20, 256  ;;  %p2914_p10 = scmp.lt.s32.totalorder %s3436_s20, %s3436_s20 }
  0x66   : > { %p2907_p5 = scmp.ne.s32.totalorder %s3436_s20, %s2906_s17  ;;  %p2915_p11 = scmp.lt.s32.totalorder %s2906_s17, %s2906_s17 }
  0x68   : > { %p2909_p7 = pnand %p2907_p5, %p3446_p8  ;;  %p2916_p12 = por %p2915_p11, %p2914_p10 }
  0x6a   : > { %p2910_p9 = pneg %p2909_p7 }
  0x6c   : > { %p2917_p4 = pnand %p2916_p12, %p2910_p9 }
  0x6e   : > { %2920 = shalt.err (!%p2917_p4)
}
  0x6f   : > { %2681 = dma.hbm_to_vmem [thread:$0]  (!%p3430_p6), %s4131_s7, 256, %s3436_s20, [#allocation16], %s4094_s2, %s4094_s2, %s4096_s15  }
  0x70   : > { %s3304_s23 = smov [#allocation18]   ;;  %s3305_s29 = smov [#allocation21]  }
  0x71   : > { %s442_s24 = sshll.u32 %s3304_s23, 4  ;;  %s468_s19 = sshll.u32 %s3305_s29, 4  ;;  %s443_s24 = int_to_ptr.vmem [resolvable:$true] %s442_s24  ;;  %s469_s19 = int_to_ptr.vmem [resolvable:$true] %s468_s19 }
  0x72   : > { %s4132_s9 = sld [smem:[#allocation46_spill]] }
  0x78   : > { %s2921_s30 = scalar_lea.hbm %s4132_s9, 256 }
  0x79   : > { %p2922_p13 = scmp.ne.s32.totalorder %s4132_s9, %s2921_s30  ;;  %p2928_p5 = scmp.lt.u32.totalorder %s2921_s30, %s4132_s9 }
  0x7b   : > { %p2924_p0 = pnand %p2922_p13, %p3446_p8 }
  0x7d   : > { %p2925_p2 = pneg %p2924_p0 }
  0x7f   : > { %p2930_p7 = pnand %p2928_p5, %p2925_p2 }
  0x81   : > { %2933 = shalt.err (!%p2930_p7)
}
  0x82   : > { %s2934_s20 = scalar_lea.vmem %s443_s24, 256  ;;  %p2942_p12 = scmp.lt.s32.totalorder %s443_s24, %s443_s24 }
  0x83   : > { %p2935_p9 = scmp.ne.s32.totalorder %s443_s24, %s2934_s20  ;;  %p2943_p4 = scmp.lt.s32.totalorder %s2934_s20, %s2934_s20 }
  0x85   : > { %p2937_p10 = pnand %p2935_p9, %p3446_p8  ;;  %p2944_p1 = por %p2943_p4, %p2942_p12 }
  0x87   : > { %p2938_p11 = pneg %p2937_p10 }
  0x89   : > { %p2945_p3 = pnand %p2944_p1, %p2938_p11 }
  0x8b   : > { %2948 = shalt.err (!%p2945_p3)
}
  0x8c   : > { %2687 = dma.hbm_to_vmem [thread:$0]  (!%p3430_p6), %s4132_s9, 256, %s443_s24, [#allocation19], %s4094_s2, %s4094_s2, %s4096_s15  }
  0x8d   : > { %s4133_s11 = sld [smem:[#allocation47_spill]] }
  0x93   : > { %s2949_s29 = scalar_lea.hbm %s4133_s11, 256 }
  0x94   : > { %p2950_p1 = scmp.ne.s32.totalorder %s4133_s11, %s2949_s29  ;;  %p2956_p0 = scmp.lt.u32.totalorder %s2949_s29, %s4133_s11 }
  0x96   : > { %p2952_p3 = pnand %p2950_p1, %p3446_p8 }
  0x98   : > { %p2953_p13 = pneg %p2952_p3 }
  0x9a   : > { %p2958_p2 = pnand %p2956_p0, %p2953_p13 }
  0x9c   : > { %2961 = shalt.err (!%p2958_p2)
}
  0x9d   : > { %s2962_s3 = scalar_lea.vmem %s469_s19, 256  ;;  %p2970_p10 = scmp.lt.s32.totalorder %s469_s19, %s469_s19 }
  0x9e   : > { %p2963_p5 = scmp.ne.s32.totalorder %s469_s19, %s2962_s3  ;;  %p2971_p11 = scmp.lt.s32.totalorder %s2962_s3, %s2962_s3 }
  0xa0   : > { %p2965_p7 = pnand %p2963_p5, %p3446_p8  ;;  %p2972_p12 = por %p2971_p11, %p2970_p10 }
  0xa2   : > { %p2966_p9 = pneg %p2965_p7 }
  0xa4   : > { %p2973_p4 = pnand %p2972_p12, %p2966_p9 }
  0xa6   : > { %2976 = shalt.err (!%p2973_p4)
}
  0xa7   : > { %2693 = dma.hbm_to_vmem [thread:$0]  (!%p3430_p6), %s4133_s11, 256, %s469_s19, [#allocation22], %s4094_s2, %s4094_s2, %s4096_s15  }
  0xa8   : > { %s2322_s0 = sadd.s32 4294967294, %s3297_s28   ;;  %s3564_s5 = sadd.s32 1, %s3297_s28  }
  0xa9   : > { %4134 = sst [smem:[#allocation36_spill]] %s3564_s5  ;;  %s44_s13 = sadd.s32 1, %s3293_s27 }
  0xaa   : > { %s41_s23 = ssub.s32 %s3297_s28, %s3564_s5  ;;  %p51_p1 = scmp.ne.s32.totalorder %s3293_s27, %s3289_s26 }
  0xab   : > { %p42_p3 = scmp.eq.s32.totalorder %s41_s23, 0  ;;  %p52_p13 = scmp.eq.s32.totalorder %s3297_s28, 0 }
  0xac   : > { %p57_p0 = scmp.ne.s32.totalorder %s3289_s26, %s3285_s25  ;;  %p343_p2 = scmp.eq.s32.totalorder %s3414_s14, 1 }
  0xad   : > { %s3576_s29 = scalar_select %p42_p3, %s3293_s27, %s44_s13  }
  0xae   : > { %p53_p5 = por %p52_p13, %p51_p1  ;;  %p4136_p7 = scmp.eq.s32.totalorder %s3414_s14, 0 }
  0xaf   : > { %4135 = sst [smem:[#allocation37_spill]] %s3576_s29  ;;  %p3584_p10 = por %p343_p2, %p51_p1 }
  0xb0   : > { %p3580_p9 = por %p4136_p7, %p57_p0  ;;  %p349_p11 = scmp.eq.s32.totalorder %s2322_s0, 1 }
  0xb1   : > { %s4138_s21 = scalar_select %p3584_p10, 1, 0 }
  0xb2   : > { %s4137_s19 = scalar_select %p3580_p9, 1, 0 }
  0xb3   : > { %p2721_p12 = scmp.lt.s32.totalorder %s3297_s28, 2  ;;  %s4093_s22 = sand.u32 1, %s3293_s27  }
  0xb4   : > { %p3590_p4 = por %p349_p11, %p57_p0  ;;  %s3596_s17 = sshll.u32 %s4093_s22, 3 }
  0xb5   : > { %s3599_s3 = sshll.u32 %s3297_s28, 7  ;;  %p3601_p3 = pnand %p2721_p12, %p53_p5 }
  0xb6   : > { %s4139_s30 = scalar_select %p3590_p4, 1, 0 }
  0xb7   : > { %s4141_s24 = scalar_select %p3601_p3, 1, 0 }
  0xb8   : > { %4140 = sst [smem:[#allocation38_spill]] %s4139_s30  ;;  %s513_s20 = sand.u32 1, %s3297_s28  }
  0xb9   : > { %s4142_s1 = sld [smem:[#allocation40_spill]]  ;;  %s517_s22 = scalar_lea.vmem [#allocation6], %s3596_s17 }
  0xba   : > { %s524_s2 = sshll.u32 %s517_s22, 4  ;;  %s3615_s15 = scalar_lea.sflag [#allocation7], %s513_s20  ;;  %s3613_s2 = int_to_ptr.vmem [resolvable:$true] %s524_s2 }
  0xbb   : > { %p3621_p13 = pneg %p3601_p3 }
  0xbd   : > { %s4143_s9 = scalar_select %p3621_p13, 1, 0 }
  0xbf   : > { %s3610_s23 = scalar_lea.hbm %s4142_s1, %s3599_s3  ;;  %s2982_s11 = scalar_lea.hbm %s4142_s1, 256 }
  0xc0   : > { %s2977_s7 = scalar_lea.hbm %s3610_s23, 128  ;;  %p2983_p5 = scmp.lt.u32.totalorder %s3610_s23, %s4142_s1 }
  0xc1   : > { %p2978_p1 = scmp.ne.s32.totalorder %s3610_s23, %s2977_s7  ;;  %p2984_p7 = scmp.lt.u32.totalorder %s2982_s11, %s2977_s7 }
  0xc2   : > { %p2986_p12 = scmp.lt.u32.totalorder %s2977_s7, %s3610_s23 }
  0xc3   : > { %p2980_p0 = pnand %p3621_p13, %p2978_p1  ;;  %p2985_p11 = por %p2984_p7, %p2983_p5 }
  0xc5   : > { %p2981_p2 = pneg %p2980_p0  ;;  %p2987_p4 = por %p2986_p12, %p2985_p11 }
  0xc7   : > { %p2988_p10 = pnand %p2987_p4, %p2981_p2 }
  0xc9   : > { %2991 = shalt.err (!%p2988_p10)
}
  0xca   : > { %s2992_s20 = scalar_lea.vmem %s3613_s2, 128  ;;  %s3306_s0 = smov [#allocation6]  }
  0xcb   : > { %p2993_p1 = scmp.ne.s32.totalorder %s3613_s2, %s2992_s20  ;;  %s2997_s13 = sshll.u32 %s3306_s0, 4  ;;  %s2998_s13 = int_to_ptr.vmem [resolvable:$false] %s2997_s13 }
  0xcc   : > { %s2999_s29 = scalar_lea.vmem %s2998_s13, 256  ;;  %p3000_p6 = scmp.lt.s32.totalorder %s3613_s2, %s2998_s13 }
  0xcd   : > { %p2995_p0 = pnand %p2993_p1, %p3621_p13  ;;  %p3001_p8 = scmp.lt.s32.totalorder %s2999_s29, %s2992_s20 }
  0xcf   : > { %p2996_p9 = pneg %p2995_p0  ;;  %p3002_p5 = por %p3001_p8, %p3000_p6 }
  0xd1   : > { %p3003_p7 = pnand %p3002_p5, %p2996_p9 }
  0xd3   : > { %3006 = shalt.err (!%p3003_p7)
}
  0xd4   : > { %2703 = dma.hbm_to_vmem [thread:$0]  (!%p3601_p3), %s3610_s23, 128, %s3613_s2, %s3615_s15  }
  0xd5   : > { %s3307_s7 = smov [#allocation11]   ;;  %s3308_s22 = smov [#allocation14]  }
  0xd6   : > { %s379_s11 = sshll.u32 %s3307_s7, 4  ;;  %s405_s1 = sshll.u32 %s3308_s22, 4  ;;  %s380_s11 = int_to_ptr.vmem [resolvable:$true] %s379_s11  ;;  %s406_s1 = int_to_ptr.vmem [resolvable:$true] %s405_s1 }
  0xd7   : > { %s4144_s4 = sld [smem:[#allocation43_spill]]  ;;  %p4145_p8 = scmp.ne.s32.totalorder %s4129_s16, 0 }
  0xdd   : > { %s3007_s13 = scalar_lea.hbm %s4144_s4, 256 }
  0xde   : > { %p3008_p6 = scmp.ne.s32.totalorder %s4144_s4, %s3007_s13  ;;  %p3014_p4 = scmp.lt.u32.totalorder %s3007_s13, %s4144_s4 }
  0xe0   : > { %p3010_p9 = pnand %p3008_p6, %p4145_p8 }
  0xe2   : > { %p3011_p10 = pneg %p3010_p9 }
  0xe4   : > { %p3016_p2 = pnand %p3014_p4, %p3011_p10 }
  0xe6   : > { %3019 = shalt.err (!%p3016_p2)
}
  0xe7   : > { %s3020_s2 = scalar_lea.vmem %s380_s11, 256  ;;  %p3028_p0 = scmp.lt.s32.totalorder %s380_s11, %s380_s11 }
  0xe8   : > { %p3021_p11 = scmp.ne.s32.totalorder %s380_s11, %s3020_s2  ;;  %p3029_p5 = scmp.lt.s32.totalorder %s3020_s2, %s3020_s2 }
  0xea   : > { %p3023_p12 = pnand %p3021_p11, %p4145_p8  ;;  %p3030_p7 = por %p3029_p5, %p3028_p0 }
  0xec   : > { %p3024_p1 = pneg %p3023_p12 }
  0xee   : > { %p3031_p3 = pnand %p3030_p7, %p3024_p1 }
  0xf0   : > { %3034 = shalt.err (!%p3031_p3)
}
  0xf1   : > { %p4146_p6 = scmp.ne.s32.totalorder %s4127_s18, 0  ;;  %s4147_s5 = smov 4  }
  0xf2   : > { %s4148_s23 = smov 64   ;;  %s3035_s0 = scalar_lea.hbm %s4079_s6, 256 }
  0xf3   : > { %2672 = dma.hbm_to_vmem [thread:$0]  (!%p4146_p6), %s4144_s4, 256, %s380_s11, [#allocation10], %s4148_s23, %s4148_s23, %s4147_s5  }
  0xf4   : > { %p3036_p9 = scmp.ne.s32.totalorder %s4079_s6, %s3035_s0  ;;  %p3042_p4 = scmp.lt.u32.totalorder %s3035_s0, %s4079_s6 }
  0xf6   : > { %p3038_p3 = pnand %p3036_p9, %p4145_p8 }
  0xf8   : > { %p3039_p10 = pneg %p3038_p3 }
  0xfa   : > { %p3044_p2 = pnand %p3042_p4, %p3039_p10 }
  0xfc   : > { %3047 = shalt.err (!%p3044_p2)
}
  0xfd   : > { %s3048_s28 = scalar_lea.vmem %s406_s1, 256  ;;  %p3056_p0 = scmp.lt.s32.totalorder %s406_s1, %s406_s1 }
  0xfe   : > { %p3049_p11 = scmp.ne.s32.totalorder %s406_s1, %s3048_s28  ;;  %p3057_p5 = scmp.lt.s32.totalorder %s3048_s28, %s3048_s28 }
 0x100   : > { %p3051_p12 = pnand %p3049_p11, %p4145_p8  ;;  %p3058_p7 = por %p3057_p5, %p3056_p0 }
 0x102   : > { %p3052_p1 = pneg %p3051_p12 }
 0x104   : > { %p3059_p13 = pnand %p3058_p7, %p3052_p1 }
 0x106   : > { %3062 = shalt.err (!%p3059_p13)
}
 0x107   : > { %2678 = dma.hbm_to_vmem [thread:$0]  (!%p4146_p6), %s4079_s6, 256, %s406_s1, [#allocation13], %s4148_s23, %s4148_s23, %s4147_s5  }
 0x108   : > { %s3309_s7 = smov [#allocation17]   ;;  %s3310_s0 = smov [#allocation20]  }
 0x109   : > { %s432_s22 = sshll.u32 %s3309_s7, 4  ;;  %s455_s13 = sshll.u32 %s3310_s0, 4  ;;  %s433_s22 = int_to_ptr.vmem [resolvable:$true] %s432_s22  ;;  %s456_s13 = int_to_ptr.vmem [resolvable:$true] %s455_s13 }
 0x10a   : > { %s3063_s2 = scalar_lea.hbm %s4081_s8, 16 }
 0x10b   : > { %p3064_p13 = scmp.ne.s32.totalorder %s4081_s8, %s3063_s2  ;;  %p3070_p10 = scmp.lt.u32.totalorder %s3063_s2, %s4081_s8 }
 0x10d   : > { %p3066_p9 = pnand %p3064_p13, %p4145_p8 }
 0x10f   : > { %p3067_p3 = pneg %p3066_p9 }
 0x111   : > { %p3072_p4 = pnand %p3070_p10, %p3067_p3 }
 0x113   : > { %3075 = shalt.err (!%p3072_p4)
}
 0x114   : > { %s3076_s1 = scalar_lea.vmem %s433_s22, 16  ;;  %s3083_s30 = scalar_lea.vmem %s433_s22, 32 }
 0x115   : > { %p3077_p2 = scmp.ne.s32.totalorder %s433_s22, %s3076_s1  ;;  %p3084_p1 = scmp.lt.s32.totalorder %s433_s22, %s433_s22 }
 0x116   : > { %p3085_p0 = scmp.lt.s32.totalorder %s3083_s30, %s3076_s1 }
 0x117   : > { %p3079_p11 = pnand %p3077_p2, %p4145_p8 }
 0x118   : > { %p3086_p5 = por %p3085_p0, %p3084_p1 }
 0x119   : > { %p3080_p12 = pneg %p3079_p11 }
 0x11b   : > { %p3087_p7 = pnand %p3086_p5, %p3080_p12 }
 0x11d   : > { %3090 = shalt.err (!%p3087_p7)
}
 0x11e   : > { %2684 = dma.hbm_to_vmem [thread:$0]  (!%p4146_p6), %s4081_s8, 16, %s433_s22, [#allocation16]  }
 0x11f   : > { %s3091_s20 = scalar_lea.hbm %s4083_s10, 256 }
 0x120   : > { %p3092_p13 = scmp.ne.s32.totalorder %s4083_s10, %s3091_s20  ;;  %p3098_p10 = scmp.lt.u32.totalorder %s3091_s20, %s4083_s10 }
 0x122   : > { %p3094_p9 = pnand %p3092_p13, %p4145_p8 }
 0x124   : > { %p3095_p3 = pneg %p3094_p9 }
 0x126   : > { %p3100_p4 = pnand %p3098_p10, %p3095_p3 }
 0x128   : > { %3103 = shalt.err (!%p3100_p4)
}
 0x129   : > { %s3104_s1 = scalar_lea.vmem %s456_s13, 256  ;;  %p3112_p1 = scmp.lt.s32.totalorder %s456_s13, %s456_s13 }
 0x12a   : > { %p3105_p2 = scmp.ne.s32.totalorder %s456_s13, %s3104_s1  ;;  %p3113_p0 = scmp.lt.s32.totalorder %s3104_s1, %s3104_s1 }
 0x12c   : > { %p3107_p11 = pnand %p3105_p2, %p4145_p8  ;;  %p3114_p5 = por %p3113_p0, %p3112_p1 }
 0x12e   : > { %p3108_p12 = pneg %p3107_p11 }
 0x130   : > { %p3115_p7 = pnand %p3114_p5, %p3108_p12 }
 0x132   : > { %3118 = shalt.err (!%p3115_p7)
}
 0x133   : > { %2690 = dma.hbm_to_vmem [thread:$0]  (!%p4146_p6), %s4083_s10, 256, %s456_s13, [#allocation19], %s4148_s23, %s4148_s23, %s4147_s5  }
 0x134   : > { %s3311_s4 = smov [#allocation23]   ;;  %s3119_s20 = scalar_lea.hbm %s4085_s12, 256 }
 0x135   : > { %s481_s7 = sshll.u32 %s3311_s4, 4  ;;  %p3120_p13 = scmp.ne.s32.totalorder %s4085_s12, %s3119_s20  ;;  %s482_s7 = int_to_ptr.vmem [resolvable:$true] %s481_s7 }
 0x136   : > { %p3126_p10 = scmp.lt.u32.totalorder %s3119_s20, %s4085_s12 }
 0x137   : > { %p3122_p9 = pnand %p3120_p13, %p4145_p8 }
 0x139   : > { %p3123_p3 = pneg %p3122_p9 }
 0x13b   : > { %p3128_p4 = pnand %p3126_p10, %p3123_p3 }
 0x13d   : > { %3131 = shalt.err (!%p3128_p4)
}
 0x13e   : > { %s3132_s13 = scalar_lea.vmem %s482_s7, 256  ;;  %p3140_p1 = scmp.lt.s32.totalorder %s482_s7, %s482_s7 }
 0x13f   : > { %p3133_p2 = scmp.ne.s32.totalorder %s482_s7, %s3132_s13  ;;  %p3141_p0 = scmp.lt.s32.totalorder %s3132_s13, %s3132_s13 }
 0x141   : > { %p3135_p11 = pnand %p3133_p2, %p4145_p8  ;;  %p3142_p5 = por %p3141_p0, %p3140_p1 }
 0x143   : > { %p3136_p12 = pneg %p3135_p11 }
 0x145   : > { %p3143_p7 = pnand %p3142_p5, %p3136_p12 }
 0x147   : > { %3146 = shalt.err (!%p3143_p7)
}
 0x148   : > { %2696 = dma.hbm_to_vmem [thread:$0]  (!%p4146_p6), %s4085_s12, 256, %s482_s7, [#allocation22], %s4148_s23, %s4148_s23, %s4147_s5  }
 0x149   : > { %s4149_s4 = sld [smem:[#allocation39_spill]]  ;;  %s499_s18 = scalar_lea.vmem [#allocation3], %s3596_s17 }
 0x14a   : > { %s506_s0 = sshll.u32 %s499_s18, 4  ;;  %s4150_s20 = sand.u32 1, %s3293_s27   ;;  %s507_s0 = int_to_ptr.vmem [resolvable:$true] %s506_s0 }
 0x14b   : > { %s496_s29 = scalar_lea.sflag [#allocation4], %s4150_s20  ;;  %p4151_p13 = scmp.ne.s32.totalorder %s4143_s9, 0 }
 0x14f   : > { %s3751_s25 = scalar_lea.hbm %s4149_s4, %s3599_s3  ;;  %s3152_s7 = scalar_lea.hbm %s4149_s4, 256 }
 0x150   : > { %s3147_s2 = scalar_lea.hbm %s3751_s25, 128  ;;  %p3153_p6 = scmp.lt.u32.totalorder %s3751_s25, %s4149_s4 }
 0x151   : > { %p3148_p8 = scmp.ne.s32.totalorder %s3751_s25, %s3147_s2  ;;  %p3154_p10 = scmp.lt.u32.totalorder %s3152_s7, %s3147_s2 }
 0x152   : > { %p3156_p2 = scmp.lt.u32.totalorder %s3147_s2, %s3751_s25 }
 0x153   : > { %p3150_p9 = pnand %p3148_p8, %p4151_p13  ;;  %p3155_p4 = por %p3154_p10, %p3153_p6 }
 0x155   : > { %p3151_p3 = pneg %p3150_p9  ;;  %p3157_p11 = por %p3156_p2, %p3155_p4 }
 0x157   : > { %p3158_p12 = pnand %p3157_p11, %p3151_p3 }
 0x159   : > { %3161 = shalt.err (!%p3158_p12)
}
 0x15a   : > { %s3162_s13 = scalar_lea.vmem %s507_s0, 128  ;;  %s3312_s1 = smov [#allocation3]  }
 0x15b   : > { %p3163_p1 = scmp.ne.s32.totalorder %s507_s0, %s3162_s13  ;;  %s3167_s22 = sshll.u32 %s3312_s1, 4  ;;  %s3168_s22 = int_to_ptr.vmem [resolvable:$false] %s3167_s22 }
 0x15c   : > { %s3169_s16 = scalar_lea.vmem %s3168_s22, 256  ;;  %p3170_p7 = scmp.lt.s32.totalorder %s507_s0, %s3168_s22 }
 0x15d   : > { %p3165_p0 = pnand %p3163_p1, %p4151_p13  ;;  %p3171_p8 = scmp.lt.s32.totalorder %s3169_s16, %s3162_s13 }
 0x15f   : > { %p3166_p5 = pneg %p3165_p0  ;;  %p3172_p9 = por %p3171_p8, %p3170_p7 }
 0x161   : > { %p3173_p6 = pnand %p3172_p9, %p3166_p5 }
 0x163   : > { %3176 = shalt.err (!%p3173_p6)
}
 0x164   : > { %p4152_p10 = scmp.ne.s32.totalorder %s4141_s24, 0  ;;  %s4153_s20 = sld [smem:[#allocation41_spill]] }
 0x165   : > { %s535_s5 = scalar_lea.vmem [#allocation8], %s3596_s17 }
 0x166   : > { %2700 = dma.hbm_to_vmem [thread:$0]  (!%p4152_p10), %s3751_s25, 128, %s507_s0, %s496_s29  }
 0x167   : > { %s542_s23 = sshll.u32 %s535_s5, 4  ;;  %s543_s23 = int_to_ptr.vmem [resolvable:$true] %s542_s23 }
 0x16a   : > { %s3777_s2 = scalar_lea.hbm %s4153_s20, %s3599_s3  ;;  %s3182_s25 = scalar_lea.hbm %s4153_s20, 256 }
 0x16b   : > { %s3177_s7 = scalar_lea.hbm %s3777_s2, 128  ;;  %p3183_p11 = scmp.lt.u32.totalorder %s3777_s2, %s4153_s20 }
 0x16c   : > { %p3178_p3 = scmp.ne.s32.totalorder %s3777_s2, %s3177_s7  ;;  %p3184_p12 = scmp.lt.u32.totalorder %s3182_s25, %s3177_s7 }
 0x16d   : > { %p3186_p0 = scmp.lt.u32.totalorder %s3177_s7, %s3777_s2 }
 0x16e   : > { %p3180_p4 = pnand %p3178_p3, %p4151_p13  ;;  %p3185_p1 = por %p3184_p12, %p3183_p11 }
 0x170   : > { %p3181_p2 = pneg %p3180_p4  ;;  %p3187_p5 = por %p3186_p0, %p3185_p1 }
 0x172   : > { %p3188_p7 = pnand %p3187_p5, %p3181_p2 }
 0x174   : > { %3191 = shalt.err (!%p3188_p7)
}
 0x175   : > { %s3192_s17 = scalar_lea.vmem %s543_s23, 128  ;;  %s3313_s3 = smov [#allocation8]  }
 0x176   : > { %p3193_p8 = scmp.ne.s32.totalorder %s543_s23, %s3192_s17  ;;  %s3197_s13 = sshll.u32 %s3313_s3, 4  ;;  %s3198_s13 = int_to_ptr.vmem [resolvable:$false] %s3197_s13 }
 0x177   : > { %s3199_s1 = scalar_lea.vmem %s3198_s13, 256  ;;  %p3200_p3 = scmp.lt.s32.totalorder %s543_s23, %s3198_s13 }
 0x178   : > { %p3195_p9 = pnand %p3193_p8, %p4151_p13  ;;  %p3201_p4 = scmp.lt.s32.totalorder %s3199_s1, %s3192_s17 }
 0x17a   : > { %p3196_p6 = pneg %p3195_p9  ;;  %p3202_p10 = por %p3201_p4, %p3200_p3 }
 0x17c   : > { %p3203_p11 = pnand %p3202_p10, %p3196_p6 }
 0x17e   : > { %3206 = shalt.err (!%p3203_p11)
}
 0x17f   : > { %p4154_p12 = scmp.ne.s32.totalorder %s4141_s24, 0  ;;  %s4155_s22 = sld [smem:[#allocation35_spill]] }
 0x181   : > { %2706 = dma.hbm_to_vmem [thread:$0]  (!%p4154_p12), %s3777_s2, 128, %s543_s23, %s3615_s15  }
 0x185   : > { %p4156_p2 = scmp.ne.s32.totalorder %s4155_s22, 0 }
 0x186   : > { %s3801_s9 = sand.u32 (!%p4156_p2), 1, %s3289_s26   ;;  %p4157_p13 = scmp.ne.s32.totalorder (!%p4156_p2), %s4137_s19, 0 }
 0x187   : > { %551 = sbr.rel (%p4156_p2) target bundleno = 3623 (0xe27), region = 72  ;;  %s3804_s16 = sshll.u32 (!%p4156_p2), %s3801_s9, 3 }
 0x188   : > { %s554_s30 = scalar_lea.sflag (!%p4156_p2), [#allocation4], %s3801_s9  ;;  %s557_s18 = scalar_lea.vmem (!%p4156_p2), [#allocation3], %s3804_s16 }
 0x18e   : > { %3252 = dma.done.wait (%p4157_p13), %s554_s30, 128  }
 0x18f   : > { %3254 = vsyncadd (%p4157_p13), %s554_s30, 4294967168  ;;  %s562_s15 = sand.u32 1, %s3414_s14   ;;  %s566_s2 = scalar_lea.vmem [#allocation6], %s3804_s16 }
 0x190   : > { %s563_s24 = scalar_lea.sflag [#allocation7], %s562_s15 }
 0x191   : > { %3256 = dma.done.wait (%p4157_p13), %s563_s24, 256  }
 0x192   : > { %3258 = vsyncadd (%p4157_p13), %s563_s24, 4294967040  ;;  %s575_s5 = scalar_lea.vmem [#allocation8], %s3804_s16  ;;  %p4158_p10 = scmp.eq.s32.totalorder %s3414_s14, 0 }
 0x194   : > { %3260 = dma.done.wait (%p4158_p10), [#allocation10], 272   ;;  %p4159_p1 = pmov %p4158_p10 }
 0x196   : > { %3262 = vsyncadd (%p4159_p1), [#allocation10], 4294967024  ;;  %p4160_p0 = pmov %p4159_p1 }
 0x198   : > { %3264 = dma.done.wait (%p4160_p0), [#allocation13], 512   ;;  %p4161_p5 = pmov %p4160_p0 }
 0x199   : > { %p4162_p7 = pmov %p4160_p0 }
 0x19a   : > { %3266 = vsyncadd (%p4161_p5), [#allocation13], 4294966784 }
 0x19b   : > { %3268 = dma.done.wait (%p4162_p7), [#allocation16], 272   ;;  %p4163_p8 = pmov %p4160_p0 }
 0x19c   : > { %p4164_p9 = pmov %p4160_p0 }
 0x19d   : > { %3270 = vsyncadd (%p4163_p8), [#allocation16], 4294967024 }
 0x19e   : > { %3272 = dma.done.wait (%p4164_p9), [#allocation19], 512   ;;  %p4165_p6 = pmov %p4160_p0 }
 0x19f   : > { %p4166_p3 = pmov %p4160_p0 }
 0x1a0   : > { %3274 = vsyncadd (%p4165_p6), [#allocation19], 4294966784 }
 0x1a1   : > { %3276 = dma.done.wait (%p4166_p3), [#allocation22], 512   ;;  %p4167_p4 = pmov %p4160_p0 }
 0x1a2   : > { %v3839_v0 = vld [vmem:[%s557_s18] sm:$0xff]  ;;  %vm676_vm0 = vcmask 261120   ;;  %v3314_v4 = vmov 0.0   ;;  %v670_v6 = vld [vmem:[%s566_s2] sm:$0xff]  ;;  %vm3315_vm1 = vmmov 0   ;;  %vm870_vm2 = vcmask 64512  }
 0x1a3   : > { %3278 = vsyncadd (%p4167_p4), [#allocation22], 4294966784  ;;  %v675_v1 = vmul.f32 %v3839_v0, %v3839_v0  ;;  %v2785_v3 = vld [vmem:[#allocation12] sm:$0xff]   ;;  %2466 = vmatprep.subr.bf16.mxu1 %v3314_v4  ;;  %2458 = vmatprep.subr.bf16.mxu0 %v3314_v4  ;;  %v2786_v5 = vld [vmem:[#allocation12 + $0x8] sm:$0xff]   ;;  %v671_v8 = vpack.c.bf16 %v670_v6, %v670_v6  ;;  %s3316_s19 = smov 120   ;;  %s3317_s23 = smov 112  }
 0x1a4   : > { %2467 = vmatpush3.bf16.msra.mxu1 %v2785_v3  ;;  %v2787_v7 = vld [vmem:[#allocation11] sm:$0xff]   ;;  %2470 = vmatprep.mubr.msk.bf16.mxu1 %vm3315_vm1, %v3314_v4  ;;  %v2788_v9 = vld [vmem:[#allocation11 + $0x8] sm:$0xff]   ;;  %v2356_v14 = vld [vmem:[#allocation9] ss:$0 sm:$0xff]  ;;  %s3318_s7 = smov 104   ;;  %vm932_vm3 = vcmask 1043456  }
 0x1a5   : > { %v677_v2 = vsel %vm676_vm0, %v675_v1, 0.0  ;;  %2468 = vmatprep.subr.bf16.mxu1 %v3314_v4  ;;  %2462 = vmatprep.mubr.msk.bf16.mxu0 %vm3315_vm1, %v3314_v4  ;;  %v2789_v31 = vld [vmem:[#allocation14] sm:$0xff]   ;;  %v2790_v32 = vld [vmem:[#allocation14 + $0x8] sm:$0xff]   ;;  %s3319_s28 = smov 8   ;;  %s3320_s11 = smov 16   ;;  %vm1094_vm4 = vcmask 130112  }
 0x1a6   : > { %678 = vadd.xlane.f32.xlu0 %v677_v2  ;;  %2459 = vmatpush3.bf16.msra.mxu0 %v2787_v7  ;;  %s3321_s25 = smov 24   ;;  %vm1210_vm5 = vcmask 195712   ;;  %vm1326_vm6 = vcmask 261312   ;;  %s2399_s0 = sshll.u32 %s3414_s14, 7 }
 0x1a7   : > { %2460 = vmatprep.subr.bf16.mxu0 %v3314_v4  ;;  %s667_s29 = scalar_lea.vmem [#allocation24], %s3804_s16  ;;  %s4168_s1 = sld [smem:[#allocation48_spill]] }
 0x1a8   : > { %2469 = vmatpush3.bf16.msra.mxu1 %v2786_v5  ;;  %s2114_s17 = sshll.u32 %s667_s29, 4  ;;  %s2101_s14 = scalar_lea.sflag [#allocation5], %s3801_s9  ;;  %s4030_s17 = int_to_ptr.vmem [resolvable:$true] %s2114_s17 }
 0x1a9   : > { %2482 = vmatprep.subr.bf16.mxu1 %v3314_v4  ;;  %s3207_s16 = scalar_lea.vmem %s4030_s17, 128  ;;  %p4169_p12 = scmp.ne.s32.totalorder %s4138_s21, 0 }
 0x1aa   : > { %2461 = vmatpush3.bf16.msra.mxu0 %v2788_v9  ;;  %p3208_p11 = scmp.ne.s32.totalorder %s4030_s17, %s3207_s16  ;;  %s3322_s30 = smov [#allocation24]  }
 0x1ab   : > { %2471 = vmatmul.mubr.msk.bf16.vlgmr.msra.gmra.mrb[0].mxu1 %vm676_vm0, %v671_v8  ;;  %2474 = vmatprep.subr.bf16.mxu0 %v3314_v4  ;;  %s3211_s18 = sshll.u32 %s3322_s30, 4  ;;  %s3212_s18 = int_to_ptr.vmem [resolvable:$false] %s3211_s18 }
 0x1ac   : > { %2484 = vmatprep.mubr.msk.bf16.mxu1 %vm3315_vm1, %v3314_v4  ;;  %p3209_p2 = pnand %p3208_p11, %p4169_p12  ;;  %s3213_s15 = scalar_lea.vmem %s3212_s18, 256 }
 0x1ad   : > { %s4028_s22 = scalar_lea.hbm %s4168_s1, %s2399_s0  ;;  %p3214_p10 = scmp.lt.s32.totalorder %s4030_s17, %s3212_s18 }
 0x1ae   : > { %p3210_p13 = pneg %p3209_p2  ;;  %p3215_p1 = scmp.lt.s32.totalorder %s3213_s15, %s3207_s16 }
 0x1b0   : > { %p3216_p0 = por %p3215_p1, %p3214_p10 }
 0x1b2   : > { %p3217_p5 = pnand %p3216_p0, %p3210_p13 }
 0x233   : > { %v679_v10 = vpop.xlane.xlu0 %678 }
 0x234   : > { %v681_v11 = vmul.f32 0.03125, %v679_v10 }
 0x236   : > { %v682_v12 = vadd.f32 1e-06, %v681_v11 }
 0x238   : > { %2801 = vrsqrt.f32 %v682_v12 }
 0x242   : > { %v2802_v13 = vpop.eup %2801 }
 0x243   : > { %v684_v15 = vmul.f32 %v2802_v13, %v3839_v0 }
 0x245   : > { %v691_v16 = vmul.f32 %v2356_v14, %v684_v15 }
 0x247   : > { %v692_v17 = vpack.c.bf16 %v691_v16, %v691_v16 }
 0x249   : > { %2463 = vmatmul.mubr.msk.bf16.vlgmr.msra.gmra.mrb[0].mxu0 %vm676_vm0, %v692_v17 }
 0x24a   : > { %2478 = vmatprep.mubr.msk.bf16.mxu0 %vm3315_vm1, %v3314_v4  ;;  %2475 = vmatpush3.bf16.msra.mxu0 %v2789_v31 }
 0x24b   : > { %2476 = vmatprep.subr.bf16.mxu0 %v3314_v4 }
 0x24e   : > { %2477 = vmatpush3.bf16.msra.mxu0 %v2790_v32 }
 0x24f   : > { %2488 = vmatprep.subr.bf16.mxu0 %v3314_v4 }
 0x251   : > { %2479 = vmatmul.mubr.msk.bf16.vlgmr.msra.gmra.mrb[4].mxu0 %vm676_vm0, %v671_v8 }
 0x252   : > { %2490 = vmatprep.mubr.msk.bf16.mxu0 %vm3315_vm1, %v3314_v4 }
 0x27e   : > { %v805_v18 = vpop.f32.mrb[0].mxu1 }
 0x27f   : > { %v868_v19 = vpack.c.bf16 %v805_v18, %v805_v18  ;;  %v2472_v20 = vpop.f32.mrb[1].mxu1 }
 0x280   : > { %v808_v21 = vpop.f32.mrb[2].mxu1 }
 0x281   : > { %v2473_v22 = vpop.f32.mrb[3].mxu1  ;;  %981 = vrot.lane.b32.xlu0 %v868_v19, %s3316_s19  ;;  %1098 = vrot.lane.b32.xlu1 %v868_v19, %s3317_s23  ;;  %v875_v23 = vsel %vm870_vm2, %v868_v19, 0 }
 0x282   : > { %2483 = vmatpush3.bf16.xpose.msra.mxu1 %v875_v23 }
 0x283   : > { %2494 = vmatprep.subr.bf16.mxu1 %v3314_v4 }
 0x2f3   : > { %v982_v24 = vpop.permute.xlu0 %981  ;;  %v1099_v33 = vpop.permute.xlu1 %1098 }
 0x2f4   : > { %v987_v28 = vsel %vm870_vm2, %v982_v24, 0  ;;  %v1104_v35 = vsel %vm870_vm2, %v1099_v33, 0 }
 0x31c   : > { %v746_v25 = vpop.f32.mrb[0].mxu0 }
 0x31d   : > { %v867_v26 = vpack.c.bf16 %v746_v25, %v746_v25  ;;  %v2464_v27 = vpop.f32.mrb[1].mxu0 }
 0x31e   : > { %v749_v29 = vpop.f32.mrb[2].mxu0 }
 0x31f   : > { %978 = vrot.lane.b32.xlu1 %v867_v26, %s3316_s19  ;;  %v2465_v30 = vpop.f32.mrb[3].mxu0  ;;  %2485 = vmatmul.mubr.msk.bf16.vlgmr.msra.gmra.mrb[4].mxu1 %vm870_vm2, %v867_v26 }
 0x320   : > { %2495 = vmatpush3.bf16.xpose.msra.mxu1 %v987_v28  ;;  %2496 = vmatprep.mubr.msk.bf16.mxu1 %vm3315_vm1, %v3314_v4 }
 0x321   : > { %2506 = vmatprep.subr.bf16.mxu1 %v3314_v4 }
 0x323   : > { %1096 = vrot.lane.b32.xlu1 %v867_v26, %s3317_s23 }
 0x324   : > { %v861_v45 = vpop.f32.mrb[4].mxu0 }
 0x325   : > { %v869_v46 = vpack.c.bf16 %v861_v45, %v861_v45  ;;  %v2480_v47 = vpop.f32.mrb[5].mxu0 }
 0x326   : > { %v864_v48 = vpop.f32.mrb[6].mxu0 }
 0x327   : > { %1214 = vrot.lane.b32.xlu1 %v868_v19, %s3318_s7  ;;  %v2481_v49 = vpop.f32.mrb[7].mxu0  ;;  %v934_v50 = vsel %vm932_vm3, %v869_v46, 0 }
 0x328   : > { %2489 = vmatpush3.bf16.msra.mxu0 %v934_v50 }
 0x329   : > { %2500 = vmatprep.subr.bf16.mxu0 %v3314_v4 }
 0x32b   : > { %1212 = vrot.lane.b32.xlu1 %v867_v26, %s3318_s7 }
 0x391   : > { %v979_v34 = vpop.permute.xlu1 %978 }
 0x392   : > { %2497 = vmatmul.mubr.msk.bf16.vlgmr.msra.gmra.mrb[8].mxu1 %vm870_vm2, %v979_v34 }
 0x393   : > { %2507 = vmatpush3.bf16.xpose.msra.mxu1 %v1104_v35  ;;  %2508 = vmatprep.mubr.msk.bf16.mxu1 %vm3315_vm1, %v3314_v4 }
 0x394   : > { %2518 = vmatprep.subr.bf16.mxu1 %v3314_v4 }
 0x395   : > { %v1097_v36 = vpop.permute.xlu1 %1096 }
 0x399   : > { %v1215_v37 = vpop.permute.xlu1 %1214 }
 0x39a   : > { %v1220_v38 = vsel %vm870_vm2, %v1215_v37, 0  ;;  %2509 = vmatmul.mubr.msk.bf16.vlgmr.msra.gmra.mrb[12].mxu1 %vm870_vm2, %v1097_v36 }
 0x39b   : > { %2519 = vmatpush3.bf16.xpose.msra.mxu1 %v1220_v38  ;;  %2520 = vmatprep.mubr.msk.bf16.mxu1 %vm3315_vm1, %v3314_v4 }
 0x39c   : > { %2530 = vmatprep.subr.bf16.mxu1 %v3314_v4 }
 0x39d   : > { %v1213_v39 = vpop.permute.xlu1 %1212 }
 0x3a2   : > { %2521 = vmatmul.mubr.msk.bf16.vlgmr.msra.gmra.mrb[16].mxu1 %vm870_vm2, %v1213_v39 }
 0x3a3   : > { %2534 = vmatprep.mubr.msk.bf16.mxu1 %vm3315_vm1, %v3314_v4 }
 0x3f2   : > { %v911_v40 = vpop.f32.mrb[4].mxu1 }
 0x3f3   : > { %v2486_v41 = vpop.f32.mrb[5].mxu1  ;;  %v917_v42 = vsel %vm870_vm2, %v911_v40, -inf }
 0x3f4   : > { %918 = vmax.xlane.f32.xlu1 %v917_v42  ;;  %v914_v43 = vpop.f32.mrb[6].mxu1 }
 0x3f5   : > { %v2487_v44 = vpop.f32.mrb[7].mxu1 }
 0x465   : > { %v1023_v51 = vpop.f32.mrb[8].mxu1 }
 0x466   : > { %v2498_v52 = vpop.f32.mrb[9].mxu1  ;;  %v1029_v53 = vsel %vm870_vm2, %v1023_v51, -inf }
 0x467   : > { %1030 = vmax.xlane.f32.xlu0 %v1029_v53  ;;  %v1026_v54 = vpop.f32.mrb[10].mxu1 }
 0x468   : > { %v2499_v55 = vpop.f32.mrb[11].mxu1  ;;  %v2791_v54 = vld [vmem:[#allocation15] sm:$0xff]  }
 0x469   : > { %2531 = vmatpush3.bf16.msra.mxu1 %v2791_v54  ;;  %v2792_v55 = vld [vmem:[#allocation15 + $0x8] sm:$0xff]  }
 0x46a   : > { %2532 = vmatprep.subr.bf16.mxu1 %v3314_v4 }
 0x46d   : > { %v1140_v56 = vpop.f32.mrb[12].mxu1  ;;  %2533 = vmatpush3.bf16.msra.mxu1 %v2792_v55 }
 0x46e   : > { %v2510_v57 = vpop.f32.mrb[13].mxu1  ;;  %v1146_v58 = vsel %vm870_vm2, %v1140_v56, -inf  ;;  %2546 = vmatprep.subr.bf16.mxu1 %v3314_v4 }
 0x46f   : > { %1147 = vmax.xlane.f32.xlu1 %v1146_v58  ;;  %v1143_v59 = vpop.f32.mrb[14].mxu1 }
 0x470   : > { %v2511_v60 = vpop.f32.mrb[15].mxu1 }
 0x475   : > { %v1256_v61 = vpop.f32.mrb[16].mxu1 }
 0x476   : > { %v2522_v62 = vpop.f32.mrb[17].mxu1  ;;  %v1262_v63 = vsel %vm870_vm2, %v1256_v61, -inf }
 0x477   : > { %1263 = vmax.xlane.f32.xlu0 %v1262_v63  ;;  %v1259_v1 = vpop.f32.mrb[18].mxu1 }
 0x478   : > { %v2523_v2 = vpop.f32.mrb[19].mxu1 }
 0x481   : > { %v919_v3 = vpop.xlane.xlu1 %918 }
 0x482   : > { %v920_v5 = vsub.f32 %v911_v40, %v919_v3 }
 0x484   : > { %v921_v6 = vmul.f32 1.442695, %v920_v5 }
 0x486   : > { %2803 = vpow2.f32 %v921_v6 }
 0x490   : > { %v2804_v7 = vpop.eup %2803 }
 0x491   : > { %v923_v8 = vsel %vm870_vm2, %v2804_v7, 0.0 }
 0x492   : > { %924 = vadd.xlane.f32.xlu1 %v923_v8 }
 0x4a3   : > { %1042 = vrot.lane.b32.xlu1 %v869_v46, %s3316_s19 }
 0x4f4   : > { %v1031_v9 = vpop.xlane.xlu0 %1030 }
 0x4f5   : > { %v1032_v10 = vsub.f32 %v1023_v51, %v1031_v9 }
 0x4f7   : > { %v1033_v11 = vmul.f32 1.442695, %v1032_v10 }
 0x4f9   : > { %2805 = vpow2.f32 %v1033_v11 }
 0x4fc   : > { %v1148_v12 = vpop.xlane.xlu1 %1147 }
 0x4fd   : > { %v1149_v13 = vsub.f32 %v1140_v56, %v1148_v12 }
 0x4ff   : > { %v1150_v14 = vmul.f32 1.442695, %v1149_v13 }
 0x501   : > { %2807 = vpow2.f32 %v1150_v14  ;;  %v2793_v14 = vld [vmem:[#allocation20] sm:$0xff]  }
 0x503   : > { %v2806_v15 = vpop.eup %2805 }
 0x504   : > { %v1264_v16 = vpop.xlane.xlu0 %1263  ;;  %v1035_v17 = vsel %vm870_vm2, %v2806_v15, 0.0 }
 0x505   : > { %v1265_v18 = vsub.f32 %v1256_v61, %v1264_v16  ;;  %1036 = vadd.xlane.f32.xlu0 %v1035_v17  ;;  %v672_v16 = vld [vmem:[%s575_s5] sm:$0xff] }
 0x506   : > { %v673_v17 = vpack.c.bf16 %v672_v16, %v672_v16 }
 0x507   : > { %v1266_v19 = vmul.f32 1.442695, %v1265_v18  ;;  %v2796_v18 = vld [vmem:[#allocation18 + $0x8] sm:$0xff]  }
 0x509   : > { %2809 = vpow2.f32 %v1266_v19 }
 0x50b   : > { %v2808_v20 = vpop.eup %2807 }
 0x50c   : > { %v1152_v21 = vsel %vm870_vm2, %v2808_v20, 0.0 }
 0x50d   : > { %1153 = vadd.xlane.f32.xlu1 %v1152_v21 }
 0x513   : > { %v2810_v22 = vpop.eup %2809 }
 0x514   : > { %v1268_v23 = vsel %vm870_vm2, %v2810_v22, 0.0 }
 0x515   : > { %1269 = vadd.xlane.f32.xlu0 %v1268_v23  ;;  %v2377_v23 = vld [vmem:[#allocation17] ss:$0 sm:$0xff] }
 0x51e   : > { %1274 = vrot.lane.b32.xlu1 %v869_v46, %s3318_s7 }
 0x51f   : > { %v925_v24 = vpop.xlane.xlu1 %924 }
 0x520   : > { %2811 = vrcp.f32 %v925_v24 }
 0x523   : > { %v1043_v26 = vpop.permute.xlu1 %1042 }
 0x524   : > { %v1048_v29 = vsel %vm932_vm3, %v1043_v26, 0 }
 0x52a   : > { %v2812_v25 = vpop.eup %2811 }
 0x52b   : > { %v927_v27 = vmul.f32 %v2812_v25, %v2804_v7  ;;  %1158 = vrot.lane.b32.xlu0 %v869_v46, %s3317_s23 }
 0x52d   : > { %v928_v28 = vpack.c.bf16 %v927_v27, %v927_v27 }
 0x52f   : > { %2491 = vmatmul.mubr.msk.bf16.vlgmr.msra.gmra.mrb[8].mxu0 %vm870_vm2, %v928_v28 }
 0x530   : > { %2501 = vmatpush3.bf16.msra.mxu0 %v1048_v29  ;;  %2502 = vmatprep.mubr.msk.bf16.mxu0 %vm3315_vm1, %v3314_v4 }
 0x531   : > { %2512 = vmatprep.subr.bf16.mxu0 %v3314_v4 }
 0x592   : > { %v1037_v30 = vpop.xlane.xlu0 %1036 }
 0x593   : > { %2813 = vrcp.f32 %v1037_v30 }
 0x59a   : > { %v1154_v31 = vpop.xlane.xlu1 %1153 }
 0x59b   : > { %2815 = vrcp.f32 %v1154_v31 }
 0x59d   : > { %v2814_v32 = vpop.eup %2813 }
 0x59e   : > { %v1039_v33 = vmul.f32 %v2814_v32, %v2806_v15  ;;  %v1275_v40 = vpop.permute.xlu1 %1274  ;;  %v2794_v15 = vld [vmem:[#allocation20 + $0x8] sm:$0xff]  }
 0x59f   : > { %v1280_v42 = vsel %vm932_vm3, %v1275_v40, 0  ;;  %v2797_v40 = vld [vmem:[#allocation21] sm:$0xff]  }
 0x5a0   : > { %v1040_v34 = vpack.c.bf16 %v1039_v33, %v1039_v33 }
 0x5a2   : > { %2503 = vmatmul.mubr.msk.bf16.vlgmr.msra.gmra.mrb[12].mxu0 %vm870_vm2, %v1040_v34  ;;  %v1270_v35 = vpop.xlane.xlu0 %1269 }
 0x5a3   : > { %2817 = vrcp.f32 %v1270_v35  ;;  %2514 = vmatprep.mubr.msk.bf16.mxu0 %vm3315_vm1, %v3314_v4 }
 0x5a5   : > { %v2816_v36 = vpop.eup %2815 }
 0x5a6   : > { %v1156_v37 = vmul.f32 %v2816_v36, %v2808_v20  ;;  %v1159_v38 = vpop.permute.xlu0 %1158 }
 0x5a7   : > { %v1164_v39 = vsel %vm932_vm3, %v1159_v38, 0 }
 0x5a8   : > { %2513 = vmatpush3.bf16.msra.mxu0 %v1164_v39  ;;  %v1157_v41 = vpack.c.bf16 %v1156_v37, %v1156_v37 }
 0x5a9   : > { %2524 = vmatprep.subr.bf16.mxu0 %v3314_v4 }
 0x5ab   : > { %2515 = vmatmul.mubr.msk.bf16.vlgmr.msra.gmra.mrb[16].mxu0 %vm870_vm2, %v1157_v41  ;;  %v2798_v41 = vld [vmem:[#allocation21 + $0x8] sm:$0xff]  }
 0x5ac   : > { %2525 = vmatpush3.bf16.msra.mxu0 %v1280_v42  ;;  %2526 = vmatprep.mubr.msk.bf16.mxu0 %vm3315_vm1, %v3314_v4 }
 0x5ad   : > { %v2818_v43 = vpop.eup %2817  ;;  %2538 = vmatprep.subr.bf16.mxu0 %v3314_v4 }
 0x5ae   : > { %v1272_v44 = vmul.f32 %v2818_v43, %v2810_v22 }
 0x5b0   : > { %v1273_v45 = vpack.c.bf16 %v1272_v44, %v1272_v44 }
 0x5b3   : > { %2527 = vmatmul.mubr.msk.bf16.vlgmr.msra.gmra.mrb[20].mxu0 %vm870_vm2, %v1273_v45 }
 0x5b4   : > { %2542 = vmatprep.mubr.msk.bf16.mxu0 %vm3315_vm1, %v3314_v4 }
 0x602   : > { %v970_v46 = vpop.f32.mrb[8].mxu0 }
 0x603   : > { %976 = vst.msk [vmem:[#allocation2] sm:$0xff] %vm870_vm2, %v970_v46  ;;  %v2492_v47 = vpop.f32.mrb[9].mxu0 }
 0x604   : > { %v973_v48 = vpop.f32.mrb[10].mxu0 }
 0x605   : > { %v2493_v49 = vpop.f32.mrb[11].mxu0 }
 0x675   : > { %v1084_v50 = vpop.f32.mrb[12].mxu0 }
 0x676   : > { %1091 = vrot.lane.b32.xlu1 %v1084_v50, %s3319_s28  ;;  %v2504_v51 = vpop.f32.mrb[13].mxu0 }
 0x677   : > { %v1087_v52 = vpop.f32.mrb[14].mxu0 }
 0x678   : > { %v2505_v53 = vpop.f32.mrb[15].mxu0 }
 0x67e   : > { %v1200_v56 = vpop.f32.mrb[16].mxu0 }
 0x67f   : > { %1207 = vrot.lane.b32.xlu0 %v1200_v56, %s3320_s11  ;;  %v2516_v57 = vpop.f32.mrb[17].mxu0 }
 0x680   : > { %v1203_v58 = vpop.f32.mrb[18].mxu0 }
 0x681   : > { %v2517_v59 = vpop.f32.mrb[19].mxu0 }
 0x686   : > { %v1316_v60 = vpop.f32.mrb[20].mxu0 }
 0x687   : > { %1323 = vrot.lane.b32.xlu1 %v1316_v60, %s3321_s25  ;;  %v2528_v61 = vpop.f32.mrb[21].mxu0 }
 0x688   : > { %v1319_v62 = vpop.f32.mrb[22].mxu0 }
 0x689   : > { %v2529_v63 = vpop.f32.mrb[23].mxu0 }
 0x6e8   : > { %v1092_v1 = vpop.permute.xlu1 %1091 }
 0x6e9   : > { %1095 = vst.msk [vmem:[#allocation2] sm:$0xff] %vm1094_vm4, %v1092_v1 }
 0x6f1   : > { %v1208_v2 = vpop.permute.xlu0 %1207 }
 0x6f2   : > { %1211 = vst.msk [vmem:[#allocation2] sm:$0xff] %vm1210_vm5, %v1208_v2 }
 0x6f9   : > { %v1324_v3 = vpop.permute.xlu1 %1323 }
 0x6fa   : > { %1327 = vst.msk [vmem:[#allocation2] sm:$0xff] %vm1326_vm6, %v1324_v3 }
 0x701   : > { %v1328_v5 = vld [vmem:[#allocation2] sm:$0xff] }
 0x702   : > { %v1329_v6 = vpack.c.bf16 %v1328_v5, %v1328_v5 }
 0x704   : > { %2535 = vmatmul.mubr.msk.bf16.vlgmr.msra.gmra.mrb[20].mxu1 %vm676_vm0, %v1329_v6 }
 0x705   : > { %2550 = vmatprep.mubr.msk.bf16.mxu1 %vm3315_vm1, %v3314_v4  ;;  %2547 = vmatpush3.bf16.msra.mxu1 %v2793_v14 }
 0x706   : > { %2548 = vmatprep.subr.bf16.mxu1 %v3314_v4 }
 0x709   : > { %2549 = vmatpush3.bf16.msra.mxu1 %v2794_v15 }
 0x70a   : > { %2562 = vmatprep.subr.bf16.mxu1 %v3314_v4 }
 0x70c   : > { %2551 = vmatmul.mubr.msk.bf16.vlgmr.msra.gmra.mrb[24].mxu1 %vm676_vm0, %v673_v17 }
 0x70d   : > { %2564 = vmatprep.mubr.msk.bf16.mxu1 %vm3315_vm1, %v3314_v4 }
 0x7d7   : > { %v1383_v7 = vpop.f32.mrb[20].mxu1 }
 0x7d8   : > { %v3936_v8 = vadd.f32 %v1383_v7, %v3839_v0  ;;  %v2536_v9 = vpop.f32.mrb[21].mxu1  ;;  %v2795_v0 = vld [vmem:[#allocation18] sm:$0xff]  }
 0x7d9   : > { %v1386_v10 = vpop.f32.mrb[22].mxu1  ;;  %2539 = vmatpush3.bf16.msra.mxu0 %v2795_v0 }
 0x7da   : > { %v2537_v11 = vpop.f32.mrb[23].mxu1  ;;  %v1391_v12 = vmul.f32 %v3936_v8, %v3936_v8  ;;  %2540 = vmatprep.subr.bf16.mxu0 %v3314_v4 }
 0x7dc   : > { %v1392_v13 = vsel %vm676_vm0, %v1391_v12, 0.0 }
 0x7dd   : > { %1393 = vadd.xlane.f32.xlu0 %v1392_v13  ;;  %2541 = vmatpush3.bf16.msra.mxu0 %v2796_v18 }
 0x7de   : > { %2554 = vmatprep.subr.bf16.mxu0 %v3314_v4 }
 0x7df   : > { %v1519_v27 = vpop.f32.mrb[24].mxu1 }
 0x7e0   : > { %v1582_v28 = vpack.c.bf16 %v1519_v27, %v1519_v27  ;;  %v2552_v29 = vpop.f32.mrb[25].mxu1 }
 0x7e1   : > { %v1522_v30 = vpop.f32.mrb[26].mxu1 }
 0x7e2   : > { %1693 = vrot.lane.b32.xlu1 %v1582_v28, %s3316_s19  ;;  %v2553_v31 = vpop.f32.mrb[27].mxu1  ;;  %v1588_v32 = vsel %vm870_vm2, %v1582_v28, 0 }
 0x7e3   : > { %2563 = vmatpush3.bf16.xpose.msra.mxu1 %v1588_v32 }
 0x7e4   : > { %2574 = vmatprep.subr.bf16.mxu1 %v3314_v4 }
 0x7e6   : > { %1809 = vrot.lane.b32.xlu1 %v1582_v28, %s3317_s23 }
 0x854   : > { %v1694_v34 = vpop.permute.xlu1 %1693 }
 0x855   : > { %v1699_v37 = vsel %vm870_vm2, %v1694_v34, 0 }
 0x858   : > { %v1810_v42 = vpop.permute.xlu1 %1809 }
 0x859   : > { %v1815_v44 = vsel %vm870_vm2, %v1810_v42, 0 }
 0x86a   : > { %v1394_v19 = vpop.xlane.xlu0 %1393 }
 0x86b   : > { %v1395_v20 = vmul.f32 0.03125, %v1394_v19 }
 0x86d   : > { %v1396_v21 = vadd.f32 1e-06, %v1395_v20 }
 0x86f   : > { %2819 = vrsqrt.f32 %v1396_v21 }
 0x879   : > { %v2820_v22 = vpop.eup %2819 }
 0x87a   : > { %v1398_v24 = vmul.f32 %v2820_v22, %v3936_v8 }
 0x87c   : > { %v1405_v25 = vmul.f32 %v2377_v23, %v1398_v24 }
 0x87e   : > { %v1406_v26 = vpack.c.bf16 %v1405_v25, %v1405_v25 }
 0x880   : > { %2543 = vmatmul.mubr.msk.bf16.vlgmr.msra.gmra.mrb[24].mxu0 %vm676_vm0, %v1406_v26 }
 0x881   : > { %2558 = vmatprep.mubr.msk.bf16.mxu0 %vm3315_vm1, %v3314_v4  ;;  %2555 = vmatpush3.bf16.msra.mxu0 %v2797_v40 }
 0x882   : > { %2556 = vmatprep.subr.bf16.mxu0 %v3314_v4 }
 0x885   : > { %2557 = vmatpush3.bf16.msra.mxu0 %v2798_v41 }
 0x886   : > { %2568 = vmatprep.subr.bf16.mxu0 %v3314_v4 }
 0x888   : > { %2559 = vmatmul.mubr.msk.bf16.vlgmr.msra.gmra.mrb[28].mxu0 %vm676_vm0, %v673_v17 }
 0x889   : > { %2570 = vmatprep.mubr.msk.bf16.mxu0 %vm3315_vm1, %v3314_v4 }
 0x953   : > { %v1460_v33 = vpop.f32.mrb[24].mxu0 }
 0x954   : > { %v1581_v35 = vpack.c.bf16 %v1460_v33, %v1460_v33  ;;  %v2544_v36 = vpop.f32.mrb[25].mxu0 }
 0x955   : > { %v1463_v38 = vpop.f32.mrb[26].mxu0 }
 0x956   : > { %v2545_v39 = vpop.f32.mrb[27].mxu0  ;;  %1690 = vrot.lane.b32.xlu1 %v1581_v35, %s3316_s19  ;;  %2565 = vmatmul.mubr.msk.bf16.vlgmr.msra.gmra.mrb[28].mxu1 %vm870_vm2, %v1581_v35 }
 0x957   : > { %2575 = vmatpush3.bf16.xpose.msra.mxu1 %v1699_v37  ;;  %2576 = vmatprep.mubr.msk.bf16.mxu1 %vm3315_vm1, %v3314_v4 }
 0x958   : > { %2586 = vmatprep.subr.bf16.mxu1 %v3314_v4 }
 0x95a   : > { %1807 = vrot.lane.b32.xlu1 %v1581_v35, %s3317_s23 }
 0x95b   : > { %v1575_v13 = vpop.f32.mrb[28].mxu0 }
 0x95c   : > { %v1583_v14 = vpack.c.bf16 %v1575_v13, %v1575_v13  ;;  %v2560_v15 = vpop.f32.mrb[29].mxu0 }
 0x95d   : > { %v1578_v16 = vpop.f32.mrb[30].mxu0 }
 0x95e   : > { %1924 = vrot.lane.b32.xlu1 %v1582_v28, %s3318_s7  ;;  %v1646_v17 = vsel %vm932_vm3, %v1583_v14, 0  ;;  %v2561_v0 = vpop.f32.mrb[31].mxu0 }
 0x95f   : > { %2569 = vmatpush3.bf16.msra.mxu0 %v1646_v17 }
 0x960   : > { %2580 = vmatprep.subr.bf16.mxu0 %v3314_v4 }
 0x962   : > { %1922 = vrot.lane.b32.xlu1 %v1581_v35, %s3318_s7 }
 0x9c8   : > { %v1691_v43 = vpop.permute.xlu1 %1690 }
 0x9c9   : > { %2577 = vmatmul.mubr.msk.bf16.vlgmr.msra.gmra.mrb[32].mxu1 %vm870_vm2, %v1691_v43 }
 0x9ca   : > { %2587 = vmatpush3.bf16.xpose.msra.mxu1 %v1815_v44  ;;  %2588 = vmatprep.mubr.msk.bf16.mxu1 %vm3315_vm1, %v3314_v4 }
 0x9cb   : > { %2598 = vmatprep.subr.bf16.mxu1 %v3314_v4 }
 0x9cc   : > { %v1808_v45 = vpop.permute.xlu1 %1807 }
 0x9d0   : > { %v1925_v46 = vpop.permute.xlu1 %1924 }
 0x9d1   : > { %v1930_v47 = vsel %vm870_vm2, %v1925_v46, 0  ;;  %2589 = vmatmul.mubr.msk.bf16.vlgmr.msra.gmra.mrb[36].mxu1 %vm870_vm2, %v1808_v45 }
 0x9d2   : > { %2599 = vmatpush3.bf16.xpose.msra.mxu1 %v1930_v47  ;;  %2600 = vmatprep.mubr.msk.bf16.mxu1 %vm3315_vm1, %v3314_v4 }
 0x9d3   : > { %2610 = vmatprep.subr.bf16.mxu1 %v3314_v4 }
 0x9d4   : > { %v1923_v48 = vpop.permute.xlu1 %1922 }
 0x9d9   : > { %2601 = vmatmul.mubr.msk.bf16.vlgmr.msra.gmra.mrb[40].mxu1 %vm870_vm2, %v1923_v48 }
 0x9da   : > { %2614 = vmatprep.mubr.msk.bf16.mxu1 %vm3315_vm1, %v3314_v4 }
 0xa29   : > { %v1624_v49 = vpop.f32.mrb[28].mxu1 }
 0xa2a   : > { %v2566_v50 = vpop.f32.mrb[29].mxu1  ;;  %v1630_v51 = vsel %vm870_vm2, %v1624_v49, -inf }
 0xa2b   : > { %1631 = vmax.xlane.f32.xlu1 %v1630_v51  ;;  %v1627_v52 = vpop.f32.mrb[30].mxu1 }
 0xa2c   : > { %v2567_v53 = vpop.f32.mrb[31].mxu1 }
 0xa3c   : > { %1869 = vrot.lane.b32.xlu1 %v1583_v14, %s3317_s23 }
 0xa40   : > { %1984 = vrot.lane.b32.xlu1 %v1583_v14, %s3318_s7 }
 0xa9c   : > { %v1735_v54 = vpop.f32.mrb[32].mxu1 }
 0xa9d   : > { %v2578_v55 = vpop.f32.mrb[33].mxu1  ;;  %v1741_v56 = vsel %vm870_vm2, %v1735_v54, -inf }
 0xa9e   : > { %1742 = vmax.xlane.f32.xlu0 %v1741_v56  ;;  %v1738_v57 = vpop.f32.mrb[34].mxu1 }
 0xa9f   : > { %v2579_v58 = vpop.f32.mrb[35].mxu1 }
 0xaa4   : > { %v1851_v59 = vpop.f32.mrb[36].mxu1 }
 0xaa5   : > { %v2590_v60 = vpop.f32.mrb[37].mxu1  ;;  %v1857_v61 = vsel %vm870_vm2, %v1851_v59, -inf }
 0xaa6   : > { %1858 = vmax.xlane.f32.xlu0 %v1857_v61  ;;  %v1854_v62 = vpop.f32.mrb[38].mxu1 }
 0xaa7   : > { %v2591_v63 = vpop.f32.mrb[39].mxu1 }
 0xaa8   : > { %v2799_v63 = vld [vmem:[#allocation23] sm:$0xff]  }
 0xaa9   : > { %2611 = vmatpush3.bf16.msra.mxu1 %v2799_v63 }
 0xaaa   : > { %2612 = vmatprep.subr.bf16.mxu1 %v3314_v4 }
 0xaac   : > { %v1966_v1 = vpop.f32.mrb[40].mxu1 }
 0xaad   : > { %v2602_v2 = vpop.f32.mrb[41].mxu1  ;;  %v1972_v3 = vsel %vm870_vm2, %v1966_v1, -inf }
 0xaae   : > { %1973 = vmax.xlane.f32.xlu0 %v1972_v3  ;;  %v1969_v5 = vpop.f32.mrb[42].mxu1 }
 0xaaf   : > { %v2603_v6 = vpop.f32.mrb[43].mxu1 }
 0xab8   : > { %v1632_v7 = vpop.xlane.xlu1 %1631 }
 0xab9   : > { %v1633_v9 = vsub.f32 %v1624_v49, %v1632_v7 }
 0xabb   : > { %v1634_v10 = vmul.f32 1.442695, %v1633_v9 }
 0xabc   : > { %v1870_v46 = vpop.permute.xlu1 %1869 }
 0xabd   : > { %2821 = vpow2.f32 %v1634_v10  ;;  %v1875_v47 = vsel %vm932_vm3, %v1870_v46, 0 }
 0xac0   : > { %v1985_v49 = vpop.permute.xlu1 %1984 }
 0xac1   : > { %v1990_v52 = vsel %vm932_vm3, %v1985_v49, 0 }
 0xac7   : > { %v2822_v11 = vpop.eup %2821 }
 0xac8   : > { %v1636_v12 = vsel %vm870_vm2, %v2822_v11, 0.0 }
 0xac9   : > { %1637 = vadd.xlane.f32.xlu0 %v1636_v12 }
 0xb2b   : > { %v1743_v18 = vpop.xlane.xlu0 %1742 }
 0xb2c   : > { %v1744_v19 = vsub.f32 %v1735_v54, %v1743_v18 }
 0xb2e   : > { %v1745_v20 = vmul.f32 1.442695, %v1744_v19 }
 0xb30   : > { %2823 = vpow2.f32 %v1745_v20 }
 0xb33   : > { %v1859_v21 = vpop.xlane.xlu0 %1858 }
 0xb34   : > { %v1860_v22 = vsub.f32 %v1851_v59, %v1859_v21 }
 0xb36   : > { %v1861_v23 = vmul.f32 1.442695, %v1860_v22 }
 0xb38   : > { %2825 = vpow2.f32 %v1861_v23 }
 0xb3a   : > { %v2824_v24 = vpop.eup %2823 }
 0xb3b   : > { %v1974_v25 = vpop.xlane.xlu0 %1973  ;;  %v1747_v26 = vsel %vm870_vm2, %v2824_v24, 0.0 }
 0xb3c   : > { %v1975_v27 = vsub.f32 %v1966_v1, %v1974_v25  ;;  %1748 = vadd.xlane.f32.xlu0 %v1747_v26  ;;  %v2800_v1 = vld [vmem:[#allocation23 + $0x8] sm:$0xff]  }
 0xb3d   : > { %2613 = vmatpush3.bf16.msra.mxu1 %v2800_v1 }
 0xb3e   : > { %v1976_v28 = vmul.f32 1.442695, %v1975_v27 }
 0xb40   : > { %2827 = vpow2.f32 %v1976_v28 }
 0xb42   : > { %v2826_v29 = vpop.eup %2825 }
 0xb43   : > { %v1863_v30 = vsel %vm870_vm2, %v2826_v29, 0.0 }
 0xb44   : > { %1864 = vadd.xlane.f32.xlu0 %v1863_v30 }
 0xb4a   : > { %v2828_v31 = vpop.eup %2827 }
 0xb4b   : > { %v1978_v32 = vsel %vm870_vm2, %v2828_v31, 0.0 }
 0xb4c   : > { %1979 = vadd.xlane.f32.xlu0 %v1978_v32 }
 0xb56   : > { %v1638_v33 = vpop.xlane.xlu0 %1637 }
 0xb57   : > { %2829 = vrcp.f32 %v1638_v33 }
 0xb61   : > { %v2830_v34 = vpop.eup %2829 }
 0xb62   : > { %v1640_v35 = vmul.f32 %v2830_v34, %v2822_v11  ;;  %1754 = vrot.lane.b32.xlu0 %v1583_v14, %s3316_s19 }
 0xb64   : > { %v1641_v36 = vpack.c.bf16 %v1640_v35, %v1640_v35 }
 0xb66   : > { %2571 = vmatmul.mubr.msk.bf16.vlgmr.msra.gmra.mrb[32].mxu0 %vm870_vm2, %v1641_v36 }
 0xb67   : > { %2582 = vmatprep.mubr.msk.bf16.mxu0 %vm3315_vm1, %v3314_v4 }
 0xbc9   : > { %v1749_v37 = vpop.xlane.xlu0 %1748 }
 0xbca   : > { %2831 = vrcp.f32 %v1749_v37 }
 0xbd1   : > { %v1865_v38 = vpop.xlane.xlu0 %1864 }
 0xbd2   : > { %2833 = vrcp.f32 %v1865_v38 }
 0xbd4   : > { %v2832_v39 = vpop.eup %2831 }
 0xbd5   : > { %v1751_v41 = vmul.f32 %v2832_v39, %v2824_v24 }
 0xbd7   : > { %v1752_v44 = vpack.c.bf16 %v1751_v41, %v1751_v41 }
 0xbd9   : > { %v1980_v40 = vpop.xlane.xlu0 %1979 }
 0xbda   : > { %2835 = vrcp.f32 %v1980_v40 }
 0xbdc   : > { %v2834_v45 = vpop.eup %2833 }
 0xbdd   : > { %v1755_v42 = vpop.permute.xlu0 %1754  ;;  %v1867_v48 = vmul.f32 %v2834_v45, %v2826_v29 }
 0xbde   : > { %v1760_v43 = vsel %vm932_vm3, %v1755_v42, 0 }
 0xbdf   : > { %2581 = vmatpush3.bf16.msra.mxu0 %v1760_v43  ;;  %v1868_v50 = vpack.c.bf16 %v1867_v48, %v1867_v48 }
 0xbe0   : > { %2592 = vmatprep.subr.bf16.mxu0 %v3314_v4 }
 0xbe2   : > { %2583 = vmatmul.mubr.msk.bf16.vlgmr.msra.gmra.mrb[36].mxu0 %vm870_vm2, %v1752_v44 }
 0xbe3   : > { %2593 = vmatpush3.bf16.msra.mxu0 %v1875_v47  ;;  %2594 = vmatprep.mubr.msk.bf16.mxu0 %vm3315_vm1, %v3314_v4 }
 0xbe4   : > { %2604 = vmatprep.subr.bf16.mxu0 %v3314_v4  ;;  %v2836_v51 = vpop.eup %2835 }
 0xbe5   : > { %v1982_v53 = vmul.f32 %v2836_v51, %v2828_v31 }
 0xbe7   : > { %v1983_v54 = vpack.c.bf16 %v1982_v53, %v1982_v53 }
 0xbea   : > { %2595 = vmatmul.mubr.msk.bf16.vlgmr.msra.gmra.mrb[40].mxu0 %vm870_vm2, %v1868_v50 }
 0xbeb   : > { %2605 = vmatpush3.bf16.msra.mxu0 %v1990_v52  ;;  %2606 = vmatprep.mubr.msk.bf16.mxu0 %vm3315_vm1, %v3314_v4 }
 0xbf2   : > { %2607 = vmatmul.mubr.msk.bf16.vlgmr.msra.gmra.mrb[44].mxu0 %vm870_vm2, %v1983_v54 }
 0xc39   : > { %v1682_v55 = vpop.f32.mrb[32].mxu0 }
 0xc3a   : > { %1688 = vst.msk [vmem:[#allocation2] sm:$0xff] %vm870_vm2, %v1682_v55  ;;  %v2572_v56 = vpop.f32.mrb[33].mxu0 }
 0xc3b   : > { %v1685_v57 = vpop.f32.mrb[34].mxu0 }
 0xc3c   : > { %v2573_v58 = vpop.f32.mrb[35].mxu0 }
 0xcb5   : > { %v1796_v59 = vpop.f32.mrb[36].mxu0 }
 0xcb6   : > { %1803 = vrot.lane.b32.xlu0 %v1796_v59, %s3319_s28  ;;  %v2584_v60 = vpop.f32.mrb[37].mxu0 }
 0xcb7   : > { %v1799_v61 = vpop.f32.mrb[38].mxu0 }
 0xcb8   : > { %v2585_v62 = vpop.f32.mrb[39].mxu0 }
 0xcbd   : > { %v1911_v2 = vpop.f32.mrb[40].mxu0 }
 0xcbe   : > { %1918 = vrot.lane.b32.xlu1 %v1911_v2, %s3320_s11  ;;  %v2596_v3 = vpop.f32.mrb[41].mxu0 }
 0xcbf   : > { %v1914_v5 = vpop.f32.mrb[42].mxu0 }
 0xcc0   : > { %v2597_v6 = vpop.f32.mrb[43].mxu0 }
 0xcc5   : > { %v2026_v7 = vpop.f32.mrb[44].mxu0 }
 0xcc6   : > { %2033 = vrot.lane.b32.xlu0 %v2026_v7, %s3321_s25  ;;  %v2608_v9 = vpop.f32.mrb[45].mxu0 }
 0xcc7   : > { %v2029_v10 = vpop.f32.mrb[46].mxu0 }
 0xcc8   : > { %v2609_v11 = vpop.f32.mrb[47].mxu0 }
 0xd28   : > { %v1804_v12 = vpop.permute.xlu0 %1803 }
 0xd29   : > { %1806 = vst.msk [vmem:[#allocation2] sm:$0xff] %vm1094_vm4, %v1804_v12 }
 0xd30   : > { %v1919_v13 = vpop.permute.xlu1 %1918 }
 0xd31   : > { %1921 = vst.msk [vmem:[#allocation2] sm:$0xff] %vm1210_vm5, %v1919_v13 }
 0xd38   : > { %v2034_v4 = vpop.permute.xlu0 %2033 }
 0xd39   : > { %2036 = vst.msk [vmem:[#allocation2] sm:$0xff] %vm1326_vm6, %v2034_v4 }
 0xd40   : > { %v2037_v14 = vld [vmem:[#allocation2] sm:$0xff] }
 0xd41   : > { %v2038_v15 = vpack.c.bf16 %v2037_v14, %v2037_v14 }
 0xd43   : > { %2615 = vmatmul.mubr.msk.bf16.vlgmr.msra.gmra.mrb[44].mxu1 %vm676_vm0, %v2038_v15 }
 0xe16   : > { %v2092_v16 = vpop.f32.mrb[44].mxu1 }
 0xe17   : > { %v2098_v17 = vadd.f32 %v2092_v16, %v3936_v8  ;;  %v2616_v0 = vpop.f32.mrb[45].mxu1 }
 0xe18   : > { %v2095_v18 = vpop.f32.mrb[46].mxu1 }
 0xe19   : > { %v2617_v19 = vpop.f32.mrb[47].mxu1  ;;  %2099 = vst.msk [vmem:[%s667_s29] sm:$0xff] %vm676_vm0, %v2098_v17 }
 0xe1a   : > { %3220 = shalt.err (!%p3217_p5)
}
 0xe1b   : > { %s3221_s9 = scalar_lea.hbm %s4028_s22, 128  ;;  %s3225_s5 = scalar_lea.hbm %s4168_s1, 256 }
 0xe1c   : > { %p3222_p7 = scmp.ne.s32.totalorder %s4028_s22, %s3221_s9  ;;  %p3226_p6 = scmp.lt.u32.totalorder %s4028_s22, %s4168_s1 }
 0xe1d   : > { %p3227_p3 = scmp.lt.u32.totalorder %s3225_s5, %s3221_s9  ;;  %p3229_p11 = scmp.lt.u32.totalorder %s3221_s9, %s4028_s22 }
 0xe1e   : > { %p3223_p8 = pnand %p3222_p7, %p4169_p12 }
 0xe1f   : > { %p3228_p4 = por %p3227_p3, %p3226_p6 }
 0xe20   : > { %p3224_p9 = pneg %p3223_p8 }
 0xe21   : > { %p3230_p2 = por %p3229_p11, %p3228_p4 }
 0xe23   : > { %p3231_p13 = pnand %p3230_p2, %p3224_p9 }
 0xe25   : > { %3234 = shalt.err (!%p3231_p13)
}
 0xe26   : > { %2664 = dma.vmem_to_hbm [thread:$0]  (%p4169_p12), %s4030_s17, 128, %s4028_s22, %s2101_s14  }
 0xe27 PF: > { %s4170_s7 = sld [smem:[#allocation33_spill]]  ;;  %s4171_s28 = sld [smem:[#allocation38_spill]] }
 0xe28   : > { %s4172_s11 = sld [smem:[#allocation34_spill]] }
 0xe2d   : > { %s2126_s25 = sand.u32 1, %s4170_s7   ;;  %p4173_p10 = scmp.ne.s32.totalorder %s4171_s28, 0 }
 0xe2e   : > { %p4174_p1 = scmp.ge.s32.totalorder %s4172_s11, 2  ;;  %s2127_s0 = scalar_lea.sflag [#allocation5], %s2126_s25 }
 0xe30   : > { %p2708_p0 = pnand %p4174_p1, %p4173_p10 }
 0xe32   : > { %3280 = dma.done.wait (!%p2708_p0), %s2127_s0, 128  }
 0xe33   : > { %3282 = vsyncadd (!%p2708_p0), %s2127_s0, 4294967168  ;;  %s4175_s28 = sld [smem:[#allocation36_spill]]  ;;  %s4176_s29 = sld [smem:[#allocation37_spill]] }
 0xe34   : > { %s4177_s25 = smov %s3289_s26  ;;  %s4178_s26 = smov %s3293_s27 }
 0xe39   : > { %p34_p5 = scmp.ge.s32.totalorder %s4175_s28, 4   ;;  %s4179_s27 = smov %s4176_s29 }
 0xe3b   :  { %36 = sbr.rel (!%p34_p5) target bundleno = 23 (0x17), region = 181 }
 0xe42   :  { %2132 = vsyncpa [#allocation4], 1 }
 0xe43   :  { %2134 = vsyncpa [#allocation4 + $0x1], 1 }
 0xe44   :  { %2135 = vsyncpa [#allocation7], 1 }
 0xe45   :  { %2137 = vsyncpa [#allocation7 + $0x1], 1 }
 0xe46   :  { %2138 = vsyncpa [#allocation10], 1 }
 0xe47   :  { %2139 = vsyncpa [#allocation13], 1 }
 0xe48   :  { %2140 = vsyncpa [#allocation16], 1 }
 0xe49   :  { %2141 = vsyncpa [#allocation19], 1 }
 0xe4a   :  { %2142 = vsyncpa [#allocation22], 1 }
 0xe4b   :  { %2143 = vsyncpa [#allocation5], 1 }
 0xe4c   :  { %2145 = vsyncpa [#allocation5 + $0x1], 1 }

</bundles_post_ra>
